<compile_context>
chip_gen: v5e
topology: v5e:2x2
jax: 0.10.0
libtpu: 0.0.40
codegen_flags: <defaults>
</compile_context>

<pallas_src>
import jax
import jax.numpy as jnp
from jax.experimental import pallas as pl
from jax.experimental.pallas import tpu as pltpu

_PAD = 8  # sublane-aligned column offset of the intermediate's interior


def _double_conv_kernel(x_ref, w1_ref, b1_ref, w2_ref, b2_ref, o_ref,
                        p1_ref, mid_ref, p2_ref):
    # x_ref  : (1, H+2, W+2, Cin)  zero-padded input, one batch element (f32)
    # w1_ref : (9*Cin, Cmid)       BN-scale-folded conv1 weights (bf16)
    # b1_ref : (1, Cmid)           folded BN1 shift (f32)
    # w2_ref : (9*Cmid, Cout)      BN-scale-folded conv2 weights (bf16)
    # b2_ref : (1, Cout)           folded BN2 shift (f32)
    # o_ref  : (1, H, W, Cout)
    # p1_ref : VMEM (H*W, 9*Cin)   im2col patch matrix for conv1
    # mid_ref: VMEM (H+2, W+_PAD+1, Cmid) zero-bordered intermediate
    # p2_ref : VMEM (H*W, 9*Cmid)  im2col patch matrix for conv2
    H = o_ref.shape[1]
    W = o_ref.shape[2]
    cin = x_ref.shape[-1]
    cmid = mid_ref.shape[-1]
    cout = o_ref.shape[-1]

    # Zero the padded intermediate scratch once; scratch persists across grid
    # steps, its border is never written again and its interior is fully
    # overwritten below on every step.
    @pl.when(pl.program_id(0) == 0)
    def _():
        mid_ref[...] = jnp.zeros(mid_ref.shape, mid_ref.dtype)

    # ---- conv1 (3x3, pad=1) + folded-BN shift + ReLU: im2col + one MXU dot ----
    for kh in range(3):
        for kw in range(3):
            t = kh * 3 + kw
            tap = x_ref[0, kh:kh + H, kw:kw + W, :].reshape(H * W, cin)
            p1_ref[:, t * cin:(t + 1) * cin] = tap
    acc1 = jnp.dot(p1_ref[...].astype(jnp.bfloat16), w1_ref[...],
                   preferred_element_type=jnp.float32)
    y1 = jnp.maximum(acc1 + b1_ref[...], 0.0)      # BN1 scale already in w1

    # Write intermediate at a sublane-aligned column offset (_PAD); the 1-pixel
    # zero halo lives at columns _PAD-1 and _PAD+W and rows 0 / H+1.
    mid_ref[1:H + 1, _PAD:_PAD + W, :] = y1.reshape(H, W, cmid)

    # ---- conv2 (3x3, pad=1) + folded-BN shift + ReLU: im2col + one MXU dot ----
    for kh in range(3):
        for kw in range(3):
            t = kh * 3 + kw
            c0 = _PAD - 1 + kw
            tap = mid_ref[kh:kh + H, c0:c0 + W, :].reshape(H * W, cmid)
            p2_ref[:, t * cmid:(t + 1) * cmid] = tap
    acc2 = jnp.dot(p2_ref[...].astype(jnp.bfloat16), w2_ref[...],
                   preferred_element_type=jnp.float32)
    y2 = jnp.maximum(acc2 + b2_ref[...], 0.0)      # BN2 scale already in w2

    o_ref[...] = y2.reshape(1, H, W, cout).astype(o_ref.dtype)


def _fold_bn(gamma, beta, mean, var, eps=1e-5):
    scale = gamma / jnp.sqrt(var + eps)
    shift = beta - mean * scale
    return scale, shift


def double_conv(x_nchw, w1, g1, be1, m1, v1, w2, g2, be2, m2, v2, eps=1e-5):
    """x_nchw: (N, Cin, H, W) float32 (PyTorch layout). Returns (N, Cout, H, W)."""
    N, Cin, H, W = x_nchw.shape
    Cmid = w1.shape[0]   # PyTorch weight layout: (Cout, Cin, KH, KW)
    Cout = w2.shape[0]

    # Glue (done once, in JAX): layout conversion, BN folding, zero padding.
    x_nhwc = jnp.transpose(x_nchw, (0, 2, 3, 1))
    x_pad = jnp.pad(x_nhwc, ((0, 0), (1, 1), (1, 1), (0, 0)))

    s1, b1 = _fold_bn(g1, be1, m1, v1, eps)
    s2, b2 = _fold_bn(g2, be2, m2, v2, eps)

    # Fold BN scale into the (bias-free) conv weights and reshape HWIO ->
    # (9*C_in, C_out) so the contraction dim matches the kernel's im2col column
    # order (kh, kw, ci). Cast to bf16 for the MXU.
    w1_mat = (jnp.transpose(w1, (2, 3, 1, 0)) * s1).reshape(9 * Cin, Cmid)
    w2_mat = (jnp.transpose(w2, (2, 3, 1, 0)) * s2).reshape(9 * Cmid, Cout)
    w1_mat = w1_mat.astype(jnp.bfloat16)
    w2_mat = w2_mat.astype(jnp.bfloat16)
    b1 = b1.reshape(1, Cmid).astype(jnp.float32)
    b2 = b2.reshape(1, Cout).astype(jnp.float32)

    out_nhwc = pl.pallas_call(
        _double_conv_kernel,
        out_shape=jax.ShapeDtypeStruct((N, H, W, Cout), jnp.float32),
        grid_spec=pltpu.PrefetchScalarGridSpec(
            num_scalar_prefetch=0,
            grid=(N,),
            in_specs=[
                pl.BlockSpec((1, H + 2, W + 2, Cin), lambda n: (n, 0, 0, 0)),
                pl.BlockSpec((9 * Cin, Cmid), lambda n: (0, 0)),
                pl.BlockSpec((1, Cmid), lambda n: (0, 0)),
                pl.BlockSpec((9 * Cmid, Cout), lambda n: (0, 0)),
                pl.BlockSpec((1, Cout), lambda n: (0, 0)),
            ],
            out_specs=pl.BlockSpec((1, H, W, Cout), lambda n: (n, 0, 0, 0)),
            scratch_shapes=[
                pltpu.VMEM((H * W, 9 * Cin), jnp.float32),              # im2col 1
                pltpu.VMEM((H + 2, W + _PAD + 1, Cmid), jnp.float32),   # padded mid
                pltpu.VMEM((H * W, 9 * Cmid), jnp.float32),             # im2col 2
            ],
        ),
        compiler_params=pltpu.CompilerParams(
            dimension_semantics=("parallel",)),
    )(x_pad, w1_mat, b1, w2_mat, b2)

    return jnp.transpose(out_nhwc, (0, 3, 1, 2))


def _reference(x_nchw, w1, g1, be1, m1, v1, w2, g2, be2, m2, v2, eps=1e-5):
    def conv_bn_relu(x, w, g, be, m, v):
        y = jax.lax.conv_general_dilated(
            x, w, window_strides=(1, 1), padding=((1, 1), (1, 1)),
            dimension_numbers=("NCHW", "OIHW", "NCHW"))
        s = (g / jnp.sqrt(v + eps)).reshape(1, -1, 1, 1)
        b = (be - m * g / jnp.sqrt(v + eps)).reshape(1, -1, 1, 1)
        return jnp.maximum(y * s + b, 0.0)
    y = conv_bn_relu(x_nchw, w1, g1, be1, m1, v1)
    return conv_bn_relu(y, w2, g2, be2, m2, v2)


if __name__ == "__main__":
    N, Cin, H, W = 2, 4, 16, 16
    Cmid = Cout = 8   # mid_channels defaults to out_channels

    key = jax.random.PRNGKey(0)
    ks = jax.random.split(key, 11)

    x = jax.random.normal(ks[0], (N, Cin, H, W), jnp.float32)

    # Conv weights, PyTorch OIHW layout, no bias (bias=False in the module).
    w1 = jax.random.normal(ks[1], (Cmid, Cin, 3, 3), jnp.float32) / jnp.sqrt(9.0 * Cin)
    w2 = jax.random.normal(ks[2], (Cout, Cmid, 3, 3), jnp.float32) / jnp.sqrt(9.0 * Cmid)

    # BatchNorm affine params + running stats (deterministic synthetic init).
    g1 = jax.random.uniform(ks[3], (Cmid,), jnp.float32, 0.5, 1.5)
    be1 = 0.1 * jax.random.normal(ks[4], (Cmid,), jnp.float32)
    m1 = 0.1 * jax.random.normal(ks[5], (Cmid,), jnp.float32)
    v1 = jax.random.uniform(ks[6], (Cmid,), jnp.float32, 0.5, 1.5)

    g2 = jax.random.uniform(ks[7], (Cout,), jnp.float32, 0.5, 1.5)
    be2 = 0.1 * jax.random.normal(ks[8], (Cout,), jnp.float32)
    m2 = 0.1 * jax.random.normal(ks[9], (Cout,), jnp.float32)
    v2 = jax.random.uniform(ks[10], (Cout,), jnp.float32, 0.5, 1.5)

    out = double_conv(x, w1, g1, be1, m1, v1, w2, g2, be2, m2, v2)
    out = jax.block_until_ready(out)

    ref = _reference(x, w1, g1, be1, m1, v1, w2, g2, be2, m2, v2)
    assert out.shape == (N, Cout, H, W), out.shape
    # bf16 MXU inputs (f32 accumulation) -> slightly looser tolerance than pure f32.
    assert jnp.allclose(out, ref, atol=5e-2, rtol=5e-2), float(
        jnp.max(jnp.abs(out - ref)))

    print("KERNEL_OK")
</pallas_src>

<mosaic_0001>
module attributes {stable_mosaic.version = 11 : i64} {
  func.func @_double_conv_kernel(%arg0: i32, %arg1: memref<1x18x18x4xf32, #tpu.memory_space<vmem>>, %arg2: memref<36x8xbf16, #tpu.memory_space<vmem>>, %arg3: memref<1x8xf32, #tpu.memory_space<vmem>>, %arg4: memref<72x8xbf16, #tpu.memory_space<vmem>>, %arg5: memref<1x8xf32, #tpu.memory_space<vmem>>, %arg6: memref<1x16x16x8xf32, #tpu.memory_space<vmem>>, %arg7: memref<256x36xf32, #tpu.memory_space<vmem>>, %arg8: memref<18x25x8xf32, #tpu.memory_space<vmem>>, %arg9: memref<256x72xf32, #tpu.memory_space<vmem>>) attributes {dimension_semantics = [#tpu.dimension_semantics<parallel>], iteration_bounds = array<i64: 2>, scalar_prefetch = 0 : i64, scratch_operands = 3 : i64, tpu.core_type = #tpu.core_type<tc>, window_params = [{transform_indices = @transform_0, window_bounds = array<i64: 1, 18, 18, 4>}, {pipeline_mode = #tpu.pipeline_mode<synchronous>, transform_indices = @transform_1, window_bounds = array<i64: 36, 8>}, {pipeline_mode = #tpu.pipeline_mode<synchronous>, transform_indices = @transform_2, window_bounds = array<i64: 1, 8>}, {pipeline_mode = #tpu.pipeline_mode<synchronous>, transform_indices = @transform_3, window_bounds = array<i64: 72, 8>}, {pipeline_mode = #tpu.pipeline_mode<synchronous>, transform_indices = @transform_4, window_bounds = array<i64: 1, 8>}, {transform_indices = @transform_5, window_bounds = array<i64: 1, 16, 16, 8>}]} {
    %c0_i32 = arith.constant 0 : i32
    %0 = arith.cmpi eq, %arg0, %c0_i32 : i32
    %1 = arith.extui %0 : i1 to i32
    %c0_i32_0 = arith.constant 0 : i32
    %2 = arith.cmpi ne, %1, %c0_i32_0 : i32
    scf.if %2 {
      %cst_105 = arith.constant 0.000000e+00 : f32
      %88 = vector.broadcast %cst_105 : f32 to vector<18x25x8xf32>
      %c0_106 = arith.constant 0 : index
      %c0_107 = arith.constant 0 : index
      %c0_108 = arith.constant 0 : index
      %89 = vector.load %arg8[%c0_106, %c0_107, %c0_108] : memref<18x25x8xf32, #tpu.memory_space<vmem>>, vector<18x25x8xf32>
      tpu.vector_store %arg8[%c0_106, %c0_107, %c0_108], %88 {strides = array<i32>} : memref<18x25x8xf32, #tpu.memory_space<vmem>>, vector<18x25x8xf32>,
    } else {
    }
    %c0 = arith.constant 0 : index
    %c0_1 = arith.constant 0 : index
    %c0_2 = arith.constant 0 : index
    %c0_3 = arith.constant 0 : index
    %3 = vector.load %arg1[%c0, %c0_1, %c0_2, %c0_3] : memref<1x18x18x4xf32, #tpu.memory_space<vmem>>, vector<1x16x16x4xf32>
    %4 = vector.shape_cast %3 : vector<1x16x16x4xf32> to vector<16x16x4xf32>
    %5 = vector.shape_cast %4 : vector<16x16x4xf32> to vector<256x4xf32>
    %c0_4 = arith.constant 0 : index
    %c0_5 = arith.constant 0 : index
    %6 = vector.load %arg7[%c0_4, %c0_5] : memref<256x36xf32, #tpu.memory_space<vmem>>, vector<256x4xf32>
    tpu.vector_store %arg7[%c0_4, %c0_5], %5 {strides = array<i32>} : memref<256x36xf32, #tpu.memory_space<vmem>>, vector<256x4xf32>,
    %c0_6 = arith.constant 0 : index
    %c0_7 = arith.constant 0 : index
    %c1 = arith.constant 1 : index
    %c0_8 = arith.constant 0 : index
    %7 = vector.load %arg1[%c0_6, %c0_7, %c1, %c0_8] : memref<1x18x18x4xf32, #tpu.memory_space<vmem>>, vector<1x16x16x4xf32>
    %8 = vector.shape_cast %7 : vector<1x16x16x4xf32> to vector<16x16x4xf32>
    %9 = vector.shape_cast %8 : vector<16x16x4xf32> to vector<256x4xf32>
    %c0_9 = arith.constant 0 : index
    %c4 = arith.constant 4 : index
    %10 = vector.load %arg7[%c0_9, %c4] : memref<256x36xf32, #tpu.memory_space<vmem>>, vector<256x4xf32>
    tpu.vector_store %arg7[%c0_9, %c4], %9 {strides = array<i32>} : memref<256x36xf32, #tpu.memory_space<vmem>>, vector<256x4xf32>,
    %c0_10 = arith.constant 0 : index
    %c0_11 = arith.constant 0 : index
    %c2 = arith.constant 2 : index
    %c0_12 = arith.constant 0 : index
    %11 = vector.load %arg1[%c0_10, %c0_11, %c2, %c0_12] : memref<1x18x18x4xf32, #tpu.memory_space<vmem>>, vector<1x16x16x4xf32>
    %12 = vector.shape_cast %11 : vector<1x16x16x4xf32> to vector<16x16x4xf32>
    %13 = vector.shape_cast %12 : vector<16x16x4xf32> to vector<256x4xf32>
    %c0_13 = arith.constant 0 : index
    %c8 = arith.constant 8 : index
    %14 = vector.load %arg7[%c0_13, %c8] : memref<256x36xf32, #tpu.memory_space<vmem>>, vector<256x4xf32>
    tpu.vector_store %arg7[%c0_13, %c8], %13 {strides = array<i32>} : memref<256x36xf32, #tpu.memory_space<vmem>>, vector<256x4xf32>,
    %c0_14 = arith.constant 0 : index
    %c1_15 = arith.constant 1 : index
    %c0_16 = arith.constant 0 : index
    %c0_17 = arith.constant 0 : index
    %15 = vector.load %arg1[%c0_14, %c1_15, %c0_16, %c0_17] : memref<1x18x18x4xf32, #tpu.memory_space<vmem>>, vector<1x16x16x4xf32>
    %16 = vector.shape_cast %15 : vector<1x16x16x4xf32> to vector<16x16x4xf32>
    %17 = vector.shape_cast %16 : vector<16x16x4xf32> to vector<256x4xf32>
    %c0_18 = arith.constant 0 : index
    %c12 = arith.constant 12 : index
    %18 = vector.load %arg7[%c0_18, %c12] : memref<256x36xf32, #tpu.memory_space<vmem>>, vector<256x4xf32>
    tpu.vector_store %arg7[%c0_18, %c12], %17 {strides = array<i32>} : memref<256x36xf32, #tpu.memory_space<vmem>>, vector<256x4xf32>,
    %c0_19 = arith.constant 0 : index
    %c1_20 = arith.constant 1 : index
    %c1_21 = arith.constant 1 : index
    %c0_22 = arith.constant 0 : index
    %19 = vector.load %arg1[%c0_19, %c1_20, %c1_21, %c0_22] : memref<1x18x18x4xf32, #tpu.memory_space<vmem>>, vector<1x16x16x4xf32>
    %20 = vector.shape_cast %19 : vector<1x16x16x4xf32> to vector<16x16x4xf32>
    %21 = vector.shape_cast %20 : vector<16x16x4xf32> to vector<256x4xf32>
    %c0_23 = arith.constant 0 : index
    %c16 = arith.constant 16 : index
    %22 = vector.load %arg7[%c0_23, %c16] : memref<256x36xf32, #tpu.memory_space<vmem>>, vector<256x4xf32>
    tpu.vector_store %arg7[%c0_23, %c16], %21 {strides = array<i32>} : memref<256x36xf32, #tpu.memory_space<vmem>>, vector<256x4xf32>,
    %c0_24 = arith.constant 0 : index
    %c1_25 = arith.constant 1 : index
    %c2_26 = arith.constant 2 : index
    %c0_27 = arith.constant 0 : index
    %23 = vector.load %arg1[%c0_24, %c1_25, %c2_26, %c0_27] : memref<1x18x18x4xf32, #tpu.memory_space<vmem>>, vector<1x16x16x4xf32>
    %24 = vector.shape_cast %23 : vector<1x16x16x4xf32> to vector<16x16x4xf32>
    %25 = vector.shape_cast %24 : vector<16x16x4xf32> to vector<256x4xf32>
    %c0_28 = arith.constant 0 : index
    %c20 = arith.constant 20 : index
    %26 = vector.load %arg7[%c0_28, %c20] : memref<256x36xf32, #tpu.memory_space<vmem>>, vector<256x4xf32>
    tpu.vector_store %arg7[%c0_28, %c20], %25 {strides = array<i32>} : memref<256x36xf32, #tpu.memory_space<vmem>>, vector<256x4xf32>,
    %c0_29 = arith.constant 0 : index
    %c2_30 = arith.constant 2 : index
    %c0_31 = arith.constant 0 : index
    %c0_32 = arith.constant 0 : index
    %27 = vector.load %arg1[%c0_29, %c2_30, %c0_31, %c0_32] : memref<1x18x18x4xf32, #tpu.memory_space<vmem>>, vector<1x16x16x4xf32>
    %28 = vector.shape_cast %27 : vector<1x16x16x4xf32> to vector<16x16x4xf32>
    %29 = vector.shape_cast %28 : vector<16x16x4xf32> to vector<256x4xf32>
    %c0_33 = arith.constant 0 : index
    %c24 = arith.constant 24 : index
    %30 = vector.load %arg7[%c0_33, %c24] : memref<256x36xf32, #tpu.memory_space<vmem>>, vector<256x4xf32>
    tpu.vector_store %arg7[%c0_33, %c24], %29 {strides = array<i32>} : memref<256x36xf32, #tpu.memory_space<vmem>>, vector<256x4xf32>,
    %c0_34 = arith.constant 0 : index
    %c2_35 = arith.constant 2 : index
    %c1_36 = arith.constant 1 : index
    %c0_37 = arith.constant 0 : index
    %31 = vector.load %arg1[%c0_34, %c2_35, %c1_36, %c0_37] : memref<1x18x18x4xf32, #tpu.memory_space<vmem>>, vector<1x16x16x4xf32>
    %32 = vector.shape_cast %31 : vector<1x16x16x4xf32> to vector<16x16x4xf32>
    %33 = vector.shape_cast %32 : vector<16x16x4xf32> to vector<256x4xf32>
    %c0_38 = arith.constant 0 : index
    %c28 = arith.constant 28 : index
    %34 = vector.load %arg7[%c0_38, %c28] : memref<256x36xf32, #tpu.memory_space<vmem>>, vector<256x4xf32>
    tpu.vector_store %arg7[%c0_38, %c28], %33 {strides = array<i32>} : memref<256x36xf32, #tpu.memory_space<vmem>>, vector<256x4xf32>,
    %c0_39 = arith.constant 0 : index
    %c2_40 = arith.constant 2 : index
    %c2_41 = arith.constant 2 : index
    %c0_42 = arith.constant 0 : index
    %35 = vector.load %arg1[%c0_39, %c2_40, %c2_41, %c0_42] : memref<1x18x18x4xf32, #tpu.memory_space<vmem>>, vector<1x16x16x4xf32>
    %36 = vector.shape_cast %35 : vector<1x16x16x4xf32> to vector<16x16x4xf32>
    %37 = vector.shape_cast %36 : vector<16x16x4xf32> to vector<256x4xf32>
    %c0_43 = arith.constant 0 : index
    %c32 = arith.constant 32 : index
    %38 = vector.load %arg7[%c0_43, %c32] : memref<256x36xf32, #tpu.memory_space<vmem>>, vector<256x4xf32>
    tpu.vector_store %arg7[%c0_43, %c32], %37 {strides = array<i32>} : memref<256x36xf32, #tpu.memory_space<vmem>>, vector<256x4xf32>,
    %c0_44 = arith.constant 0 : index
    %c0_45 = arith.constant 0 : index
    %39 = vector.load %arg7[%c0_44, %c0_45] : memref<256x36xf32, #tpu.memory_space<vmem>>, vector<256x36xf32>
    %40 = arith.truncf %39 : vector<256x36xf32> to vector<256x36xbf16>
    %c0_46 = arith.constant 0 : index
    %c0_47 = arith.constant 0 : index
    %41 = vector.load %arg2[%c0_46, %c0_47] : memref<36x8xbf16, #tpu.memory_space<vmem>>, vector<36x8xbf16>
    %cst = arith.constant dense<0.000000e+00> : vector<256x8xf32>
    %42 = tpu.matmul %40, %41, %cst {dimension_numbers = #tpu.dot_dimension_numbers<[1], [0], [0], [1], [0, 0, 1, 1], [], []>} : vector<256x36xbf16>, vector<36x8xbf16>, vector<256x8xf32> -> vector<256x8xf32>
    %c0_48 = arith.constant 0 : index
    %c0_49 = arith.constant 0 : index
    %43 = vector.load %arg3[%c0_48, %c0_49] : memref<1x8xf32, #tpu.memory_space<vmem>>, vector<1x8xf32>
    %44 = vector.broadcast %43 : vector<1x8xf32> to vector<256x8xf32>
    %45 = arith.addf %42, %44 : vector<256x8xf32>
    %cst_50 = arith.constant 0.000000e+00 : f32
    %46 = vector.broadcast %cst_50 : f32 to vector<256x8xf32>
    %47 = arith.maximumf %45, %46 : vector<256x8xf32>
    %48 = vector.shape_cast %47 : vector<256x8xf32> to vector<16x16x8xf32>
    %c1_51 = arith.constant 1 : index
    %c8_52 = arith.constant 8 : index
    %c0_53 = arith.constant 0 : index
    %49 = vector.load %arg8[%c1_51, %c8_52, %c0_53] : memref<18x25x8xf32, #tpu.memory_space<vmem>>, vector<16x16x8xf32>
    tpu.vector_store %arg8[%c1_51, %c8_52, %c0_53], %48 {strides = array<i32>} : memref<18x25x8xf32, #tpu.memory_space<vmem>>, vector<16x16x8xf32>,
    %c0_54 = arith.constant 0 : index
    %c7 = arith.constant 7 : index
    %c0_55 = arith.constant 0 : index
    %50 = vector.load %arg8[%c0_54, %c7, %c0_55] : memref<18x25x8xf32, #tpu.memory_space<vmem>>, vector<16x16x8xf32>
    %51 = vector.shape_cast %50 : vector<16x16x8xf32> to vector<256x8xf32>
    %c0_56 = arith.constant 0 : index
    %c0_57 = arith.constant 0 : index
    %52 = vector.load %arg9[%c0_56, %c0_57] : memref<256x72xf32, #tpu.memory_space<vmem>>, vector<256x8xf32>
    tpu.vector_store %arg9[%c0_56, %c0_57], %51 {strides = array<i32>} : memref<256x72xf32, #tpu.memory_space<vmem>>, vector<256x8xf32>,
    %c0_58 = arith.constant 0 : index
    %c8_59 = arith.constant 8 : index
    %c0_60 = arith.constant 0 : index
    %53 = vector.load %arg8[%c0_58, %c8_59, %c0_60] : memref<18x25x8xf32, #tpu.memory_space<vmem>>, vector<16x16x8xf32>
    %54 = vector.shape_cast %53 : vector<16x16x8xf32> to vector<256x8xf32>
    %c0_61 = arith.constant 0 : index
    %c8_62 = arith.constant 8 : index
    %55 = vector.load %arg9[%c0_61, %c8_62] : memref<256x72xf32, #tpu.memory_space<vmem>>, vector<256x8xf32>
    tpu.vector_store %arg9[%c0_61, %c8_62], %54 {strides = array<i32>} : memref<256x72xf32, #tpu.memory_space<vmem>>, vector<256x8xf32>,
    %c0_63 = arith.constant 0 : index
    %c9 = arith.constant 9 : index
    %c0_64 = arith.constant 0 : index
    %56 = vector.load %arg8[%c0_63, %c9, %c0_64] : memref<18x25x8xf32, #tpu.memory_space<vmem>>, vector<16x16x8xf32>
    %57 = vector.shape_cast %56 : vector<16x16x8xf32> to vector<256x8xf32>
    %c0_65 = arith.constant 0 : index
    %c16_66 = arith.constant 16 : index
    %58 = vector.load %arg9[%c0_65, %c16_66] : memref<256x72xf32, #tpu.memory_space<vmem>>, vector<256x8xf32>
    tpu.vector_store %arg9[%c0_65, %c16_66], %57 {strides = array<i32>} : memref<256x72xf32, #tpu.memory_space<vmem>>, vector<256x8xf32>,
    %c1_67 = arith.constant 1 : index
    %c7_68 = arith.constant 7 : index
    %c0_69 = arith.constant 0 : index
    %59 = vector.load %arg8[%c1_67, %c7_68, %c0_69] : memref<18x25x8xf32, #tpu.memory_space<vmem>>, vector<16x16x8xf32>
    %60 = vector.shape_cast %59 : vector<16x16x8xf32> to vector<256x8xf32>
    %c0_70 = arith.constant 0 : index
    %c24_71 = arith.constant 24 : index
    %61 = vector.load %arg9[%c0_70, %c24_71] : memref<256x72xf32, #tpu.memory_space<vmem>>, vector<256x8xf32>
    tpu.vector_store %arg9[%c0_70, %c24_71], %60 {strides = array<i32>} : memref<256x72xf32, #tpu.memory_space<vmem>>, vector<256x8xf32>,
    %c1_72 = arith.constant 1 : index
    %c8_73 = arith.constant 8 : index
    %c0_74 = arith.constant 0 : index
    %62 = vector.load %arg8[%c1_72, %c8_73, %c0_74] : memref<18x25x8xf32, #tpu.memory_space<vmem>>, vector<16x16x8xf32>
    %63 = vector.shape_cast %62 : vector<16x16x8xf32> to vector<256x8xf32>
    %c0_75 = arith.constant 0 : index
    %c32_76 = arith.constant 32 : index
    %64 = vector.load %arg9[%c0_75, %c32_76] : memref<256x72xf32, #tpu.memory_space<vmem>>, vector<256x8xf32>
    tpu.vector_store %arg9[%c0_75, %c32_76], %63 {strides = array<i32>} : memref<256x72xf32, #tpu.memory_space<vmem>>, vector<256x8xf32>,
    %c1_77 = arith.constant 1 : index
    %c9_78 = arith.constant 9 : index
    %c0_79 = arith.constant 0 : index
    %65 = vector.load %arg8[%c1_77, %c9_78, %c0_79] : memref<18x25x8xf32, #tpu.memory_space<vmem>>, vector<16x16x8xf32>
    %66 = vector.shape_cast %65 : vector<16x16x8xf32> to vector<256x8xf32>
    %c0_80 = arith.constant 0 : index
    %c40 = arith.constant 40 : index
    %67 = vector.load %arg9[%c0_80, %c40] : memref<256x72xf32, #tpu.memory_space<vmem>>, vector<256x8xf32>
    tpu.vector_store %arg9[%c0_80, %c40], %66 {strides = array<i32>} : memref<256x72xf32, #tpu.memory_space<vmem>>, vector<256x8xf32>,
    %c2_81 = arith.constant 2 : index
    %c7_82 = arith.constant 7 : index
    %c0_83 = arith.constant 0 : index
    %68 = vector.load %arg8[%c2_81, %c7_82, %c0_83] : memref<18x25x8xf32, #tpu.memory_space<vmem>>, vector<16x16x8xf32>
    %69 = vector.shape_cast %68 : vector<16x16x8xf32> to vector<256x8xf32>
    %c0_84 = arith.constant 0 : index
    %c48 = arith.constant 48 : index
    %70 = vector.load %arg9[%c0_84, %c48] : memref<256x72xf32, #tpu.memory_space<vmem>>, vector<256x8xf32>
    tpu.vector_store %arg9[%c0_84, %c48], %69 {strides = array<i32>} : memref<256x72xf32, #tpu.memory_space<vmem>>, vector<256x8xf32>,
    %c2_85 = arith.constant 2 : index
    %c8_86 = arith.constant 8 : index
    %c0_87 = arith.constant 0 : index
    %71 = vector.load %arg8[%c2_85, %c8_86, %c0_87] : memref<18x25x8xf32, #tpu.memory_space<vmem>>, vector<16x16x8xf32>
    %72 = vector.shape_cast %71 : vector<16x16x8xf32> to vector<256x8xf32>
    %c0_88 = arith.constant 0 : index
    %c56 = arith.constant 56 : index
    %73 = vector.load %arg9[%c0_88, %c56] : memref<256x72xf32, #tpu.memory_space<vmem>>, vector<256x8xf32>
    tpu.vector_store %arg9[%c0_88, %c56], %72 {strides = array<i32>} : memref<256x72xf32, #tpu.memory_space<vmem>>, vector<256x8xf32>,
    %c2_89 = arith.constant 2 : index
    %c9_90 = arith.constant 9 : index
    %c0_91 = arith.constant 0 : index
    %74 = vector.load %arg8[%c2_89, %c9_90, %c0_91] : memref<18x25x8xf32, #tpu.memory_space<vmem>>, vector<16x16x8xf32>
    %75 = vector.shape_cast %74 : vector<16x16x8xf32> to vector<256x8xf32>
    %c0_92 = arith.constant 0 : index
    %c64 = arith.constant 64 : index
    %76 = vector.load %arg9[%c0_92, %c64] : memref<256x72xf32, #tpu.memory_space<vmem>>, vector<256x8xf32>
    tpu.vector_store %arg9[%c0_92, %c64], %75 {strides = array<i32>} : memref<256x72xf32, #tpu.memory_space<vmem>>, vector<256x8xf32>,
    %c0_93 = arith.constant 0 : index
    %c0_94 = arith.constant 0 : index
    %77 = vector.load %arg9[%c0_93, %c0_94] : memref<256x72xf32, #tpu.memory_space<vmem>>, vector<256x72xf32>
    %78 = arith.truncf %77 : vector<256x72xf32> to vector<256x72xbf16>
    %c0_95 = arith.constant 0 : index
    %c0_96 = arith.constant 0 : index
    %79 = vector.load %arg4[%c0_95, %c0_96] : memref<72x8xbf16, #tpu.memory_space<vmem>>, vector<72x8xbf16>
    %cst_97 = arith.constant dense<0.000000e+00> : vector<256x8xf32>
    %80 = tpu.matmul %78, %79, %cst_97 {dimension_numbers = #tpu.dot_dimension_numbers<[1], [0], [0], [1], [0, 0, 1, 1], [], []>} : vector<256x72xbf16>, vector<72x8xbf16>, vector<256x8xf32> -> vector<256x8xf32>
    %c0_98 = arith.constant 0 : index
    %c0_99 = arith.constant 0 : index
    %81 = vector.load %arg5[%c0_98, %c0_99] : memref<1x8xf32, #tpu.memory_space<vmem>>, vector<1x8xf32>
    %82 = vector.broadcast %81 : vector<1x8xf32> to vector<256x8xf32>
    %83 = arith.addf %80, %82 : vector<256x8xf32>
    %cst_100 = arith.constant 0.000000e+00 : f32
    %84 = vector.broadcast %cst_100 : f32 to vector<256x8xf32>
    %85 = arith.maximumf %83, %84 : vector<256x8xf32>
    %86 = vector.shape_cast %85 : vector<256x8xf32> to vector<1x16x16x8xf32>
    %c0_101 = arith.constant 0 : index
    %c0_102 = arith.constant 0 : index
    %c0_103 = arith.constant 0 : index
    %c0_104 = arith.constant 0 : index
    %87 = vector.load %arg6[%c0_101, %c0_102, %c0_103, %c0_104] : memref<1x16x16x8xf32, #tpu.memory_space<vmem>>, vector<1x16x16x8xf32>
    tpu.vector_store %arg6[%c0_101, %c0_102, %c0_103, %c0_104], %86 {strides = array<i32>} : memref<1x16x16x8xf32, #tpu.memory_space<vmem>>, vector<1x16x16x8xf32>,
    return
  }
  func.func @transform_0(%arg0: i32) -> (i32, i32, i32, i32) {
    %c0_i32 = arith.constant 0 : i32
    %c0_i32_0 = arith.constant 0 : i32
    %c0_i32_1 = arith.constant 0 : i32
    %c0_i32_2 = arith.constant 0 : i32
    return %arg0, %c0_i32, %c0_i32_0, %c0_i32_1 : i32, i32, i32, i32
  }
  func.func @transform_1(%arg0: i32) -> (i32, i32) {
    %c0_i32 = arith.constant 0 : i32
    %c0_i32_0 = arith.constant 0 : i32
    %c0_i32_1 = arith.constant 0 : i32
    return %c0_i32, %c0_i32_0 : i32, i32
  }
  func.func @transform_2(%arg0: i32) -> (i32, i32) {
    %c0_i32 = arith.constant 0 : i32
    %c0_i32_0 = arith.constant 0 : i32
    %c0_i32_1 = arith.constant 0 : i32
    return %c0_i32, %c0_i32_0 : i32, i32
  }
  func.func @transform_3(%arg0: i32) -> (i32, i32) {
    %c0_i32 = arith.constant 0 : i32
    %c0_i32_0 = arith.constant 0 : i32
    %c0_i32_1 = arith.constant 0 : i32
    return %c0_i32, %c0_i32_0 : i32, i32
  }
  func.func @transform_4(%arg0: i32) -> (i32, i32) {
    %c0_i32 = arith.constant 0 : i32
    %c0_i32_0 = arith.constant 0 : i32
    %c0_i32_1 = arith.constant 0 : i32
    return %c0_i32, %c0_i32_0 : i32, i32
  }
  func.func @transform_5(%arg0: i32) -> (i32, i32, i32, i32) {
    %c0_i32 = arith.constant 0 : i32
    %c0_i32_0 = arith.constant 0 : i32
    %c0_i32_1 = arith.constant 0 : i32
    %c0_i32_2 = arith.constant 0 : i32
    return %arg0, %c0_i32, %c0_i32_0, %c0_i32_1 : i32, i32, i32, i32
  }
}

</mosaic_0001>

<bundles_post_ra>
// kernel: tpu_custom_call.1
= control target key start
LH: loop header
LB: loop body
LE: loop exit
PB: predicated region body
PF: predicated region fallthrough
CT: control target
= control target key end

     0   :  { %s4502_s18 = smov 0   ;;  %s6920_s0 = inlined_call_operand.vmem [shape: f32[2,18,18,4], index: 0, kind: input, shape index: {}]   ;;  %s6921_s1 = inlined_call_operand.vmem [shape: bf16[36,8], index: 1, kind: input, shape index: {}]   ;;  %s6922_s2 = inlined_call_operand.vmem [shape: f32[1,8], index: 2, kind: input, shape index: {}]   ;;  %s6923_s3 = inlined_call_operand.vmem [shape: bf16[72,8], index: 3, kind: input, shape index: {}]   ;;  %s6924_s4 = inlined_call_operand.vmem [shape: f32[1,8], index: 4, kind: input, shape index: {}]   ;;  %s6925_s5 = inlined_call_operand.vmem [shape: f32[2,16,16,8], index: 5, kind: output, shape index: {}]  }
   0x1 LB: > { %s4153_s19 = sadd.s32 4294967295, %s4457_s18   ;;  %p4157_p0 = scmp.ge.s32.totalorder %s4457_s18, 1  ;;  %s4457_s18 = sphi %s4502_s18, %s15_s18  }
   0x2   : > { %p187_p1 = scmp.lt.s32.totalorder %s4457_s18, 3 }
   0x4   : > { %p188_p2 = pnand %p4157_p0, %p187_p1 }
   0x6   : > { %191 = sbr.rel (%p188_p2) target bundleno = 1980 (0x7bc), region = 40 }
   0xb   : > { %p215_p3 = scmp.lt.s32.totalorder %s4153_s19, 1  ;;  %p4161_p4 = scmp.ne.s32.totalorder %s4153_s19, 0 }
   0xd   : > { %s216_s20 = scalar_select %p215_p3, %s4153_s19, 1 }
   0xe   : > { %229 = sbr.rel (%p4161_p4) target bundleno = 92 (0x5c), region = 44 }
   0xf   : > { %s4427_s21 = smul.u32 432, %s216_s20  ;;  %s4412_s22 = sshll.u32 %s216_s20, 8 }
  0x10   : > { %s4513_s25 = scalar_lea.vmem %s6925_s5, %s4412_s22 }
  0x11   : > { %s4518_s28 = scalar_lea.vmem %s6920_s0, %s4427_s21 }
  0x13   : > { %vm230_vm0 = vcmask 64512   ;;  %v4459_v0 = vmov 0.0   ;;  %vm234_vm1 = vcmask 57344  }
  0x14   : > { %231 = vst.msk [vmem:[#allocation3] sm:$0xff] %vm230_vm0, %v4459_v0 }
  0x15   : > { %232 = vst.msk [vmem:[#allocation3 + $0x8] sm:$0xff] %vm230_vm0, %v4459_v0 }
  0x16   : > { %233 = vst.msk [vmem:[#allocation3 + $0x10] sm:$0xff] %vm230_vm0, %v4459_v0 }
  0x17   : > { %236 = vst.msk [vmem:[#allocation3 + $0x20] sm:$0xff] %vm230_vm0, %v4459_v0 }
  0x18   : > { %237 = vst.msk [vmem:[#allocation3 + $0x28] sm:$0xff] %vm230_vm0, %v4459_v0 }
  0x19   : > { %238 = vst.msk [vmem:[#allocation3 + $0x30] sm:$0xff] %vm230_vm0, %v4459_v0 }
  0x1a   : > { %240 = vst.msk [vmem:[#allocation3 + $0x40] sm:$0xff] %vm230_vm0, %v4459_v0 }
  0x1b   : > { %241 = vst.msk [vmem:[#allocation3 + $0x48] sm:$0xff] %vm230_vm0, %v4459_v0 }
  0x1c   : > { %242 = vst.msk [vmem:[#allocation3 + $0x50] sm:$0xff] %vm230_vm0, %v4459_v0 }
  0x1d   : > { %244 = vst.msk [vmem:[#allocation3 + $0x60] sm:$0xff] %vm230_vm0, %v4459_v0 }
  0x1e   : > { %245 = vst.msk [vmem:[#allocation3 + $0x68] sm:$0xff] %vm230_vm0, %v4459_v0 }
  0x1f   : > { %246 = vst.msk [vmem:[#allocation3 + $0x70] sm:$0xff] %vm230_vm0, %v4459_v0 }
  0x20   : > { %248 = vst.msk [vmem:[#allocation3 + $0x80] sm:$0xff] %vm230_vm0, %v4459_v0 }
  0x21   : > { %249 = vst.msk [vmem:[#allocation3 + $0x88] sm:$0xff] %vm230_vm0, %v4459_v0 }
  0x22   : > { %250 = vst.msk [vmem:[#allocation3 + $0x90] sm:$0xff] %vm230_vm0, %v4459_v0 }
  0x23   : > { %252 = vst.msk [vmem:[#allocation3 + $0xa0] sm:$0xff] %vm230_vm0, %v4459_v0 }
  0x24   : > { %253 = vst.msk [vmem:[#allocation3 + $0xa8] sm:$0xff] %vm230_vm0, %v4459_v0 }
  0x25   : > { %254 = vst.msk [vmem:[#allocation3 + $0xb0] sm:$0xff] %vm230_vm0, %v4459_v0 }
  0x26   : > { %256 = vst.msk [vmem:[#allocation3 + $0xc0] sm:$0xff] %vm230_vm0, %v4459_v0 }
  0x27   : > { %257 = vst.msk [vmem:[#allocation3 + $0xc8] sm:$0xff] %vm230_vm0, %v4459_v0 }
  0x28   : > { %258 = vst.msk [vmem:[#allocation3 + $0xd0] sm:$0xff] %vm230_vm0, %v4459_v0 }
  0x29   : > { %260 = vst.msk [vmem:[#allocation3 + $0xe0] sm:$0xff] %vm230_vm0, %v4459_v0 }
  0x2a   : > { %261 = vst.msk [vmem:[#allocation3 + $0xe8] sm:$0xff] %vm230_vm0, %v4459_v0 }
  0x2b   : > { %262 = vst.msk [vmem:[#allocation3 + $0xf0] sm:$0xff] %vm230_vm0, %v4459_v0 }
  0x2c   : > { %264 = vst.msk [vmem:[#allocation3 + $0x100] sm:$0xff] %vm230_vm0, %v4459_v0 }
  0x2d   : > { %265 = vst.msk [vmem:[#allocation3 + $0x108] sm:$0xff] %vm230_vm0, %v4459_v0 }
  0x2e   : > { %266 = vst.msk [vmem:[#allocation3 + $0x110] sm:$0xff] %vm230_vm0, %v4459_v0 }
  0x2f   : > { %268 = vst.msk [vmem:[#allocation3 + $0x120] sm:$0xff] %vm230_vm0, %v4459_v0 }
  0x30   : > { %269 = vst.msk [vmem:[#allocation3 + $0x128] sm:$0xff] %vm230_vm0, %v4459_v0 }
  0x31   : > { %270 = vst.msk [vmem:[#allocation3 + $0x130] sm:$0xff] %vm230_vm0, %v4459_v0 }
  0x32   : > { %272 = vst.msk [vmem:[#allocation3 + $0x140] sm:$0xff] %vm230_vm0, %v4459_v0 }
  0x33   : > { %273 = vst.msk [vmem:[#allocation3 + $0x148] sm:$0xff] %vm230_vm0, %v4459_v0 }
  0x34   : > { %274 = vst.msk [vmem:[#allocation3 + $0x150] sm:$0xff] %vm230_vm0, %v4459_v0 }
  0x35   : > { %276 = vst.msk [vmem:[#allocation3 + $0x160] sm:$0xff] %vm230_vm0, %v4459_v0 }
  0x36   : > { %277 = vst.msk [vmem:[#allocation3 + $0x168] sm:$0xff] %vm230_vm0, %v4459_v0 }
  0x37   : > { %278 = vst.msk [vmem:[#allocation3 + $0x170] sm:$0xff] %vm230_vm0, %v4459_v0 }
  0x38   : > { %280 = vst.msk [vmem:[#allocation3 + $0x180] sm:$0xff] %vm230_vm0, %v4459_v0 }
  0x39   : > { %281 = vst.msk [vmem:[#allocation3 + $0x188] sm:$0xff] %vm230_vm0, %v4459_v0 }
  0x3a   : > { %282 = vst.msk [vmem:[#allocation3 + $0x190] sm:$0xff] %vm230_vm0, %v4459_v0 }
  0x3b   : > { %284 = vst.msk [vmem:[#allocation3 + $0x1a0] sm:$0xff] %vm230_vm0, %v4459_v0 }
  0x3c   : > { %285 = vst.msk [vmem:[#allocation3 + $0x1a8] sm:$0xff] %vm230_vm0, %v4459_v0 }
  0x3d   : > { %286 = vst.msk [vmem:[#allocation3 + $0x1b0] sm:$0xff] %vm230_vm0, %v4459_v0 }
  0x3e   : > { %288 = vst.msk [vmem:[#allocation3 + $0x1c0] sm:$0xff] %vm230_vm0, %v4459_v0 }
  0x3f   : > { %289 = vst.msk [vmem:[#allocation3 + $0x1c8] sm:$0xff] %vm230_vm0, %v4459_v0 }
  0x40   : > { %290 = vst.msk [vmem:[#allocation3 + $0x1d0] sm:$0xff] %vm230_vm0, %v4459_v0 }
  0x41   : > { %292 = vst.msk [vmem:[#allocation3 + $0x1e0] sm:$0xff] %vm230_vm0, %v4459_v0 }
  0x42   : > { %293 = vst.msk [vmem:[#allocation3 + $0x1e8] sm:$0xff] %vm230_vm0, %v4459_v0 }
  0x43   : > { %294 = vst.msk [vmem:[#allocation3 + $0x1f0] sm:$0xff] %vm230_vm0, %v4459_v0 }
  0x44   : > { %296 = vst.msk [vmem:[#allocation3 + $0x200] sm:$0xff] %vm230_vm0, %v4459_v0 }
  0x45   : > { %297 = vst.msk [vmem:[#allocation3 + $0x208] sm:$0xff] %vm230_vm0, %v4459_v0 }
  0x46   : > { %298 = vst.msk [vmem:[#allocation3 + $0x210] sm:$0xff] %vm230_vm0, %v4459_v0 }
  0x47   : > { %300 = vst.msk [vmem:[#allocation3 + $0x220] sm:$0xff] %vm230_vm0, %v4459_v0 }
  0x48   : > { %301 = vst.msk [vmem:[#allocation3 + $0x228] sm:$0xff] %vm230_vm0, %v4459_v0 }
  0x49   : > { %302 = vst.msk [vmem:[#allocation3 + $0x230] sm:$0xff] %vm230_vm0, %v4459_v0 }
  0x4a   : > { %235 = vst.msk [vmem:[#allocation3 + $0x18] sm:$0x1] %vm234_vm1, %v4459_v0 }
  0x4b   : > { %239 = vst.msk [vmem:[#allocation3 + $0x38] sm:$0x1] %vm234_vm1, %v4459_v0 }
  0x4c   : > { %243 = vst.msk [vmem:[#allocation3 + $0x58] sm:$0x1] %vm234_vm1, %v4459_v0 }
  0x4d   : > { %247 = vst.msk [vmem:[#allocation3 + $0x78] sm:$0x1] %vm234_vm1, %v4459_v0 }
  0x4e   : > { %251 = vst.msk [vmem:[#allocation3 + $0x98] sm:$0x1] %vm234_vm1, %v4459_v0 }
  0x4f   : > { %255 = vst.msk [vmem:[#allocation3 + $0xb8] sm:$0x1] %vm234_vm1, %v4459_v0 }
  0x50   : > { %259 = vst.msk [vmem:[#allocation3 + $0xd8] sm:$0x1] %vm234_vm1, %v4459_v0 }
  0x51   : > { %263 = vst.msk [vmem:[#allocation3 + $0xf8] sm:$0x1] %vm234_vm1, %v4459_v0 }
  0x52   : > { %267 = vst.msk [vmem:[#allocation3 + $0x118] sm:$0x1] %vm234_vm1, %v4459_v0 }
  0x53   : > { %271 = vst.msk [vmem:[#allocation3 + $0x138] sm:$0x1] %vm234_vm1, %v4459_v0 }
  0x54   : > { %275 = vst.msk [vmem:[#allocation3 + $0x158] sm:$0x1] %vm234_vm1, %v4459_v0 }
  0x55   : > { %279 = vst.msk [vmem:[#allocation3 + $0x178] sm:$0x1] %vm234_vm1, %v4459_v0 }
  0x56   : > { %283 = vst.msk [vmem:[#allocation3 + $0x198] sm:$0x1] %vm234_vm1, %v4459_v0 }
  0x57   : > { %287 = vst.msk [vmem:[#allocation3 + $0x1b8] sm:$0x1] %vm234_vm1, %v4459_v0 }
  0x58   : > { %291 = vst.msk [vmem:[#allocation3 + $0x1d8] sm:$0x1] %vm234_vm1, %v4459_v0 }
  0x59   : > { %295 = vst.msk [vmem:[#allocation3 + $0x1f8] sm:$0x1] %vm234_vm1, %v4459_v0 }
  0x5a   : > { %299 = vst.msk [vmem:[#allocation3 + $0x218] sm:$0x1] %vm234_vm1, %v4459_v0 }
  0x5b   : > { %303 = vst.msk [vmem:[#allocation3 + $0x238] sm:$0x1] %vm234_vm1, %v4459_v0 }
  0x5c PF: > { %v369_v1 = vld [vmem:[%s4518_s28 + $0x1] sm:$0xff]  ;;  %v4666_v2 = vld [vmem:[%s4518_s28 + $0x19] sm:$0xff]  ;;  %s4460_s29 = smov 4   ;;  %v4672_v3 = vld [vmem:[%s4518_s28 + $0x31] sm:$0xff]  ;;  %vm336_vm2 = vcmask 31744   ;;  %s4461_s30 = smov 8  }
  0x5d   : > { %433 = vrot.lane.b32.xlu0 %v369_v1, %s4460_s29  ;;  %437 = vrot.lane.b32.xlu1 %v4666_v2, %s4460_s29  ;;  %v370_v4 = vld [vmem:[%s4518_s28 + $0x9] sm:$0xff]  ;;  %v4678_v5 = vld [vmem:[%s4518_s28 + $0x21] sm:$0xff]  ;;  %vm529_vm3 = vcmask 64544   ;;  %s4462_s6 = smov 12   ;;  %vm722_vm4 = vcmask 97344   ;;  %s4463_s7 = smov 16  }
  0x5e   : > { %441 = vrot.lane.b32.xlu2 %v4672_v3, %s4460_s29  ;;  %v4681_v6 = vld [vmem:[%s4518_s28 + $0x39] sm:$0xff]  ;;  %v4689_v7 = vld [vmem:[%s4518_s28 + $0x49] sm:$0xff]  ;;  %v4692_v8 = vld [vmem:[%s4518_s28 + $0x51] sm:$0xff]  ;;  %vm916_vm5 = vcmask 130144   ;;  %s4464_s8 = smov 20   ;;  %vm1109_vm6 = vcmask 162944  }
  0x5f   : > { %v4695_v9 = vld [vmem:[%s4518_s28 + $0x61] sm:$0xff]  ;;  %v4704_v10 = vld [vmem:[%s4518_s28 + $0x69] sm:$0xff]  ;;  %v4707_v11 = vld [vmem:[%s4518_s28 + $0x79] sm:$0xff]  ;;  %s4465_s9 = smov 24   ;;  %vm1302_vm7 = vcmask 195744   ;;  %s4466_s10 = smov 28  }
  0x60   : > { %v4710_v12 = vld [vmem:[%s4518_s28 + $0x81] sm:$0xff]  ;;  %v4719_v13 = vld [vmem:[%s4518_s28 + $0x91] sm:$0xff]  ;;  %v4722_v14 = vld [vmem:[%s4518_s28 + $0x99] sm:$0xff]  ;;  %vm1496_vm8 = vcmask 228544   ;;  %s4467_s11 = smov 32   ;;  %vm1689_vm9 = vcmask 261344  }
  0x61   : > { %v4725_v15 = vld [vmem:[%s4518_s28 + $0xa9] sm:$0xff]  ;;  %v4734_v16 = vld [vmem:[%s4518_s28 + $0xb1] sm:$0xff]  ;;  %v4737_v17 = vld [vmem:[%s4518_s28 + $0xc1] sm:$0xff]  ;;  %vm2036_vm10 = vcmask 1041408   ;;  %vm1882_vm11 = vcmask 294144   ;;  %vm1987_vm12 = vcmask 293888  }
  0x62   : > { %v4740_v18 = vld [vmem:[%s4518_s28 + $0xc9] sm:$0xff]  ;;  %v4749_v19 = vld [vmem:[%s4518_s28 + $0xd9] sm:$0xff]  ;;  %v4752_v20 = vld [vmem:[%s4518_s28 + $0xe1] sm:$0xff]  ;;  %vm2162_vm13 = vcmask 64512   ;;  %vm2419_vm14 = vcmask 130112   ;;  %vm2612_vm15 = vcmask 195712  }
  0x63   : > { %v4755_v21 = vld [vmem:[%s4518_s28 + $0xf1] sm:$0xff]  ;;  %v4764_v22 = vld [vmem:[%s4518_s28 + $0xf9] sm:$0xff]  ;;  %v4767_v23 = vld [vmem:[%s4518_s28 + $0x109] sm:$0xff]  ;;  %vm2805_vm0 = vcmask 261312   ;;  %s4468_s21 = smov 40   ;;  %vm2998_vm1 = vcmask 326912  }
  0x64   : > { %v4770_v24 = vld [vmem:[%s4518_s28 + $0x111] sm:$0xff]  ;;  %v4779_v25 = vld [vmem:[%s4518_s28 + $0x121] sm:$0xff]  ;;  %v4782_v26 = vld [vmem:[%s4518_s28 + $0x129] sm:$0xff]  ;;  %s4469_s22 = smov 48   ;;  %s4470_s23 = smov 56  }
  0x65   : > { %435 = vrot.lane.b32.xlu0 %v370_v4, %s4460_s29  ;;  %439 = vrot.lane.b32.xlu1 %v4678_v5, %s4460_s29  ;;  %v4785_v27 = vld [vmem:[%s4518_s28 + $0x139] sm:$0xff]  ;;  %v4794_v28 = vld [vmem:[%s4518_s28 + $0x141] sm:$0xff]  ;;  %s4471_s24 = smov 64  }
  0x66   : > { %443 = vrot.lane.b32.xlu2 %v4681_v6, %s4460_s29  ;;  %v4797_v29 = vld [vmem:[%s4518_s28 + $0x151] sm:$0xff]  ;;  %v4800_v30 = vld [vmem:[%s4518_s28 + $0x159] sm:$0xff]  ;;  %v4809_v31 = vld [vmem:[%s4518_s28 + $0x169] sm:$0xff] }
  0x67   : > { %v4812_v32 = vld [vmem:[%s4518_s28 + $0x171] sm:$0xff]  ;;  %v562_v33 = vld [vmem:[%s4518_s28 + $0x2] sm:$0xff]  ;;  %v4824_v36 = vld [vmem:[%s4518_s28 + $0x1a] sm:$0xff] }
  0x68   : > { %v304_v34 = vld [vmem:[%s4518_s28] sm:$0xff]  ;;  %v563_v35 = vld [vmem:[%s4518_s28 + $0xa] sm:$0xff]  ;;  %v4842_v41 = vld [vmem:[%s4518_s28 + $0x32] sm:$0xff] }
  0x69   : > { %337 = vst.msk [vmem:[#allocation2] sm:$0xff] %vm336_vm2, %v304_v34  ;;  %v4827_v37 = vld [vmem:[%s4518_s28 + $0x22] sm:$0xff]  ;;  %v4833_v38 = vld [vmem:[%s4518_s28 + $0x30] sm:$0xff]  ;;  %v4845_v42 = vld [vmem:[%s4518_s28 + $0x3a] sm:$0xff] }
  0x6a   : > { %6990 = vst [vmem:[#allocation5_spill] sm:$0xff] %v4827_v37  ;;  %v305_v39 = vld [vmem:[%s4518_s28 + $0x8] sm:$0xff]  ;;  %v4856_v44 = vld [vmem:[%s4518_s28 + $0x38] sm:$0xff]  ;;  %v4887_v51 = vld [vmem:[%s4518_s28 + $0x60] sm:$0xff] }
  0x6b   : > { %341 = vst.msk [vmem:[#allocation2 + $0x20] sm:$0xff] %vm336_vm2, %v4833_v38  ;;  %v4849_v43 = vld [vmem:[%s4518_s28 + $0x4a] sm:$0xff]  ;;  %v4859_v45 = vld [vmem:[%s4518_s28 + $0x18] sm:$0xff]  ;;  %v4876_v49 = vld [vmem:[%s4518_s28 + $0x62] sm:$0xff] }
  0x6c   : > { %338 = vst.msk [vmem:[#allocation2 + $0x8] sm:$0xff] %vm336_vm2, %v305_v39  ;;  %v4864_v46 = vld [vmem:[%s4518_s28 + $0x48] sm:$0xff]  ;;  %v4873_v48 = vld [vmem:[%s4518_s28 + $0x52] sm:$0xff]  ;;  %v4890_v52 = vld [vmem:[%s4518_s28 + $0x20] sm:$0xff] }
  0x6d   : > { %445 = vrot.lane.b32.xlu0 %v4689_v7, %s4460_s29  ;;  %447 = vrot.lane.b32.xlu1 %v4692_v8, %s4460_s29  ;;  %6991 = vst [vmem:[#allocation6_spill] sm:$0xff] %v4842_v41  ;;  %v4880_v50 = vld [vmem:[%s4518_s28 + $0x6a] sm:$0xff]  ;;  %v4904_v55 = vld [vmem:[%s4518_s28 + $0x7a] sm:$0xff] }
  0x6e   : > { %449 = vrot.lane.b32.xlu2 %v4695_v9, %s4460_s29  ;;  %6992 = vst [vmem:[#allocation7_spill] sm:$0xff] %v4845_v42  ;;  %v4895_v53 = vld [vmem:[%s4518_s28 + $0x68] sm:$0xff]  ;;  %v4911_v57 = vld [vmem:[%s4518_s28 + $0x92] sm:$0xff]  ;;  %v4918_v58 = vld [vmem:[%s4518_s28 + $0x80] sm:$0xff] }
  0x6f   : > { %6993 = vst [vmem:[#allocation8_spill] sm:$0xff] %v4849_v43  ;;  %v4907_v56 = vld [vmem:[%s4518_s28 + $0x82] sm:$0xff]  ;;  %v4921_v59 = vld [vmem:[%s4518_s28 + $0x50] sm:$0xff]  ;;  %v4935_v0 = vld [vmem:[%s4518_s28 + $0x9a] sm:$0xff] }
  0x70   : > { %342 = vst.msk [vmem:[#allocation2 + $0x28] sm:$0xff] %vm336_vm2, %v4856_v44  ;;  %v4931_v62 = vld [vmem:[%s4518_s28 + $0x90] sm:$0xff]  ;;  %v4954_v34 = vld [vmem:[%s4518_s28 + $0x78] sm:$0xff] }
  0x71   : > { %339 = vst.msk [vmem:[#allocation2 + $0x10] sm:$0xff] %vm336_vm2, %v4859_v45  ;;  %v4938_v1 = vld [vmem:[%s4518_s28 + $0xaa] sm:$0xff]  ;;  %v4944_v4 = vld [vmem:[%s4518_s28 + $0xb2] sm:$0xff] }
  0x72   : > { %343 = vst.msk [vmem:[#allocation2 + $0x30] sm:$0xff] %vm336_vm2, %v4864_v46 }
  0x73   : > { %6994 = vst [vmem:[#allocation9_spill] sm:$0xff] %v4873_v48 }
  0x74   : > { %6995 = vst [vmem:[#allocation10_spill] sm:$0xff] %v4876_v49 }
  0x75   : > { %451 = vrot.lane.b32.xlu0 %v4704_v10, %s4460_s29  ;;  %453 = vrot.lane.b32.xlu1 %v4707_v11, %s4460_s29  ;;  %6996 = vst [vmem:[#allocation11_spill] sm:$0xff] %v4880_v50 }
  0x76   : > { %455 = vrot.lane.b32.xlu2 %v4710_v12, %s4460_s29  ;;  %345 = vst.msk [vmem:[#allocation2 + $0x40] sm:$0xff] %vm336_vm2, %v4887_v51 }
  0x77   : > { %340 = vst.msk [vmem:[#allocation2 + $0x18] sm:$0xff] %vm336_vm2, %v4890_v52 }
  0x78   : > { %346 = vst.msk [vmem:[#allocation2 + $0x48] sm:$0xff] %vm336_vm2, %v4895_v53 }
  0x79   : > { %6997 = vst [vmem:[#allocation12_spill] sm:$0xff] %v4904_v55 }
  0x7a   : > { %6998 = vst [vmem:[#allocation13_spill] sm:$0xff] %v4907_v56 }
  0x7b   : > { %6999 = vst [vmem:[#allocation14_spill] sm:$0xff] %v4911_v57 }
  0x7c   : > { %348 = vst.msk [vmem:[#allocation2 + $0x58] sm:$0xff] %vm336_vm2, %v4918_v58 }
  0x7d   : > { %457 = vrot.lane.b32.xlu0 %v4719_v13, %s4460_s29  ;;  %459 = vrot.lane.b32.xlu1 %v4722_v14, %s4460_s29  ;;  %344 = vst.msk [vmem:[#allocation2 + $0x38] sm:$0xff] %vm336_vm2, %v4921_v59 }
  0x7e   : > { %461 = vrot.lane.b32.xlu2 %v4725_v15, %s4460_s29  ;;  %7000 = vst [vmem:[#allocation15_spill] sm:$0xff] %v4935_v0 }
  0x7f   : > { %7001 = vst [vmem:[#allocation16_spill] sm:$0xff] %v4938_v1 }
  0x80   : > { %349 = vst.msk [vmem:[#allocation2 + $0x60] sm:$0xff] %vm336_vm2, %v4931_v62 }
  0x81   : > { %7002 = vst [vmem:[#allocation17_spill] sm:$0xff] %v4944_v4 }
  0x82   : > { %347 = vst.msk [vmem:[#allocation2 + $0x50] sm:$0xff] %vm336_vm2, %v4954_v34 }
  0x85   : > { %463 = vrot.lane.b32.xlu0 %v4734_v16, %s4460_s29  ;;  %465 = vrot.lane.b32.xlu1 %v4737_v17, %s4460_s29 }
  0x86   : > { %467 = vrot.lane.b32.xlu2 %v4740_v18, %s4460_s29 }
  0x8d   : > { %469 = vrot.lane.b32.xlu0 %v4749_v19, %s4460_s29  ;;  %471 = vrot.lane.b32.xlu1 %v4752_v20, %s4460_s29 }
  0x8e   : > { %473 = vrot.lane.b32.xlu2 %v4755_v21, %s4460_s29 }
  0x95   : > { %475 = vrot.lane.b32.xlu0 %v4764_v22, %s4460_s29  ;;  %477 = vrot.lane.b32.xlu1 %v4767_v23, %s4460_s29 }
  0x96   : > { %479 = vrot.lane.b32.xlu2 %v4770_v24, %s4460_s29 }
  0x9d   : > { %481 = vrot.lane.b32.xlu0 %v4779_v25, %s4460_s29  ;;  %483 = vrot.lane.b32.xlu1 %v4782_v26, %s4460_s29 }
  0x9e   : > { %485 = vrot.lane.b32.xlu2 %v4785_v27, %s4460_s29 }
  0xa5   : > { %487 = vrot.lane.b32.xlu0 %v4794_v28, %s4460_s29  ;;  %489 = vrot.lane.b32.xlu1 %v4797_v29, %s4460_s29 }
  0xa6   : > { %491 = vrot.lane.b32.xlu2 %v4800_v30, %s4460_s29 }
  0xad   : > { %493 = vrot.lane.b32.xlu0 %v4809_v31, %s4460_s29  ;;  %495 = vrot.lane.b32.xlu1 %v4812_v32, %s4460_s29 }
  0xae   : > { %626 = vrot.lane.b32.xlu2 %v562_v33, %s4461_s30  ;;  %v4951_v33 = vld [vmem:[%s4518_s28 + $0xa8] sm:$0xff] }
  0xaf   : > { %351 = vst.msk [vmem:[#allocation2 + $0x70] sm:$0xff] %vm336_vm2, %v4951_v33 }
  0xb5   : > { %628 = vrot.lane.b32.xlu0 %v563_v35, %s4461_s30  ;;  %630 = vrot.lane.b32.xlu1 %v4824_v36, %s4461_s30 }
  0xb6   : > { %632 = vrot.lane.b32.xlu2 %v4827_v37, %s4461_s30  ;;  %v5133_v37 = vld [vmem:[%s4518_s28 + $0x172] sm:$0xff] }
  0xb7   : > { %7018 = vst [vmem:[#allocation33_spill] sm:$0xff] %v5133_v37 }
  0xb8   : > { %v442_v40 = vpop.permute.xlu2 %441 }
  0xb9   : > { %534 = vst.msk [vmem:[#allocation2 + $0x20] sm:$0xff] %vm529_vm3, %v442_v40  ;;  %v4964_v40 = vld [vmem:[%s4518_s28 + $0xb0] sm:$0xff] }
  0xba   : > { %352 = vst.msk [vmem:[#allocation2 + $0x78] sm:$0xff] %vm336_vm2, %v4964_v40 }
  0xbd   : > { %634 = vrot.lane.b32.xlu0 %v4842_v41, %s4461_s30  ;;  %636 = vrot.lane.b32.xlu1 %v4845_v42, %s4461_s30  ;;  %v5103_v42 = vld [vmem:[%s4518_s28 + $0x15a] sm:$0xff] }
  0xbe   : > { %638 = vrot.lane.b32.xlu2 %v4849_v43, %s4461_s30  ;;  %v5100_v43 = vld [vmem:[%s4518_s28 + $0x152] sm:$0xff]  ;;  %7016 = vst [vmem:[#allocation31_spill] sm:$0xff] %v5103_v42 }
  0xbf   : > { %7015 = vst [vmem:[#allocation30_spill] sm:$0xff] %v5100_v43 }
  0xc0   : > { %v444_v47 = vpop.permute.xlu2 %443 }
  0xc1   : > { %535 = vst.msk [vmem:[#allocation2 + $0x28] sm:$0xff] %vm529_vm3, %v444_v47 }
  0xc5   : > { %640 = vrot.lane.b32.xlu0 %v4873_v48, %s4461_s30  ;;  %642 = vrot.lane.b32.xlu1 %v4876_v49, %s4461_s30  ;;  %v5070_v49 = vld [vmem:[%s4518_s28 + $0x13a] sm:$0xff] }
  0xc6   : > { %644 = vrot.lane.b32.xlu2 %v4880_v50, %s4461_s30  ;;  %v5067_v50 = vld [vmem:[%s4518_s28 + $0x12a] sm:$0xff]  ;;  %7013 = vst [vmem:[#allocation28_spill] sm:$0xff] %v5070_v49 }
  0xc7   : > { %7012 = vst [vmem:[#allocation27_spill] sm:$0xff] %v5067_v50 }
  0xc8   : > { %v450_v54 = vpop.permute.xlu2 %449 }
  0xc9   : > { %538 = vst.msk [vmem:[#allocation2 + $0x40] sm:$0xff] %vm529_vm3, %v450_v54  ;;  %v4968_v54 = vld [vmem:[%s4518_s28 + $0xc2] sm:$0xff] }
  0xca   : > { %7003 = vst [vmem:[#allocation18_spill] sm:$0xff] %v4968_v54 }
  0xcd   : > { %646 = vrot.lane.b32.xlu0 %v4904_v55, %s4461_s30  ;;  %648 = vrot.lane.b32.xlu1 %v4907_v56, %s4461_s30  ;;  %v5037_v56 = vld [vmem:[%s4518_s28 + $0x112] sm:$0xff] }
  0xce   : > { %650 = vrot.lane.b32.xlu2 %v4911_v57, %s4461_s30  ;;  %v5034_v57 = vld [vmem:[%s4518_s28 + $0x10a] sm:$0xff]  ;;  %7010 = vst [vmem:[#allocation25_spill] sm:$0xff] %v5037_v56 }
  0xcf   : > { %v434_v60 = vpop.permute.xlu0 %433  ;;  %v438_v61 = vpop.permute.xlu1 %437  ;;  %7009 = vst [vmem:[#allocation24_spill] sm:$0xff] %v5034_v57 }
  0xd0   : > { %530 = vst.msk [vmem:[#allocation2] sm:$0xff] %vm529_vm3, %v434_v60  ;;  %v456_v63 = vpop.permute.xlu2 %455  ;;  %v4971_v60 = vld [vmem:[%s4518_s28 + $0xca] sm:$0xff] }
  0xd1   : > { %532 = vst.msk [vmem:[#allocation2 + $0x10] sm:$0xff] %vm529_vm3, %v438_v61  ;;  %v4977_v61 = vld [vmem:[%s4518_s28 + $0xda] sm:$0xff] }
  0xd2   : > { %541 = vst.msk [vmem:[#allocation2 + $0x58] sm:$0xff] %vm529_vm3, %v456_v63  ;;  %v4984_v63 = vld [vmem:[%s4518_s28 + $0xc8] sm:$0xff] }
  0xd3   : > { %7004 = vst [vmem:[#allocation19_spill] sm:$0xff] %v4971_v60 }
  0xd4   : > { %7005 = vst [vmem:[#allocation20_spill] sm:$0xff] %v4977_v61 }
  0xd5   : > { %652 = vrot.lane.b32.xlu0 %v4935_v0, %s4461_s30  ;;  %654 = vrot.lane.b32.xlu1 %v4938_v1, %s4461_s30  ;;  %354 = vst.msk [vmem:[#allocation2 + $0x88] sm:$0xff] %vm336_vm2, %v4984_v63  ;;  %v5004_v1 = vld [vmem:[%s4518_s28 + $0xf2] sm:$0xff] }
  0xd6   : > { %656 = vrot.lane.b32.xlu2 %v4944_v4, %s4461_s30  ;;  %v5001_v4 = vld [vmem:[%s4518_s28 + $0xe2] sm:$0xff]  ;;  %7007 = vst [vmem:[#allocation22_spill] sm:$0xff] %v5004_v1 }
  0xd7   : > { %v436_v35 = vpop.permute.xlu0 %435  ;;  %v440_v39 = vpop.permute.xlu1 %439  ;;  %7006 = vst [vmem:[#allocation21_spill] sm:$0xff] %v5001_v4 }
  0xd8   : > { %531 = vst.msk [vmem:[#allocation2 + $0x8] sm:$0xff] %vm529_vm3, %v436_v35  ;;  %v462_v47 = vpop.permute.xlu2 %461  ;;  %v4987_v35 = vld [vmem:[%s4518_s28 + $0x98] sm:$0xff] }
  0xd9   : > { %533 = vst.msk [vmem:[#allocation2 + $0x18] sm:$0xff] %vm529_vm3, %v440_v39 }
  0xda   : > { %544 = vst.msk [vmem:[#allocation2 + $0x70] sm:$0xff] %vm529_vm3, %v462_v47 }
  0xdb   : > { %350 = vst.msk [vmem:[#allocation2 + $0x68] sm:$0xff] %vm336_vm2, %v4987_v35 }
  0xdd   : > { %658 = vrot.lane.b32.xlu0 %v4968_v54, %s4461_s30  ;;  %660 = vrot.lane.b32.xlu1 %v4971_v60, %s4461_s30  ;;  %v4997_v60 = vld [vmem:[%s4518_s28 + $0xd8] sm:$0xff] }
  0xde   : > { %662 = vrot.lane.b32.xlu2 %v4977_v61, %s4461_s30  ;;  %355 = vst.msk [vmem:[#allocation2 + $0x90] sm:$0xff] %vm336_vm2, %v4997_v60  ;;  %v5010_v61 = vld [vmem:[%s4518_s28 + $0xfa] sm:$0xff] }
  0xdf   : > { %v446_v39 = vpop.permute.xlu0 %445  ;;  %v448_v47 = vpop.permute.xlu1 %447  ;;  %7008 = vst [vmem:[#allocation23_spill] sm:$0xff] %v5010_v61 }
  0xe0   : > { %536 = vst.msk [vmem:[#allocation2 + $0x30] sm:$0xff] %vm529_vm3, %v446_v39  ;;  %v468_v54 = vpop.permute.xlu2 %467  ;;  %v5017_v39 = vld [vmem:[%s4518_s28 + $0xf0] sm:$0xff] }
  0xe1   : > { %537 = vst.msk [vmem:[#allocation2 + $0x38] sm:$0xff] %vm529_vm3, %v448_v47  ;;  %v5020_v47 = vld [vmem:[%s4518_s28 + $0xc0] sm:$0xff] }
  0xe2   : > { %547 = vst.msk [vmem:[#allocation2 + $0x88] sm:$0xff] %vm529_vm3, %v468_v54 }
  0xe3   : > { %357 = vst.msk [vmem:[#allocation2 + $0xa0] sm:$0xff] %vm336_vm2, %v5017_v39 }
  0xe4   : > { %353 = vst.msk [vmem:[#allocation2 + $0x80] sm:$0xff] %vm336_vm2, %v5020_v47 }
  0xe5   : > { %664 = vrot.lane.b32.xlu0 %v5001_v4, %s4461_s30  ;;  %666 = vrot.lane.b32.xlu1 %v5004_v1, %s4461_s30  ;;  %v5030_v1 = vld [vmem:[%s4518_s28 + $0xf8] sm:$0xff] }
  0xe6   : > { %668 = vrot.lane.b32.xlu2 %v5010_v61, %s4461_s30  ;;  %358 = vst.msk [vmem:[#allocation2 + $0xa8] sm:$0xff] %vm336_vm2, %v5030_v1  ;;  %v5043_v61 = vld [vmem:[%s4518_s28 + $0x122] sm:$0xff] }
  0xe7   : > { %v452_v54 = vpop.permute.xlu0 %451  ;;  %v454_v0 = vpop.permute.xlu1 %453  ;;  %7011 = vst [vmem:[#allocation26_spill] sm:$0xff] %v5043_v61 }
  0xe8   : > { %539 = vst.msk [vmem:[#allocation2 + $0x48] sm:$0xff] %vm529_vm3, %v452_v54  ;;  %v474_v4 = vpop.permute.xlu2 %473  ;;  %v5053_v54 = vld [vmem:[%s4518_s28 + $0xe0] sm:$0xff] }
  0xe9   : > { %540 = vst.msk [vmem:[#allocation2 + $0x50] sm:$0xff] %vm529_vm3, %v454_v0  ;;  %v5050_v0 = vld [vmem:[%s4518_s28 + $0x110] sm:$0xff] }
  0xea   : > { %550 = vst.msk [vmem:[#allocation2 + $0xa0] sm:$0xff] %vm529_vm3, %v474_v4 }
  0xeb   : > { %360 = vst.msk [vmem:[#allocation2 + $0xb8] sm:$0xff] %vm336_vm2, %v5050_v0 }
  0xec   : > { %356 = vst.msk [vmem:[#allocation2 + $0x98] sm:$0xff] %vm336_vm2, %v5053_v54 }
  0xed   : > { %670 = vrot.lane.b32.xlu0 %v5034_v57, %s4461_s30  ;;  %672 = vrot.lane.b32.xlu1 %v5037_v56, %s4461_s30  ;;  %v5063_v56 = vld [vmem:[%s4518_s28 + $0x120] sm:$0xff] }
  0xee   : > { %674 = vrot.lane.b32.xlu2 %v5043_v61, %s4461_s30  ;;  %361 = vst.msk [vmem:[#allocation2 + $0xc0] sm:$0xff] %vm336_vm2, %v5063_v56  ;;  %v5076_v61 = vld [vmem:[%s4518_s28 + $0x142] sm:$0xff] }
  0xef   : > { %v458_v4 = vpop.permute.xlu0 %457  ;;  %v460_v55 = vpop.permute.xlu1 %459  ;;  %7014 = vst [vmem:[#allocation29_spill] sm:$0xff] %v5076_v61 }
  0xf0   : > { %542 = vst.msk [vmem:[#allocation2 + $0x60] sm:$0xff] %vm529_vm3, %v458_v4  ;;  %v480_v57 = vpop.permute.xlu2 %479  ;;  %v5086_v4 = vld [vmem:[%s4518_s28 + $0x108] sm:$0xff] }
  0xf1   : > { %543 = vst.msk [vmem:[#allocation2 + $0x68] sm:$0xff] %vm529_vm3, %v460_v55  ;;  %v5083_v55 = vld [vmem:[%s4518_s28 + $0x138] sm:$0xff] }
  0xf2   : > { %553 = vst.msk [vmem:[#allocation2 + $0xb8] sm:$0xff] %vm529_vm3, %v480_v57 }
  0xf3   : > { %363 = vst.msk [vmem:[#allocation2 + $0xd0] sm:$0xff] %vm336_vm2, %v5083_v55 }
  0xf4   : > { %359 = vst.msk [vmem:[#allocation2 + $0xb0] sm:$0xff] %vm336_vm2, %v5086_v4 }
  0xf5   : > { %676 = vrot.lane.b32.xlu0 %v5067_v50, %s4461_s30  ;;  %678 = vrot.lane.b32.xlu1 %v5070_v49, %s4461_s30  ;;  %v5096_v49 = vld [vmem:[%s4518_s28 + $0x140] sm:$0xff] }
  0xf6   : > { %680 = vrot.lane.b32.xlu2 %v5076_v61, %s4461_s30  ;;  %364 = vst.msk [vmem:[#allocation2 + $0xd8] sm:$0xff] %vm336_vm2, %v5096_v49  ;;  %v5109_v61 = vld [vmem:[%s4518_s28 + $0x16a] sm:$0xff] }
  0xf7   : > { %v464_v57 = vpop.permute.xlu0 %463  ;;  %v466_v48 = vpop.permute.xlu1 %465  ;;  %7017 = vst [vmem:[#allocation32_spill] sm:$0xff] %v5109_v61 }
  0xf8   : > { %545 = vst.msk [vmem:[#allocation2 + $0x78] sm:$0xff] %vm529_vm3, %v464_v57  ;;  %v486_v50 = vpop.permute.xlu2 %485  ;;  %v5119_v57 = vld [vmem:[%s4518_s28 + $0x128] sm:$0xff] }
  0xf9   : > { %546 = vst.msk [vmem:[#allocation2 + $0x80] sm:$0xff] %vm529_vm3, %v466_v48  ;;  %v5116_v48 = vld [vmem:[%s4518_s28 + $0x158] sm:$0xff] }
  0xfa   : > { %556 = vst.msk [vmem:[#allocation2 + $0xd0] sm:$0xff] %vm529_vm3, %v486_v50 }
  0xfb   : > { %366 = vst.msk [vmem:[#allocation2 + $0xe8] sm:$0xff] %vm336_vm2, %v5116_v48 }
  0xfc   : > { %362 = vst.msk [vmem:[#allocation2 + $0xc8] sm:$0xff] %vm336_vm2, %v5119_v57 }
  0xfd   : > { %682 = vrot.lane.b32.xlu0 %v5100_v43, %s4461_s30  ;;  %684 = vrot.lane.b32.xlu1 %v5103_v42, %s4461_s30  ;;  %v5129_v43 = vld [vmem:[%s4518_s28 + $0x168] sm:$0xff] }
  0xfe   : > { %686 = vrot.lane.b32.xlu2 %v5109_v61, %s4461_s30  ;;  %367 = vst.msk [vmem:[#allocation2 + $0xf0] sm:$0xff] %vm336_vm2, %v5129_v43 }
  0xff   : > { %v470_v50 = vpop.permute.xlu0 %469  ;;  %v472_v41 = vpop.permute.xlu1 %471 }
 0x100   : > { %548 = vst.msk [vmem:[#allocation2 + $0x90] sm:$0xff] %vm529_vm3, %v470_v50  ;;  %v492_v42 = vpop.permute.xlu2 %491  ;;  %v5143_v50 = vld [vmem:[%s4518_s28 + $0x150] sm:$0xff] }
 0x101   : > { %549 = vst.msk [vmem:[#allocation2 + $0x98] sm:$0xff] %vm529_vm3, %v472_v41 }
 0x102   : > { %559 = vst.msk [vmem:[#allocation2 + $0xe8] sm:$0xff] %vm529_vm3, %v492_v42 }
 0x103   : > { %365 = vst.msk [vmem:[#allocation2 + $0xe0] sm:$0xff] %vm336_vm2, %v5143_v50 }
 0x105   : > { %688 = vrot.lane.b32.xlu0 %v5133_v37, %s4461_s30  ;;  %820 = vrot.lane.b32.xlu1 %v4859_v45, %s4462_s6  ;;  %v5157_v45 = vld [vmem:[%s4518_s28 + $0x170] sm:$0xff] }
 0x106   : > { %822 = vrot.lane.b32.xlu2 %v4890_v52, %s4462_s6  ;;  %368 = vst.msk [vmem:[#allocation2 + $0xf8] sm:$0xff] %vm336_vm2, %v5157_v45  ;;  %vm3191_vm2 = vcmask 392512  }
 0x107   : > { %v476_v41 = vpop.permute.xlu0 %475  ;;  %v478_v61 = vpop.permute.xlu1 %477 }
 0x108   : > { %551 = vst.msk [vmem:[#allocation2 + $0xa8] sm:$0xff] %vm529_vm3, %v476_v41  ;;  %v627_v42 = vpop.permute.xlu2 %626 }
 0x109   : > { %552 = vst.msk [vmem:[#allocation2 + $0xb0] sm:$0xff] %vm529_vm3, %v478_v61 }
 0x10a   : > { %723 = vst.msk [vmem:[#allocation2] sm:$0xff] %vm722_vm4, %v627_v42 }
 0x10d   : > { %824 = vrot.lane.b32.xlu0 %v4833_v38, %s4462_s6  ;;  %826 = vrot.lane.b32.xlu1 %v4856_v44, %s4462_s6 }
 0x10e   : > { %828 = vrot.lane.b32.xlu2 %v4864_v46, %s4462_s6 }
 0x10f   : > { %v482_v52 = vpop.permute.xlu0 %481  ;;  %v484_v37 = vpop.permute.xlu1 %483 }
 0x110   : > { %554 = vst.msk [vmem:[#allocation2 + $0xc0] sm:$0xff] %vm529_vm3, %v482_v52  ;;  %v633_v61 = vpop.permute.xlu2 %632 }
 0x111   : > { %555 = vst.msk [vmem:[#allocation2 + $0xc8] sm:$0xff] %vm529_vm3, %v484_v37 }
 0x112   : > { %726 = vst.msk [vmem:[#allocation2 + $0x18] sm:$0xff] %vm722_vm4, %v633_v61 }
 0x115   : > { %830 = vrot.lane.b32.xlu0 %v4921_v59, %s4462_s6  ;;  %832 = vrot.lane.b32.xlu1 %v4887_v51, %s4462_s6 }
 0x116   : > { %834 = vrot.lane.b32.xlu2 %v4895_v53, %s4462_s6 }
 0x117   : > { %v488_v38 = vpop.permute.xlu0 %487  ;;  %v490_v44 = vpop.permute.xlu1 %489 }
 0x118   : > { %557 = vst.msk [vmem:[#allocation2 + $0xd8] sm:$0xff] %vm529_vm3, %v488_v38  ;;  %v639_v41 = vpop.permute.xlu2 %638 }
 0x119   : > { %558 = vst.msk [vmem:[#allocation2 + $0xe0] sm:$0xff] %vm529_vm3, %v490_v44 }
 0x11a   : > { %729 = vst.msk [vmem:[#allocation2 + $0x30] sm:$0xff] %vm722_vm4, %v639_v41 }
 0x11d   : > { %836 = vrot.lane.b32.xlu0 %v4954_v34, %s4462_s6  ;;  %838 = vrot.lane.b32.xlu1 %v4918_v58, %s4462_s6 }
 0x11e   : > { %840 = vrot.lane.b32.xlu2 %v4931_v62, %s4462_s6 }
 0x11f   : > { %v494_v37 = vpop.permute.xlu0 %493  ;;  %v496_v51 = vpop.permute.xlu1 %495 }
 0x120   : > { %560 = vst.msk [vmem:[#allocation2 + $0xf0] sm:$0xff] %vm529_vm3, %v494_v37  ;;  %v645_v42 = vpop.permute.xlu2 %644 }
 0x121   : > { %561 = vst.msk [vmem:[#allocation2 + $0xf8] sm:$0xff] %vm529_vm3, %v496_v51  ;;  %vm3941_vm3 = vcmask 1043456  }
 0x122   : > { %732 = vst.msk [vmem:[#allocation2 + $0x48] sm:$0xff] %vm722_vm4, %v645_v42 }
 0x125   : > { %842 = vrot.lane.b32.xlu0 %v4987_v35, %s4462_s6  ;;  %844 = vrot.lane.b32.xlu1 %v4951_v33, %s4462_s6 }
 0x126   : > { %846 = vrot.lane.b32.xlu2 %v4964_v40, %s4462_s6 }
 0x127   : > { %v629_v52 = vpop.permute.xlu0 %628  ;;  %v631_v58 = vpop.permute.xlu1 %630 }
 0x128   : > { %724 = vst.msk [vmem:[#allocation2 + $0x8] sm:$0xff] %vm722_vm4, %v629_v52  ;;  %v651_v61 = vpop.permute.xlu2 %650 }
 0x129   : > { %725 = vst.msk [vmem:[#allocation2 + $0x10] sm:$0xff] %vm722_vm4, %v631_v58 }
 0x12a   : > { %735 = vst.msk [vmem:[#allocation2 + $0x60] sm:$0xff] %vm722_vm4, %v651_v61 }
 0x12d   : > { %848 = vrot.lane.b32.xlu0 %v5020_v47, %s4462_s6  ;;  %850 = vrot.lane.b32.xlu1 %v4984_v63, %s4462_s6 }
 0x12e   : > { %852 = vrot.lane.b32.xlu2 %v4997_v60, %s4462_s6 }
 0x12f   : > { %v635_v38 = vpop.permute.xlu0 %634  ;;  %v637_v33 = vpop.permute.xlu1 %636 }
 0x130   : > { %727 = vst.msk [vmem:[#allocation2 + $0x20] sm:$0xff] %vm722_vm4, %v635_v38  ;;  %v657_v44 = vpop.permute.xlu2 %656 }
 0x131   : > { %728 = vst.msk [vmem:[#allocation2 + $0x28] sm:$0xff] %vm722_vm4, %v637_v33 }
 0x132   : > { %738 = vst.msk [vmem:[#allocation2 + $0x78] sm:$0xff] %vm722_vm4, %v657_v44  ;;  %v5238_v44 = vld [vmem:[%s4518_s28 + $0x180] sm:$0xff] }
 0x135   : > { %854 = vrot.lane.b32.xlu0 %v5053_v54, %s4462_s6  ;;  %856 = vrot.lane.b32.xlu1 %v5017_v39, %s4462_s6 }
 0x136   : > { %858 = vrot.lane.b32.xlu2 %v5030_v1, %s4462_s6 }
 0x137   : > { %v641_v41 = vpop.permute.xlu0 %640  ;;  %v643_v63 = vpop.permute.xlu1 %642 }
 0x138   : > { %730 = vst.msk [vmem:[#allocation2 + $0x38] sm:$0xff] %vm722_vm4, %v641_v41  ;;  %v663_v37 = vpop.permute.xlu2 %662  ;;  %v5242_v41 = vld [vmem:[%s4518_s28 + $0x188] sm:$0xff] }
 0x139   : > { %731 = vst.msk [vmem:[#allocation2 + $0x40] sm:$0xff] %vm722_vm4, %v643_v63 }
 0x13a   : > { %741 = vst.msk [vmem:[#allocation2 + $0x90] sm:$0xff] %vm722_vm4, %v663_v37 }
 0x13d   : > { %860 = vrot.lane.b32.xlu0 %v5086_v4, %s4462_s6  ;;  %862 = vrot.lane.b32.xlu1 %v5050_v0, %s4462_s6 }
 0x13e   : > { %864 = vrot.lane.b32.xlu2 %v5063_v56, %s4462_s6 }
 0x13f   : > { %v647_v51 = vpop.permute.xlu0 %646  ;;  %v649_v39 = vpop.permute.xlu1 %648 }
 0x140   : > { %733 = vst.msk [vmem:[#allocation2 + $0x50] sm:$0xff] %vm722_vm4, %v647_v51  ;;  %v669_v42 = vpop.permute.xlu2 %668 }
 0x141   : > { %734 = vst.msk [vmem:[#allocation2 + $0x58] sm:$0xff] %vm722_vm4, %v649_v39 }
 0x142   : > { %744 = vst.msk [vmem:[#allocation2 + $0xa8] sm:$0xff] %vm722_vm4, %v669_v42 }
 0x145   : > { %866 = vrot.lane.b32.xlu0 %v5119_v57, %s4462_s6  ;;  %868 = vrot.lane.b32.xlu1 %v5083_v55, %s4462_s6 }
 0x146   : > { %870 = vrot.lane.b32.xlu2 %v5096_v49, %s4462_s6 }
 0x147   : > { %v653_v0 = vpop.permute.xlu0 %652  ;;  %v655_v52 = vpop.permute.xlu1 %654 }
 0x148   : > { %736 = vst.msk [vmem:[#allocation2 + $0x68] sm:$0xff] %vm722_vm4, %v653_v0  ;;  %v675_v58 = vpop.permute.xlu2 %674 }
 0x149   : > { %737 = vst.msk [vmem:[#allocation2 + $0x70] sm:$0xff] %vm722_vm4, %v655_v52  ;;  %v5343_v52 = vld [vmem:[%s4518_s28 + $0x181] sm:$0xff] }
 0x14a   : > { %747 = vst.msk [vmem:[#allocation2 + $0xc0] sm:$0xff] %vm722_vm4, %v675_v58  ;;  %v5346_v58 = vld [vmem:[%s4518_s28 + $0x189] sm:$0xff] }
 0x14d   : > { %872 = vrot.lane.b32.xlu0 %v5143_v50, %s4462_s6  ;;  %874 = vrot.lane.b32.xlu1 %v5116_v48, %s4462_s6 }
 0x14e   : > { %876 = vrot.lane.b32.xlu2 %v5129_v43, %s4462_s6 }
 0x14f   : > { %v659_v61 = vpop.permute.xlu0 %658  ;;  %v661_v38 = vpop.permute.xlu1 %660 }
 0x150   : > { %739 = vst.msk [vmem:[#allocation2 + $0x80] sm:$0xff] %vm722_vm4, %v659_v61  ;;  %v681_v33 = vpop.permute.xlu2 %680  ;;  %v7019_v61 = vld [vmem:[#allocation5_spill] sm:$0xff] }
 0x151   : > { %740 = vst.msk [vmem:[#allocation2 + $0x88] sm:$0xff] %vm722_vm4, %v661_v38  ;;  %v7020_v38 = vld [vmem:[#allocation6_spill] sm:$0xff] }
 0x152   : > { %750 = vst.msk [vmem:[#allocation2 + $0xd8] sm:$0xff] %vm722_vm4, %v681_v33 }
 0x155   : > { %878 = vrot.lane.b32.xlu0 %v5157_v45, %s4462_s6  ;;  %880 = vrot.lane.b32.xlu1 %v5238_v44, %s4462_s6 }
 0x156   : > { %882 = vrot.lane.b32.xlu2 %v5242_v41, %s4462_s6 }
 0x157   : > { %v665_v63 = vpop.permute.xlu0 %664  ;;  %v667_v37 = vpop.permute.xlu1 %666 }
 0x158   : > { %742 = vst.msk [vmem:[#allocation2 + $0x98] sm:$0xff] %vm722_vm4, %v665_v63  ;;  %v687_v51 = vpop.permute.xlu2 %686 }
 0x159   : > { %743 = vst.msk [vmem:[#allocation2 + $0xa0] sm:$0xff] %vm722_vm4, %v667_v37  ;;  %v7021_v37 = vld [vmem:[#allocation7_spill] sm:$0xff] }
 0x15a   : > { %753 = vst.msk [vmem:[#allocation2 + $0xf0] sm:$0xff] %vm722_vm4, %v687_v51  ;;  %v7022_v51 = vld [vmem:[#allocation8_spill] sm:$0xff] }
 0x15d   : > { %1013 = vrot.lane.b32.xlu0 %v4666_v2, %s4463_s7  ;;  %1015 = vrot.lane.b32.xlu1 %v4678_v5, %s4463_s7 }
 0x15e   : > { %1017 = vrot.lane.b32.xlu2 %v4672_v3, %s4463_s7 }
 0x15f   : > { %v671_v39 = vpop.permute.xlu0 %670  ;;  %v673_v42 = vpop.permute.xlu1 %672 }
 0x160   : > { %745 = vst.msk [vmem:[#allocation2 + $0xb0] sm:$0xff] %vm722_vm4, %v671_v39  ;;  %v823_v0 = vpop.permute.xlu2 %822  ;;  %v7023_v39 = vld [vmem:[#allocation9_spill] sm:$0xff] }
 0x161   : > { %746 = vst.msk [vmem:[#allocation2 + $0xb8] sm:$0xff] %vm722_vm4, %v673_v42 }
 0x162   : > { %918 = vst.msk [vmem:[#allocation2 + $0x8] sm:$0xff] %vm916_vm5, %v823_v0 }
 0x165   : > { %1019 = vrot.lane.b32.xlu0 %v4681_v6, %s4463_s7  ;;  %1021 = vrot.lane.b32.xlu1 %v4689_v7, %s4463_s7 }
 0x166   : > { %1023 = vrot.lane.b32.xlu2 %v4692_v8, %s4463_s7 }
 0x167   : > { %v677_v2 = vpop.permute.xlu0 %676  ;;  %v679_v5 = vpop.permute.xlu1 %678 }
 0x168   : > { %748 = vst.msk [vmem:[#allocation2 + $0xc8] sm:$0xff] %vm722_vm4, %v677_v2  ;;  %v829_v3 = vpop.permute.xlu2 %828  ;;  %v7024_v2 = vld [vmem:[#allocation10_spill] sm:$0xff] }
 0x169   : > { %749 = vst.msk [vmem:[#allocation2 + $0xd0] sm:$0xff] %vm722_vm4, %v679_v5 }
 0x16a   : > { %921 = vst.msk [vmem:[#allocation2 + $0x20] sm:$0xff] %vm916_vm5, %v829_v3  ;;  %v7025_v3 = vld [vmem:[#allocation11_spill] sm:$0xff] }
 0x16d   : > { %1025 = vrot.lane.b32.xlu0 %v4695_v9, %s4463_s7  ;;  %1027 = vrot.lane.b32.xlu1 %v4704_v10, %s4463_s7 }
 0x16e   : > { %1029 = vrot.lane.b32.xlu2 %v4707_v11, %s4463_s7 }
 0x16f   : > { %v683_v6 = vpop.permute.xlu0 %682  ;;  %v685_v7 = vpop.permute.xlu1 %684 }
 0x170   : > { %751 = vst.msk [vmem:[#allocation2 + $0xe0] sm:$0xff] %vm722_vm4, %v683_v6  ;;  %v835_v8 = vpop.permute.xlu2 %834  ;;  %v7026_v6 = vld [vmem:[#allocation12_spill] sm:$0xff] }
 0x171   : > { %752 = vst.msk [vmem:[#allocation2 + $0xe8] sm:$0xff] %vm722_vm4, %v685_v7 }
 0x172   : > { %924 = vst.msk [vmem:[#allocation2 + $0x38] sm:$0xff] %vm916_vm5, %v835_v8 }
 0x175   : > { %1031 = vrot.lane.b32.xlu0 %v4710_v12, %s4463_s7  ;;  %1033 = vrot.lane.b32.xlu1 %v4719_v13, %s4463_s7 }
 0x176   : > { %1035 = vrot.lane.b32.xlu2 %v4722_v14, %s4463_s7 }
 0x177   : > { %v689_v9 = vpop.permute.xlu0 %688  ;;  %v821_v10 = vpop.permute.xlu1 %820 }
 0x178   : > { %754 = vst.msk [vmem:[#allocation2 + $0xf8] sm:$0xff] %vm722_vm4, %v689_v9  ;;  %v841_v11 = vpop.permute.xlu2 %840  ;;  %v7027_v9 = vld [vmem:[#allocation13_spill] sm:$0xff]  ;;  %vm3385_vm4 = vcmask 458112  }
 0x179   : > { %917 = vst.msk [vmem:[#allocation2] sm:$0xff] %vm916_vm5, %v821_v10 }
 0x17a   : > { %927 = vst.msk [vmem:[#allocation2 + $0x50] sm:$0xff] %vm916_vm5, %v841_v11  ;;  %v7028_v11 = vld [vmem:[#allocation14_spill] sm:$0xff] }
 0x17d   : > { %1037 = vrot.lane.b32.xlu0 %v4725_v15, %s4463_s7  ;;  %1039 = vrot.lane.b32.xlu1 %v4734_v16, %s4463_s7 }
 0x17e   : > { %1041 = vrot.lane.b32.xlu2 %v4737_v17, %s4463_s7 }
 0x17f   : > { %v825_v12 = vpop.permute.xlu0 %824  ;;  %v827_v13 = vpop.permute.xlu1 %826 }
 0x180   : > { %919 = vst.msk [vmem:[#allocation2 + $0x10] sm:$0xff] %vm916_vm5, %v825_v12  ;;  %v847_v14 = vpop.permute.xlu2 %846  ;;  %v7029_v12 = vld [vmem:[#allocation15_spill] sm:$0xff] }
 0x181   : > { %920 = vst.msk [vmem:[#allocation2 + $0x18] sm:$0xff] %vm916_vm5, %v827_v13 }
 0x182   : > { %930 = vst.msk [vmem:[#allocation2 + $0x68] sm:$0xff] %vm916_vm5, %v847_v14 }
 0x185   : > { %1043 = vrot.lane.b32.xlu0 %v4740_v18, %s4463_s7  ;;  %1045 = vrot.lane.b32.xlu1 %v4749_v19, %s4463_s7 }
 0x186   : > { %1047 = vrot.lane.b32.xlu2 %v4752_v20, %s4463_s7 }
 0x187   : > { %v831_v15 = vpop.permute.xlu0 %830  ;;  %v833_v16 = vpop.permute.xlu1 %832 }
 0x188   : > { %922 = vst.msk [vmem:[#allocation2 + $0x28] sm:$0xff] %vm916_vm5, %v831_v15  ;;  %v853_v17 = vpop.permute.xlu2 %852  ;;  %v7030_v15 = vld [vmem:[#allocation16_spill] sm:$0xff] }
 0x189   : > { %923 = vst.msk [vmem:[#allocation2 + $0x30] sm:$0xff] %vm916_vm5, %v833_v16 }
 0x18a   : > { %933 = vst.msk [vmem:[#allocation2 + $0x80] sm:$0xff] %vm916_vm5, %v853_v17  ;;  %v7031_v17 = vld [vmem:[#allocation17_spill] sm:$0xff] }
 0x18d   : > { %1049 = vrot.lane.b32.xlu0 %v4755_v21, %s4463_s7  ;;  %1051 = vrot.lane.b32.xlu1 %v4764_v22, %s4463_s7 }
 0x18e   : > { %1053 = vrot.lane.b32.xlu2 %v4767_v23, %s4463_s7 }
 0x18f   : > { %v837_v18 = vpop.permute.xlu0 %836  ;;  %v839_v19 = vpop.permute.xlu1 %838 }
 0x190   : > { %925 = vst.msk [vmem:[#allocation2 + $0x40] sm:$0xff] %vm916_vm5, %v837_v18  ;;  %v859_v20 = vpop.permute.xlu2 %858  ;;  %v7032_v18 = vld [vmem:[#allocation18_spill] sm:$0xff] }
 0x191   : > { %926 = vst.msk [vmem:[#allocation2 + $0x48] sm:$0xff] %vm916_vm5, %v839_v19 }
 0x192   : > { %936 = vst.msk [vmem:[#allocation2 + $0x98] sm:$0xff] %vm916_vm5, %v859_v20 }
 0x195   : > { %1055 = vrot.lane.b32.xlu0 %v4770_v24, %s4463_s7  ;;  %1057 = vrot.lane.b32.xlu1 %v4779_v25, %s4463_s7 }
 0x196   : > { %1059 = vrot.lane.b32.xlu2 %v4782_v26, %s4463_s7 }
 0x197   : > { %v843_v21 = vpop.permute.xlu0 %842  ;;  %v845_v22 = vpop.permute.xlu1 %844 }
 0x198   : > { %928 = vst.msk [vmem:[#allocation2 + $0x58] sm:$0xff] %vm916_vm5, %v843_v21  ;;  %v865_v23 = vpop.permute.xlu2 %864  ;;  %v7033_v21 = vld [vmem:[#allocation19_spill] sm:$0xff] }
 0x199   : > { %929 = vst.msk [vmem:[#allocation2 + $0x60] sm:$0xff] %vm916_vm5, %v845_v22 }
 0x19a   : > { %939 = vst.msk [vmem:[#allocation2 + $0xb0] sm:$0xff] %vm916_vm5, %v865_v23  ;;  %v7034_v23 = vld [vmem:[#allocation20_spill] sm:$0xff] }
 0x19d   : > { %1061 = vrot.lane.b32.xlu0 %v4785_v27, %s4463_s7  ;;  %1063 = vrot.lane.b32.xlu1 %v4794_v28, %s4463_s7 }
 0x19e   : > { %1065 = vrot.lane.b32.xlu2 %v4797_v29, %s4463_s7 }
 0x19f   : > { %v849_v24 = vpop.permute.xlu0 %848  ;;  %v851_v25 = vpop.permute.xlu1 %850 }
 0x1a0   : > { %931 = vst.msk [vmem:[#allocation2 + $0x70] sm:$0xff] %vm916_vm5, %v849_v24  ;;  %v871_v26 = vpop.permute.xlu2 %870  ;;  %v7035_v24 = vld [vmem:[#allocation21_spill] sm:$0xff] }
 0x1a1   : > { %932 = vst.msk [vmem:[#allocation2 + $0x78] sm:$0xff] %vm916_vm5, %v851_v25 }
 0x1a2   : > { %942 = vst.msk [vmem:[#allocation2 + $0xc8] sm:$0xff] %vm916_vm5, %v871_v26 }
 0x1a5   : > { %1067 = vrot.lane.b32.xlu0 %v4800_v30, %s4463_s7  ;;  %1069 = vrot.lane.b32.xlu1 %v4809_v31, %s4463_s7 }
 0x1a6   : > { %1071 = vrot.lane.b32.xlu2 %v4812_v32, %s4463_s7 }
 0x1a7   : > { %v855_v27 = vpop.permute.xlu0 %854  ;;  %v857_v28 = vpop.permute.xlu1 %856 }
 0x1a8   : > { %934 = vst.msk [vmem:[#allocation2 + $0x88] sm:$0xff] %vm916_vm5, %v855_v27  ;;  %v877_v29 = vpop.permute.xlu2 %876  ;;  %v7036_v27 = vld [vmem:[#allocation22_spill] sm:$0xff] }
 0x1a9   : > { %935 = vst.msk [vmem:[#allocation2 + $0x90] sm:$0xff] %vm916_vm5, %v857_v28 }
 0x1aa   : > { %945 = vst.msk [vmem:[#allocation2 + $0xe0] sm:$0xff] %vm916_vm5, %v877_v29  ;;  %v7037_v29 = vld [vmem:[#allocation23_spill] sm:$0xff] }
 0x1ad   : > { %1073 = vrot.lane.b32.xlu0 %v5343_v52, %s4463_s7  ;;  %1075 = vrot.lane.b32.xlu1 %v5346_v58, %s4463_s7 }
 0x1ae   : > { %1206 = vrot.lane.b32.xlu2 %v4824_v36, %s4464_s8 }
 0x1af   : > { %v861_v30 = vpop.permute.xlu0 %860  ;;  %v863_v31 = vpop.permute.xlu1 %862 }
 0x1b0   : > { %937 = vst.msk [vmem:[#allocation2 + $0xa0] sm:$0xff] %vm916_vm5, %v861_v30  ;;  %v883_v32 = vpop.permute.xlu2 %882  ;;  %v7038_v30 = vld [vmem:[#allocation24_spill] sm:$0xff] }
 0x1b1   : > { %938 = vst.msk [vmem:[#allocation2 + $0xa8] sm:$0xff] %vm916_vm5, %v863_v31 }
 0x1b2   : > { %948 = vst.msk [vmem:[#allocation2 + $0xf8] sm:$0xff] %vm916_vm5, %v883_v32 }
 0x1b5   : > { %1208 = vrot.lane.b32.xlu0 %v7019_v61, %s4464_s8  ;;  %1210 = vrot.lane.b32.xlu1 %v7020_v38, %s4464_s8  ;;  %v7039_v61 = vld [vmem:[#allocation25_spill] sm:$0xff] }
 0x1b6   : > { %1212 = vrot.lane.b32.xlu2 %v7021_v37, %s4464_s8 }
 0x1b7   : > { %v867_v33 = vpop.permute.xlu0 %866  ;;  %v869_v63 = vpop.permute.xlu1 %868 }
 0x1b8   : > { %940 = vst.msk [vmem:[#allocation2 + $0xb8] sm:$0xff] %vm916_vm5, %v867_v33  ;;  %v1018_v36 = vpop.permute.xlu2 %1017  ;;  %v7040_v33 = vld [vmem:[#allocation26_spill] sm:$0xff] }
 0x1b9   : > { %941 = vst.msk [vmem:[#allocation2 + $0xc0] sm:$0xff] %vm916_vm5, %v869_v63  ;;  %v7041_v63 = vld [vmem:[#allocation27_spill] sm:$0xff] }
 0x1ba   : > { %1112 = vst.msk [vmem:[#allocation2 + $0x10] sm:$0xff] %vm1109_vm6, %v1018_v36 }
 0x1bd   : > { %1214 = vrot.lane.b32.xlu0 %v7022_v51, %s4464_s8  ;;  %1216 = vrot.lane.b32.xlu1 %v7023_v39, %s4464_s8  ;;  %v7042_v51 = vld [vmem:[#allocation28_spill] sm:$0xff] }
 0x1be   : > { %1218 = vrot.lane.b32.xlu2 %v7024_v2, %s4464_s8 }
 0x1bf   : > { %v873_v42 = vpop.permute.xlu0 %872  ;;  %v875_v0 = vpop.permute.xlu1 %874 }
 0x1c0   : > { %943 = vst.msk [vmem:[#allocation2 + $0xd0] sm:$0xff] %vm916_vm5, %v873_v42  ;;  %v1024_v5 = vpop.permute.xlu2 %1023  ;;  %v7043_v42 = vld [vmem:[#allocation29_spill] sm:$0xff] }
 0x1c1   : > { %944 = vst.msk [vmem:[#allocation2 + $0xd8] sm:$0xff] %vm916_vm5, %v875_v0  ;;  %v7044_v0 = vld [vmem:[#allocation30_spill] sm:$0xff] }
 0x1c2   : > { %1115 = vst.msk [vmem:[#allocation2 + $0x28] sm:$0xff] %vm1109_vm6, %v1024_v5 }
 0x1c5   : > { %1220 = vrot.lane.b32.xlu0 %v7025_v3, %s4464_s8  ;;  %1222 = vrot.lane.b32.xlu1 %v7026_v6, %s4464_s8  ;;  %v7045_v3 = vld [vmem:[#allocation31_spill] sm:$0xff] }
 0x1c6   : > { %1224 = vrot.lane.b32.xlu2 %v7027_v9, %s4464_s8  ;;  %v7047_v9 = vld [vmem:[#allocation33_spill] sm:$0xff] }
 0x1c7   : > { %v879_v7 = vpop.permute.xlu0 %878  ;;  %v881_v8 = vpop.permute.xlu1 %880 }
 0x1c8   : > { %946 = vst.msk [vmem:[#allocation2 + $0xe8] sm:$0xff] %vm916_vm5, %v879_v7  ;;  %v1030_v10 = vpop.permute.xlu2 %1029  ;;  %v5440_v7 = vld [vmem:[%s4518_s28 + $0x182] sm:$0xff] }
 0x1c9   : > { %947 = vst.msk [vmem:[#allocation2 + $0xf0] sm:$0xff] %vm916_vm5, %v881_v8  ;;  %v7046_v8 = vld [vmem:[#allocation32_spill] sm:$0xff]  ;;  %vm3578_vm5 = vcmask 523712  }
 0x1ca   : > { %1118 = vst.msk [vmem:[#allocation2 + $0x40] sm:$0xff] %vm1109_vm6, %v1030_v10 }
 0x1cd   : > { %1226 = vrot.lane.b32.xlu0 %v7028_v11, %s4464_s8  ;;  %1228 = vrot.lane.b32.xlu1 %v7029_v12, %s4464_s8 }
 0x1ce   : > { %1230 = vrot.lane.b32.xlu2 %v7030_v15, %s4464_s8  ;;  %v4259_v15 = vld [vmem:[%s4518_s28 + $0x38] sm:$0xff] }
 0x1cf   : > { %v1014_v13 = vpop.permute.xlu0 %1013  ;;  %v1016_v14 = vpop.permute.xlu1 %1015 }
 0x1d0   : > { %1110 = vst.msk [vmem:[#allocation2] sm:$0xff] %vm1109_vm6, %v1014_v13  ;;  %v1036_v16 = vpop.permute.xlu2 %1035  ;;  %v5451_v13 = vld [vmem:[%s4518_s28 + $0x18a] sm:$0xff] }
 0x1d1   : > { %1111 = vst.msk [vmem:[#allocation2 + $0x8] sm:$0xff] %vm1109_vm6, %v1016_v14  ;;  %v4258_v14 = vld [vmem:[%s4518_s28 + $0x30] sm:$0xff] }
 0x1d2   : > { %1121 = vst.msk [vmem:[#allocation2 + $0x58] sm:$0xff] %vm1109_vm6, %v1036_v16 }
 0x1d5   : > { %1232 = vrot.lane.b32.xlu0 %v7031_v17, %s4464_s8  ;;  %1234 = vrot.lane.b32.xlu1 %v7032_v18, %s4464_s8 }
 0x1d6   : > { %1236 = vrot.lane.b32.xlu2 %v7033_v21, %s4464_s8 }
 0x1d7   : > { %v1020_v19 = vpop.permute.xlu0 %1019  ;;  %v1022_v20 = vpop.permute.xlu1 %1021 }
 0x1d8   : > { %1113 = vst.msk [vmem:[#allocation2 + $0x18] sm:$0xff] %vm1109_vm6, %v1020_v19  ;;  %v1042_v22 = vpop.permute.xlu2 %1041  ;;  %v4262_v19 = vld [vmem:[%s4518_s28 + $0x60] sm:$0xff] }
 0x1d9   : > { %1114 = vst.msk [vmem:[#allocation2 + $0x20] sm:$0xff] %vm1109_vm6, %v1022_v20 }
 0x1da   : > { %1124 = vst.msk [vmem:[#allocation2 + $0x70] sm:$0xff] %vm1109_vm6, %v1042_v22 }
 0x1dd   : > { %1238 = vrot.lane.b32.xlu0 %v7034_v23, %s4464_s8  ;;  %1240 = vrot.lane.b32.xlu1 %v7035_v24, %s4464_s8  ;;  %v4265_v23 = vld [vmem:[%s4518_s28 + $0x80] sm:$0xff] }
 0x1de   : > { %1242 = vrot.lane.b32.xlu2 %v7036_v27, %s4464_s8  ;;  %v4271_v27 = vld [vmem:[%s4518_s28 + $0xc8] sm:$0xff] }
 0x1df   : > { %v1026_v25 = vpop.permute.xlu0 %1025  ;;  %v1028_v26 = vpop.permute.xlu1 %1027 }
 0x1e0   : > { %1116 = vst.msk [vmem:[#allocation2 + $0x30] sm:$0xff] %vm1109_vm6, %v1026_v25  ;;  %v1048_v28 = vpop.permute.xlu2 %1047  ;;  %v4268_v25 = vld [vmem:[%s4518_s28 + $0xa8] sm:$0xff] }
 0x1e1   : > { %1117 = vst.msk [vmem:[#allocation2 + $0x38] sm:$0xff] %vm1109_vm6, %v1028_v26 }
 0x1e2   : > { %1127 = vst.msk [vmem:[#allocation2 + $0x88] sm:$0xff] %vm1109_vm6, %v1048_v28 }
 0x1e5   : > { %1244 = vrot.lane.b32.xlu0 %v7037_v29, %s4464_s8  ;;  %1246 = vrot.lane.b32.xlu1 %v7038_v30, %s4464_s8  ;;  %v4274_v29 = vld [vmem:[%s4518_s28 + $0xf0] sm:$0xff] }
 0x1e6   : > { %1248 = vrot.lane.b32.xlu2 %v7039_v61, %s4464_s8 }
 0x1e7   : > { %v1032_v31 = vpop.permute.xlu0 %1031  ;;  %v1034_v32 = vpop.permute.xlu1 %1033 }
 0x1e8   : > { %1119 = vst.msk [vmem:[#allocation2 + $0x48] sm:$0xff] %vm1109_vm6, %v1032_v31  ;;  %v1054_v38 = vpop.permute.xlu2 %1053  ;;  %v4277_v31 = vld [vmem:[%s4518_s28 + $0x110] sm:$0xff] }
 0x1e9   : > { %1120 = vst.msk [vmem:[#allocation2 + $0x50] sm:$0xff] %vm1109_vm6, %v1034_v32 }
 0x1ea   : > { %1130 = vst.msk [vmem:[#allocation2 + $0xa0] sm:$0xff] %vm1109_vm6, %v1054_v38  ;;  %v4288_v38 = vld [vmem:[%s4518_s28 + $0x198] sm:$0xff] }
 0x1ed   : > { %1250 = vrot.lane.b32.xlu0 %v7040_v33, %s4464_s8  ;;  %1252 = vrot.lane.b32.xlu1 %v7041_v63, %s4464_s8  ;;  %v4290_v63 = vld [vmem:[%s4518_s28 + $0x31] sm:$0xff] }
 0x1ee   : > { %1254 = vrot.lane.b32.xlu2 %v7042_v51, %s4464_s8 }
 0x1ef   : > { %v1038_v37 = vpop.permute.xlu0 %1037  ;;  %v1040_v36 = vpop.permute.xlu1 %1039 }
 0x1f0   : > { %1122 = vst.msk [vmem:[#allocation2 + $0x60] sm:$0xff] %vm1109_vm6, %v1038_v37  ;;  %v1060_v39 = vpop.permute.xlu2 %1059  ;;  %v4291_v37 = vld [vmem:[%s4518_s28 + $0x39] sm:$0xff] }
 0x1f1   : > { %1123 = vst.msk [vmem:[#allocation2 + $0x68] sm:$0xff] %vm1109_vm6, %v1040_v36  ;;  %v4292_v36 = vld [vmem:[%s4518_s28 + $0x49] sm:$0xff] }
 0x1f2   : > { %1133 = vst.msk [vmem:[#allocation2 + $0xb8] sm:$0xff] %vm1109_vm6, %v1060_v39 }
 0x1f5   : > { %1256 = vrot.lane.b32.xlu0 %v7043_v42, %s4464_s8  ;;  %1258 = vrot.lane.b32.xlu1 %v7044_v0, %s4464_s8  ;;  %v4293_v42 = vld [vmem:[%s4518_s28 + $0x51] sm:$0xff]  ;;  %v4294_v0 = vld [vmem:[%s4518_s28 + $0x61] sm:$0xff] }
 0x1f6   : > { %1260 = vrot.lane.b32.xlu2 %v7045_v3, %s4464_s8 }
 0x1f7   : > { %v1044_v2 = vpop.permute.xlu0 %1043  ;;  %v1046_v5 = vpop.permute.xlu1 %1045 }
 0x1f8   : > { %1125 = vst.msk [vmem:[#allocation2 + $0x78] sm:$0xff] %vm1109_vm6, %v1044_v2  ;;  %v1066_v6 = vpop.permute.xlu2 %1065  ;;  %v4295_v2 = vld [vmem:[%s4518_s28 + $0x69] sm:$0xff] }
 0x1f9   : > { %1126 = vst.msk [vmem:[#allocation2 + $0x80] sm:$0xff] %vm1109_vm6, %v1046_v5 }
 0x1fa   : > { %1136 = vst.msk [vmem:[#allocation2 + $0xd0] sm:$0xff] %vm1109_vm6, %v1066_v6 }
 0x1fd   : > { %1262 = vrot.lane.b32.xlu0 %v7046_v8, %s4464_s8  ;;  %1264 = vrot.lane.b32.xlu1 %v7047_v9, %s4464_s8  ;;  %v4296_v8 = vld [vmem:[%s4518_s28 + $0x79] sm:$0xff]  ;;  %v4297_v9 = vld [vmem:[%s4518_s28 + $0x81] sm:$0xff] }
 0x1fe   : > { %1266 = vrot.lane.b32.xlu2 %v5440_v7, %s4464_s8 }
 0x1ff   : > { %v1050_v10 = vpop.permute.xlu0 %1049  ;;  %v1052_v11 = vpop.permute.xlu1 %1051 }
 0x200   : > { %1128 = vst.msk [vmem:[#allocation2 + $0x90] sm:$0xff] %vm1109_vm6, %v1050_v10  ;;  %v1072_v12 = vpop.permute.xlu2 %1071  ;;  %v4298_v10 = vld [vmem:[%s4518_s28 + $0x91] sm:$0xff] }
 0x201   : > { %1129 = vst.msk [vmem:[#allocation2 + $0x98] sm:$0xff] %vm1109_vm6, %v1052_v11 }
 0x202   : > { %1139 = vst.msk [vmem:[#allocation2 + $0xe8] sm:$0xff] %vm1109_vm6, %v1072_v12 }
 0x205   : > { %1268 = vrot.lane.b32.xlu0 %v5451_v13, %s4464_s8  ;;  %1400 = vrot.lane.b32.xlu1 %v4258_v14, %s4465_s9 }
 0x206   : > { %1402 = vrot.lane.b32.xlu2 %v4259_v15, %s4465_s9  ;;  %v4299_v15 = vld [vmem:[%s4518_s28 + $0x99] sm:$0xff] }
 0x207   : > { %v1056_v16 = vpop.permute.xlu0 %1055  ;;  %v1058_v17 = vpop.permute.xlu1 %1057 }
 0x208   : > { %1131 = vst.msk [vmem:[#allocation2 + $0xa8] sm:$0xff] %vm1109_vm6, %v1056_v16  ;;  %v1207_v18 = vpop.permute.xlu2 %1206  ;;  %v4300_v16 = vld [vmem:[%s4518_s28 + $0xa9] sm:$0xff] }
 0x209   : > { %1132 = vst.msk [vmem:[#allocation2 + $0xb0] sm:$0xff] %vm1109_vm6, %v1058_v17  ;;  %v4301_v17 = vld [vmem:[%s4518_s28 + $0xb1] sm:$0xff] }
 0x20a   : > { %1303 = vst.msk [vmem:[#allocation2] sm:$0xff] %vm1302_vm7, %v1207_v18 }
 0x20d   : > { %1404 = vrot.lane.b32.xlu0 %v4864_v46, %s4465_s9  ;;  %1406 = vrot.lane.b32.xlu1 %v4921_v59, %s4465_s9 }
 0x20e   : > { %1408 = vrot.lane.b32.xlu2 %v4262_v19, %s4465_s9 }
 0x20f   : > { %v1062_v20 = vpop.permute.xlu0 %1061  ;;  %v1064_v21 = vpop.permute.xlu1 %1063 }
 0x210   : > { %1134 = vst.msk [vmem:[#allocation2 + $0xc0] sm:$0xff] %vm1109_vm6, %v1062_v20  ;;  %v1213_v22 = vpop.permute.xlu2 %1212 }
 0x211   : > { %1135 = vst.msk [vmem:[#allocation2 + $0xc8] sm:$0xff] %vm1109_vm6, %v1064_v21  ;;  %v4302_v21 = vld [vmem:[%s4518_s28 + $0xc1] sm:$0xff] }
 0x212   : > { %1306 = vst.msk [vmem:[#allocation2 + $0x18] sm:$0xff] %vm1302_vm7, %v1213_v22  ;;  %v4303_v22 = vld [vmem:[%s4518_s28 + $0xc9] sm:$0xff] }
 0x215   : > { %1410 = vrot.lane.b32.xlu0 %v4895_v53, %s4465_s9  ;;  %1412 = vrot.lane.b32.xlu1 %v4954_v34, %s4465_s9 }
 0x216   : > { %1414 = vrot.lane.b32.xlu2 %v4265_v23, %s4465_s9  ;;  %v4304_v23 = vld [vmem:[%s4518_s28 + $0xd9] sm:$0xff] }
 0x217   : > { %v1068_v46 = vpop.permute.xlu0 %1067  ;;  %v1070_v59 = vpop.permute.xlu1 %1069 }
 0x218   : > { %1137 = vst.msk [vmem:[#allocation2 + $0xd8] sm:$0xff] %vm1109_vm6, %v1068_v46  ;;  %v1219_v24 = vpop.permute.xlu2 %1218 }
 0x219   : > { %1138 = vst.msk [vmem:[#allocation2 + $0xe0] sm:$0xff] %vm1109_vm6, %v1070_v59 }
 0x21a   : > { %1309 = vst.msk [vmem:[#allocation2 + $0x30] sm:$0xff] %vm1302_vm7, %v1219_v24 }
 0x21d   : > { %1416 = vrot.lane.b32.xlu0 %v4931_v62, %s4465_s9  ;;  %1418 = vrot.lane.b32.xlu1 %v4987_v35, %s4465_s9 }
 0x21e   : > { %1420 = vrot.lane.b32.xlu2 %v4268_v25, %s4465_s9  ;;  %v4305_v25 = vld [vmem:[%s4518_s28 + $0xe1] sm:$0xff] }
 0x21f   : > { %v1074_v53 = vpop.permute.xlu0 %1073  ;;  %v1076_v34 = vpop.permute.xlu1 %1075 }
 0x220   : > { %1140 = vst.msk [vmem:[#allocation2 + $0xf0] sm:$0xff] %vm1109_vm6, %v1074_v53  ;;  %v1225_v26 = vpop.permute.xlu2 %1224  ;;  %v4306_v53 = vld [vmem:[%s4518_s28 + $0xf1] sm:$0xff] }
 0x221   : > { %1141 = vst.msk [vmem:[#allocation2 + $0xf8] sm:$0xff] %vm1109_vm6, %v1076_v34  ;;  %v4307_v34 = vld [vmem:[%s4518_s28 + $0xf9] sm:$0xff]  ;;  %vm3771_vm6 = vcmask 589312  }
 0x222   : > { %1312 = vst.msk [vmem:[#allocation2 + $0x48] sm:$0xff] %vm1302_vm7, %v1225_v26 }
 0x225   : > { %1422 = vrot.lane.b32.xlu0 %v4964_v40, %s4465_s9  ;;  %1424 = vrot.lane.b32.xlu1 %v5020_v47, %s4465_s9 }
 0x226   : > { %1426 = vrot.lane.b32.xlu2 %v4271_v27, %s4465_s9 }
 0x227   : > { %v1209_v62 = vpop.permute.xlu0 %1208  ;;  %v1211_v35 = vpop.permute.xlu1 %1210 }
 0x228   : > { %1304 = vst.msk [vmem:[#allocation2 + $0x8] sm:$0xff] %vm1302_vm7, %v1209_v62  ;;  %v1231_v28 = vpop.permute.xlu2 %1230 }
 0x229   : > { %1305 = vst.msk [vmem:[#allocation2 + $0x10] sm:$0xff] %vm1302_vm7, %v1211_v35  ;;  %v4308_v35 = vld [vmem:[%s4518_s28 + $0x109] sm:$0xff] }
 0x22a   : > { %1315 = vst.msk [vmem:[#allocation2 + $0x60] sm:$0xff] %vm1302_vm7, %v1231_v28  ;;  %v4309_v28 = vld [vmem:[%s4518_s28 + $0x111] sm:$0xff] }
 0x22d   : > { %1428 = vrot.lane.b32.xlu0 %v4997_v60, %s4465_s9  ;;  %1430 = vrot.lane.b32.xlu1 %v5053_v54, %s4465_s9 }
 0x22e   : > { %1432 = vrot.lane.b32.xlu2 %v4274_v29, %s4465_s9  ;;  %v4310_v29 = vld [vmem:[%s4518_s28 + $0x121] sm:$0xff] }
 0x22f   : > { %v1215_v40 = vpop.permute.xlu0 %1214  ;;  %v1217_v47 = vpop.permute.xlu1 %1216 }
 0x230   : > { %1307 = vst.msk [vmem:[#allocation2 + $0x20] sm:$0xff] %vm1302_vm7, %v1215_v40  ;;  %v1237_v30 = vpop.permute.xlu2 %1236 }
 0x231   : > { %1308 = vst.msk [vmem:[#allocation2 + $0x28] sm:$0xff] %vm1302_vm7, %v1217_v47 }
 0x232   : > { %1318 = vst.msk [vmem:[#allocation2 + $0x78] sm:$0xff] %vm1302_vm7, %v1237_v30 }
 0x235   : > { %1434 = vrot.lane.b32.xlu0 %v5030_v1, %s4465_s9  ;;  %1436 = vrot.lane.b32.xlu1 %v5086_v4, %s4465_s9 }
 0x236   : > { %1438 = vrot.lane.b32.xlu2 %v4277_v31, %s4465_s9  ;;  %v4311_v31 = vld [vmem:[%s4518_s28 + $0x129] sm:$0xff] }
 0x237   : > { %v1221_v60 = vpop.permute.xlu0 %1220  ;;  %v1223_v54 = vpop.permute.xlu1 %1222 }
 0x238   : > { %1310 = vst.msk [vmem:[#allocation2 + $0x38] sm:$0xff] %vm1302_vm7, %v1221_v60  ;;  %v1243_v32 = vpop.permute.xlu2 %1242  ;;  %v4312_v60 = vld [vmem:[%s4518_s28 + $0x139] sm:$0xff] }
 0x239   : > { %1311 = vst.msk [vmem:[#allocation2 + $0x40] sm:$0xff] %vm1302_vm7, %v1223_v54  ;;  %v4313_v54 = vld [vmem:[%s4518_s28 + $0x141] sm:$0xff] }
 0x23a   : > { %1321 = vst.msk [vmem:[#allocation2 + $0x90] sm:$0xff] %vm1302_vm7, %v1243_v32 }
 0x23d   : > { %1440 = vrot.lane.b32.xlu0 %v5063_v56, %s4465_s9  ;;  %1442 = vrot.lane.b32.xlu1 %v5119_v57, %s4465_s9 }
 0x23e   : > { %1444 = vrot.lane.b32.xlu2 %v5083_v55, %s4465_s9 }
 0x23f   : > { %v1227_v1 = vpop.permute.xlu0 %1226  ;;  %v1229_v61 = vpop.permute.xlu1 %1228 }
 0x240   : > { %1313 = vst.msk [vmem:[#allocation2 + $0x50] sm:$0xff] %vm1302_vm7, %v1227_v1  ;;  %v1249_v4 = vpop.permute.xlu2 %1248 }
 0x241   : > { %1314 = vst.msk [vmem:[#allocation2 + $0x58] sm:$0xff] %vm1302_vm7, %v1229_v61 }
 0x242   : > { %1324 = vst.msk [vmem:[#allocation2 + $0xa8] sm:$0xff] %vm1302_vm7, %v1249_v4  ;;  %v4314_v4 = vld [vmem:[%s4518_s28 + $0x151] sm:$0xff] }
 0x245   : > { %1446 = vrot.lane.b32.xlu0 %v5096_v49, %s4465_s9  ;;  %1448 = vrot.lane.b32.xlu1 %v5143_v50, %s4465_s9 }
 0x246   : > { %1450 = vrot.lane.b32.xlu2 %v5116_v48, %s4465_s9 }
 0x247   : > { %v1233_v56 = vpop.permute.xlu0 %1232  ;;  %v1235_v57 = vpop.permute.xlu1 %1234 }
 0x248   : > { %1316 = vst.msk [vmem:[#allocation2 + $0x68] sm:$0xff] %vm1302_vm7, %v1233_v56  ;;  %v1255_v55 = vpop.permute.xlu2 %1254  ;;  %v4315_v56 = vld [vmem:[%s4518_s28 + $0x159] sm:$0xff] }
 0x249   : > { %1317 = vst.msk [vmem:[#allocation2 + $0x70] sm:$0xff] %vm1302_vm7, %v1235_v57  ;;  %v4316_v57 = vld [vmem:[%s4518_s28 + $0x169] sm:$0xff] }
 0x24a   : > { %1327 = vst.msk [vmem:[#allocation2 + $0xc0] sm:$0xff] %vm1302_vm7, %v1255_v55 }
 0x24d   : > { %1452 = vrot.lane.b32.xlu0 %v5129_v43, %s4465_s9  ;;  %1454 = vrot.lane.b32.xlu1 %v5157_v45, %s4465_s9  ;;  %v4289_v43 = vld [vmem:[%s4518_s28 + $0x1a0] sm:$0xff] }
 0x24e   : > { %1456 = vrot.lane.b32.xlu2 %v5238_v44, %s4465_s9 }
 0x24f   : > { %v1239_v49 = vpop.permute.xlu0 %1238  ;;  %v1241_v50 = vpop.permute.xlu1 %1240 }
 0x250   : > { %1319 = vst.msk [vmem:[#allocation2 + $0x80] sm:$0xff] %vm1302_vm7, %v1239_v49  ;;  %v1261_v48 = vpop.permute.xlu2 %1260 }
 0x251   : > { %1320 = vst.msk [vmem:[#allocation2 + $0x88] sm:$0xff] %vm1302_vm7, %v1241_v50 }
 0x252   : > { %1330 = vst.msk [vmem:[#allocation2 + $0xd8] sm:$0xff] %vm1302_vm7, %v1261_v48  ;;  %v4317_v48 = vld [vmem:[%s4518_s28 + $0x171] sm:$0xff] }
 0x255   : > { %1458 = vrot.lane.b32.xlu0 %v5242_v41, %s4465_s9  ;;  %1460 = vrot.lane.b32.xlu1 %v4288_v38, %s4465_s9 }
 0x256   : > { %1462 = vrot.lane.b32.xlu2 %v4289_v43, %s4465_s9 }
 0x257   : > { %v1245_v45 = vpop.permute.xlu0 %1244  ;;  %v1247_v33 = vpop.permute.xlu1 %1246 }
 0x258   : > { %1322 = vst.msk [vmem:[#allocation2 + $0x98] sm:$0xff] %vm1302_vm7, %v1245_v45  ;;  %v1267_v44 = vpop.permute.xlu2 %1266 }
 0x259   : > { %1323 = vst.msk [vmem:[#allocation2 + $0xa0] sm:$0xff] %vm1302_vm7, %v1247_v33  ;;  %v4320_v33 = vld [vmem:[%s4518_s28 + $0x199] sm:$0xff] }
 0x25a   : > { %1333 = vst.msk [vmem:[#allocation2 + $0xf0] sm:$0xff] %vm1302_vm7, %v1267_v44  ;;  %v4321_v44 = vld [vmem:[%s4518_s28 + $0x1a1] sm:$0xff] }
 0x25d   : > { %1593 = vrot.lane.b32.xlu0 %v4290_v63, %s4466_s10  ;;  %1595 = vrot.lane.b32.xlu1 %v4291_v37, %s4466_s10  ;;  %v4322_v63 = vld [vmem:[%s4518_s28 + $0x32] sm:$0xff] }
 0x25e   : > { %1597 = vrot.lane.b32.xlu2 %v4292_v36, %s4466_s10  ;;  %v4323_v36 = vld [vmem:[%s4518_s28 + $0x3a] sm:$0xff] }
 0x25f   : > { %v1251_v41 = vpop.permute.xlu0 %1250  ;;  %v1253_v51 = vpop.permute.xlu1 %1252 }
 0x260   : > { %1325 = vst.msk [vmem:[#allocation2 + $0xb0] sm:$0xff] %vm1302_vm7, %v1251_v41  ;;  %v1403_v39 = vpop.permute.xlu2 %1402  ;;  %v4324_v41 = vld [vmem:[%s4518_s28 + $0x4a] sm:$0xff] }
 0x261   : > { %1326 = vst.msk [vmem:[#allocation2 + $0xb8] sm:$0xff] %vm1302_vm7, %v1253_v51 }
 0x262   : > { %1498 = vst.msk [vmem:[#allocation2 + $0x8] sm:$0xff] %vm1496_vm8, %v1403_v39 }
 0x265   : > { %1599 = vrot.lane.b32.xlu0 %v4293_v42, %s4466_s10  ;;  %1601 = vrot.lane.b32.xlu1 %v4294_v0, %s4466_s10  ;;  %v4325_v42 = vld [vmem:[%s4518_s28 + $0x52] sm:$0xff] }
 0x266   : > { %1603 = vrot.lane.b32.xlu2 %v4295_v2, %s4466_s10  ;;  %v4326_v2 = vld [vmem:[%s4518_s28 + $0x62] sm:$0xff] }
 0x267   : > { %v1257_v5 = vpop.permute.xlu0 %1256  ;;  %v1259_v3 = vpop.permute.xlu1 %1258 }
 0x268   : > { %1328 = vst.msk [vmem:[#allocation2 + $0xc8] sm:$0xff] %vm1302_vm7, %v1257_v5  ;;  %v1409_v6 = vpop.permute.xlu2 %1408  ;;  %v4327_v5 = vld [vmem:[%s4518_s28 + $0x6a] sm:$0xff] }
 0x269   : > { %1329 = vst.msk [vmem:[#allocation2 + $0xd0] sm:$0xff] %vm1302_vm7, %v1259_v3 }
 0x26a   : > { %1501 = vst.msk [vmem:[#allocation2 + $0x20] sm:$0xff] %vm1496_vm8, %v1409_v6 }
 0x26d   : > { %1605 = vrot.lane.b32.xlu0 %v4296_v8, %s4466_s10  ;;  %1607 = vrot.lane.b32.xlu1 %v4297_v9, %s4466_s10  ;;  %v4329_v9 = vld [vmem:[%s4518_s28 + $0x82] sm:$0xff] }
 0x26e   : > { %1609 = vrot.lane.b32.xlu2 %v4298_v10, %s4466_s10  ;;  %v4330_v10 = vld [vmem:[%s4518_s28 + $0x92] sm:$0xff] }
 0x26f   : > { %v1263_v11 = vpop.permute.xlu0 %1262  ;;  %v1265_v12 = vpop.permute.xlu1 %1264 }
 0x270   : > { %1331 = vst.msk [vmem:[#allocation2 + $0xe0] sm:$0xff] %vm1302_vm7, %v1263_v11  ;;  %v1415_v14 = vpop.permute.xlu2 %1414 }
 0x271   : > { %1332 = vst.msk [vmem:[#allocation2 + $0xe8] sm:$0xff] %vm1302_vm7, %v1265_v12 }
 0x272   : > { %1504 = vst.msk [vmem:[#allocation2 + $0x38] sm:$0xff] %vm1496_vm8, %v1415_v14  ;;  %v4328_v14 = vld [vmem:[%s4518_s28 + $0x7a] sm:$0xff] }
 0x275   : > { %1611 = vrot.lane.b32.xlu0 %v4299_v15, %s4466_s10  ;;  %1613 = vrot.lane.b32.xlu1 %v4300_v16, %s4466_s10  ;;  %v4332_v16 = vld [vmem:[%s4518_s28 + $0xaa] sm:$0xff] }
 0x276   : > { %1615 = vrot.lane.b32.xlu2 %v4301_v17, %s4466_s10  ;;  %v4333_v17 = vld [vmem:[%s4518_s28 + $0xb2] sm:$0xff] }
 0x277   : > { %v1269_v18 = vpop.permute.xlu0 %1268  ;;  %v1401_v19 = vpop.permute.xlu1 %1400 }
 0x278   : > { %1334 = vst.msk [vmem:[#allocation2 + $0xf8] sm:$0xff] %vm1302_vm7, %v1269_v18  ;;  %v1421_v20 = vpop.permute.xlu2 %1420  ;;  %vm3892_vm7 = vcmask 588800  }
 0x279   : > { %1497 = vst.msk [vmem:[#allocation2] sm:$0xff] %vm1496_vm8, %v1401_v19 }
 0x27a   : > { %1507 = vst.msk [vmem:[#allocation2 + $0x50] sm:$0xff] %vm1496_vm8, %v1421_v20  ;;  %v4331_v20 = vld [vmem:[%s4518_s28 + $0x9a] sm:$0xff] }
 0x27d   : > { %1617 = vrot.lane.b32.xlu0 %v4302_v21, %s4466_s10  ;;  %1619 = vrot.lane.b32.xlu1 %v4303_v22, %s4466_s10  ;;  %v4335_v22 = vld [vmem:[%s4518_s28 + $0xca] sm:$0xff] }
 0x27e   : > { %1621 = vrot.lane.b32.xlu2 %v4304_v23, %s4466_s10  ;;  %v4336_v23 = vld [vmem:[%s4518_s28 + $0xda] sm:$0xff] }
 0x27f   : > { %v1405_v46 = vpop.permute.xlu0 %1404  ;;  %v1407_v59 = vpop.permute.xlu1 %1406 }
 0x280   : > { %1499 = vst.msk [vmem:[#allocation2 + $0x10] sm:$0xff] %vm1496_vm8, %v1405_v46  ;;  %v1427_v24 = vpop.permute.xlu2 %1426 }
 0x281   : > { %1500 = vst.msk [vmem:[#allocation2 + $0x18] sm:$0xff] %vm1496_vm8, %v1407_v59 }
 0x282   : > { %1510 = vst.msk [vmem:[#allocation2 + $0x68] sm:$0xff] %vm1496_vm8, %v1427_v24  ;;  %v4334_v24 = vld [vmem:[%s4518_s28 + $0xc2] sm:$0xff] }
 0x285   : > { %1623 = vrot.lane.b32.xlu0 %v4305_v25, %s4466_s10  ;;  %1625 = vrot.lane.b32.xlu1 %v4306_v53, %s4466_s10  ;;  %v4338_v53 = vld [vmem:[%s4518_s28 + $0xf2] sm:$0xff] }
 0x286   : > { %1627 = vrot.lane.b32.xlu2 %v4307_v34, %s4466_s10  ;;  %v4339_v34 = vld [vmem:[%s4518_s28 + $0xfa] sm:$0xff] }
 0x287   : > { %v1411_v26 = vpop.permute.xlu0 %1410  ;;  %v1413_v27 = vpop.permute.xlu1 %1412 }
 0x288   : > { %1502 = vst.msk [vmem:[#allocation2 + $0x28] sm:$0xff] %vm1496_vm8, %v1411_v26  ;;  %v1433_v62 = vpop.permute.xlu2 %1432 }
 0x289   : > { %1503 = vst.msk [vmem:[#allocation2 + $0x30] sm:$0xff] %vm1496_vm8, %v1413_v27 }
 0x28a   : > { %1513 = vst.msk [vmem:[#allocation2 + $0x80] sm:$0xff] %vm1496_vm8, %v1433_v62  ;;  %v4337_v62 = vld [vmem:[%s4518_s28 + $0xe2] sm:$0xff] }
 0x28d   : > { %1629 = vrot.lane.b32.xlu0 %v4308_v35, %s4466_s10  ;;  %1631 = vrot.lane.b32.xlu1 %v4309_v28, %s4466_s10  ;;  %v4341_v28 = vld [vmem:[%s4518_s28 + $0x112] sm:$0xff] }
 0x28e   : > { %1633 = vrot.lane.b32.xlu2 %v4310_v29, %s4466_s10  ;;  %v4342_v29 = vld [vmem:[%s4518_s28 + $0x122] sm:$0xff] }
 0x28f   : > { %v1417_v40 = vpop.permute.xlu0 %1416  ;;  %v1419_v47 = vpop.permute.xlu1 %1418 }
 0x290   : > { %1505 = vst.msk [vmem:[#allocation2 + $0x40] sm:$0xff] %vm1496_vm8, %v1417_v40  ;;  %v1439_v30 = vpop.permute.xlu2 %1438 }
 0x291   : > { %1506 = vst.msk [vmem:[#allocation2 + $0x48] sm:$0xff] %vm1496_vm8, %v1419_v47 }
 0x292   : > { %1516 = vst.msk [vmem:[#allocation2 + $0x98] sm:$0xff] %vm1496_vm8, %v1439_v30  ;;  %v4340_v30 = vld [vmem:[%s4518_s28 + $0x10a] sm:$0xff] }
 0x295   : > { %1635 = vrot.lane.b32.xlu0 %v4311_v31, %s4466_s10  ;;  %1637 = vrot.lane.b32.xlu1 %v4312_v60, %s4466_s10 }
 0x296   : > { %1639 = vrot.lane.b32.xlu2 %v4313_v54, %s4466_s10 }
 0x297   : > { %v1423_v32 = vpop.permute.xlu0 %1422  ;;  %v1425_v1 = vpop.permute.xlu1 %1424 }
 0x298   : > { %1508 = vst.msk [vmem:[#allocation2 + $0x58] sm:$0xff] %vm1496_vm8, %v1423_v32  ;;  %v1445_v61 = vpop.permute.xlu2 %1444  ;;  %v4345_v32 = vld [vmem:[%s4518_s28 + $0x142] sm:$0xff] }
 0x299   : > { %1509 = vst.msk [vmem:[#allocation2 + $0x60] sm:$0xff] %vm1496_vm8, %v1425_v1  ;;  %v4344_v1 = vld [vmem:[%s4518_s28 + $0x13a] sm:$0xff] }
 0x29a   : > { %1519 = vst.msk [vmem:[#allocation2 + $0xb0] sm:$0xff] %vm1496_vm8, %v1445_v61 }
 0x29d   : > { %1641 = vrot.lane.b32.xlu0 %v4314_v4, %s4466_s10  ;;  %1643 = vrot.lane.b32.xlu1 %v4315_v56, %s4466_s10 }
 0x29e   : > { %1645 = vrot.lane.b32.xlu2 %v4316_v57, %s4466_s10  ;;  %v4343_v57 = vld [vmem:[%s4518_s28 + $0x12a] sm:$0xff] }
 0x29f   : > { %v1429_v55 = vpop.permute.xlu0 %1428  ;;  %v1431_v49 = vpop.permute.xlu1 %1430 }
 0x2a0   : > { %1511 = vst.msk [vmem:[#allocation2 + $0x70] sm:$0xff] %vm1496_vm8, %v1429_v55  ;;  %v1451_v50 = vpop.permute.xlu2 %1450 }
 0x2a1   : > { %1512 = vst.msk [vmem:[#allocation2 + $0x78] sm:$0xff] %vm1496_vm8, %v1431_v49 }
 0x2a2   : > { %1522 = vst.msk [vmem:[#allocation2 + $0xc8] sm:$0xff] %vm1496_vm8, %v1451_v50 }
 0x2a5   : > { %1647 = vrot.lane.b32.xlu0 %v4317_v48, %s4466_s10  ;;  %1649 = vrot.lane.b32.xlu1 %v5343_v52, %s4466_s10  ;;  %v1967_v48 = vld [vmem:[%s6921_s1 + $0x10] sm:$0x3] }
 0x2a6   : > { %1651 = vrot.lane.b32.xlu2 %v5346_v58, %s4466_s10 }
 0x2a7   : > { %v1435_v38 = vpop.permute.xlu0 %1434  ;;  %v1437_v43 = vpop.permute.xlu1 %1436 }
 0x2a8   : > { %1514 = vst.msk [vmem:[#allocation2 + $0x88] sm:$0xff] %vm1496_vm8, %v1435_v38  ;;  %v1457_v45 = vpop.permute.xlu2 %1456  ;;  %v4347_v38 = vld [vmem:[%s4518_s28 + $0x15a] sm:$0xff] }
 0x2a9   : > { %1515 = vst.msk [vmem:[#allocation2 + $0x90] sm:$0xff] %vm1496_vm8, %v1437_v43 }
 0x2aa   : > { %1525 = vst.msk [vmem:[#allocation2 + $0xe0] sm:$0xff] %vm1496_vm8, %v1457_v45  ;;  %v1981_v45 = vunpack.c.l.b16 %v1967_v48 }
 0x2ad   : > { %1653 = vrot.lane.b32.xlu0 %v4320_v33, %s4466_s10  ;;  %1655 = vrot.lane.b32.xlu1 %v4321_v44, %s4466_s10  ;;  %v1984_v33 = vpack.c.b16 %v1981_v45, %v1981_v45 }
 0x2ae   : > { %1786 = vrot.lane.b32.xlu2 %v4322_v63, %s4467_s11 }
 0x2af   : > { %v1441_v52 = vpop.permute.xlu0 %1440  ;;  %v1443_v37 = vpop.permute.xlu1 %1442  ;;  %v2038_v44 = vsel %vm2036_vm10, %v1984_v33, 0 }
 0x2b0   : > { %1517 = vst.msk [vmem:[#allocation2 + $0xa0] sm:$0xff] %vm1496_vm8, %v1441_v52  ;;  %v1463_v58 = vpop.permute.xlu2 %1462  ;;  %2045 = vmatpush.bf16.msra.mxu0 %v2038_v44  ;;  %4419 = vmatpush.bf16.msra.mxu3 %v2038_v44 }
 0x2b1   : > { %1518 = vst.msk [vmem:[#allocation2 + $0xa8] sm:$0xff] %vm1496_vm8, %v1443_v37  ;;  %v4414_v37 = vld [vmem:[%s6921_s1 + $0x8] sm:$0xff] }
 0x2b2   : > { %1528 = vst.msk [vmem:[#allocation2 + $0xf8] sm:$0xff] %vm1496_vm8, %v1463_v58 }
 0x2b4   : > { %2046 = vmatpush.bf16.msra.mxu0 %v4414_v37  ;;  %4420 = vmatpush.bf16.msra.mxu3 %v4414_v37 }
 0x2b5   : > { %1788 = vrot.lane.b32.xlu0 %v4323_v36, %s4467_s11  ;;  %1790 = vrot.lane.b32.xlu1 %v4324_v41, %s4467_s11  ;;  %v4413_v36 = vld [vmem:[%s6921_s1] sm:$0xff] }
 0x2b6   : > { %1792 = vrot.lane.b32.xlu2 %v4325_v42, %s4467_s11  ;;  %v4346_v42 = vld [vmem:[%s4518_s28 + $0x152] sm:$0xff] }
 0x2b7   : > { %v1447_v51 = vpop.permute.xlu0 %1446  ;;  %v1449_v39 = vpop.permute.xlu1 %1448 }
 0x2b8   : > { %1520 = vst.msk [vmem:[#allocation2 + $0xb8] sm:$0xff] %vm1496_vm8, %v1447_v51  ;;  %v1598_v0 = vpop.permute.xlu2 %1597  ;;  %2047 = vmatpush.bf16.msra.mxu0 %v4413_v36  ;;  %4421 = vmatpush.bf16.msra.mxu3 %v4413_v36 }
 0x2b9   : > { %1521 = vst.msk [vmem:[#allocation2 + $0xc0] sm:$0xff] %vm1496_vm8, %v1449_v39  ;;  %v4348_v39 = vld [vmem:[%s4518_s28 + $0x16a] sm:$0xff] }
 0x2ba   : > { %1692 = vst.msk [vmem:[#allocation2 + $0x10] sm:$0xff] %vm1689_vm9, %v1598_v0 }
 0x2bd   : > { %1794 = vrot.lane.b32.xlu0 %v4326_v2, %s4467_s11  ;;  %1796 = vrot.lane.b32.xlu1 %v4327_v5, %s4467_s11 }
 0x2be   : > { %1798 = vrot.lane.b32.xlu2 %v4328_v14, %s4467_s11 }
 0x2bf   : > { %v1453_v3 = vpop.permute.xlu0 %1452  ;;  %v1455_v6 = vpop.permute.xlu1 %1454 }
 0x2c0   : > { %1523 = vst.msk [vmem:[#allocation2 + $0xd0] sm:$0xff] %vm1496_vm8, %v1453_v3  ;;  %v1604_v8 = vpop.permute.xlu2 %1603 }
 0x2c1   : > { %1524 = vst.msk [vmem:[#allocation2 + $0xd8] sm:$0xff] %vm1496_vm8, %v1455_v6  ;;  %v4349_v6 = vld [vmem:[%s4518_s28 + $0x172] sm:$0xff] }
 0x2c2   : > { %1695 = vst.msk [vmem:[#allocation2 + $0x28] sm:$0xff] %vm1689_vm9, %v1604_v8 }
 0x2c5   : > { %1800 = vrot.lane.b32.xlu0 %v4329_v9, %s4467_s11  ;;  %1802 = vrot.lane.b32.xlu1 %v4330_v10, %s4467_s11 }
 0x2c6   : > { %1804 = vrot.lane.b32.xlu2 %v4331_v20, %s4467_s11 }
 0x2c7   : > { %v1459_v11 = vpop.permute.xlu0 %1458  ;;  %v1461_v12 = vpop.permute.xlu1 %1460 }
 0x2c8   : > { %1526 = vst.msk [vmem:[#allocation2 + $0xe8] sm:$0xff] %vm1496_vm8, %v1459_v11  ;;  %v1610_v15 = vpop.permute.xlu2 %1609 }
 0x2c9   : > { %1527 = vst.msk [vmem:[#allocation2 + $0xf0] sm:$0xff] %vm1496_vm8, %v1461_v12 }
 0x2ca   : > { %1698 = vst.msk [vmem:[#allocation2 + $0x40] sm:$0xff] %vm1689_vm9, %v1610_v15 }
 0x2cd   : > { %1806 = vrot.lane.b32.xlu0 %v4332_v16, %s4467_s11  ;;  %1808 = vrot.lane.b32.xlu1 %v4333_v17, %s4467_s11 }
 0x2ce   : > { %1810 = vrot.lane.b32.xlu2 %v4334_v24, %s4467_s11 }
 0x2cf   : > { %v1594_v18 = vpop.permute.xlu0 %1593  ;;  %v1596_v19 = vpop.permute.xlu1 %1595 }
 0x2d0   : > { %1690 = vst.msk [vmem:[#allocation2] sm:$0xff] %vm1689_vm9, %v1594_v18  ;;  %v1616_v21 = vpop.permute.xlu2 %1615 }
 0x2d1   : > { %1691 = vst.msk [vmem:[#allocation2 + $0x8] sm:$0xff] %vm1689_vm9, %v1596_v19 }
 0x2d2   : > { %1701 = vst.msk [vmem:[#allocation2 + $0x58] sm:$0xff] %vm1689_vm9, %v1616_v21 }
 0x2d5   : > { %1812 = vrot.lane.b32.xlu0 %v4335_v22, %s4467_s11  ;;  %1814 = vrot.lane.b32.xlu1 %v4336_v23, %s4467_s11 }
 0x2d6   : > { %1816 = vrot.lane.b32.xlu2 %v4337_v62, %s4467_s11 }
 0x2d7   : > { %v1600_v46 = vpop.permute.xlu0 %1599  ;;  %v1602_v59 = vpop.permute.xlu1 %1601 }
 0x2d8   : > { %1693 = vst.msk [vmem:[#allocation2 + $0x18] sm:$0xff] %vm1689_vm9, %v1600_v46  ;;  %v1622_v25 = vpop.permute.xlu2 %1621 }
 0x2d9   : > { %1694 = vst.msk [vmem:[#allocation2 + $0x20] sm:$0xff] %vm1689_vm9, %v1602_v59 }
 0x2da   : > { %1704 = vst.msk [vmem:[#allocation2 + $0x70] sm:$0xff] %vm1689_vm9, %v1622_v25 }
 0x2dd   : > { %1818 = vrot.lane.b32.xlu0 %v4338_v53, %s4467_s11  ;;  %1820 = vrot.lane.b32.xlu1 %v4339_v34, %s4467_s11 }
 0x2de   : > { %1822 = vrot.lane.b32.xlu2 %v4340_v30, %s4467_s11 }
 0x2df   : > { %v1606_v26 = vpop.permute.xlu0 %1605  ;;  %v1608_v27 = vpop.permute.xlu1 %1607 }
 0x2e0   : > { %1696 = vst.msk [vmem:[#allocation2 + $0x30] sm:$0xff] %vm1689_vm9, %v1606_v26  ;;  %v1628_v35 = vpop.permute.xlu2 %1627 }
 0x2e1   : > { %1697 = vst.msk [vmem:[#allocation2 + $0x38] sm:$0xff] %vm1689_vm9, %v1608_v27 }
 0x2e2   : > { %1707 = vst.msk [vmem:[#allocation2 + $0x88] sm:$0xff] %vm1689_vm9, %v1628_v35 }
 0x2e5   : > { %1824 = vrot.lane.b32.xlu0 %v4341_v28, %s4467_s11  ;;  %1826 = vrot.lane.b32.xlu1 %v4342_v29, %s4467_s11 }
 0x2e6   : > { %1828 = vrot.lane.b32.xlu2 %v4343_v57, %s4467_s11 }
 0x2e7   : > { %v1612_v40 = vpop.permute.xlu0 %1611  ;;  %v1614_v47 = vpop.permute.xlu1 %1613 }
 0x2e8   : > { %1699 = vst.msk [vmem:[#allocation2 + $0x48] sm:$0xff] %vm1689_vm9, %v1612_v40  ;;  %v1634_v31 = vpop.permute.xlu2 %1633 }
 0x2e9   : > { %1700 = vst.msk [vmem:[#allocation2 + $0x50] sm:$0xff] %vm1689_vm9, %v1614_v47 }
 0x2ea   : > { %1710 = vst.msk [vmem:[#allocation2 + $0xa0] sm:$0xff] %vm1689_vm9, %v1634_v31 }
 0x2ed   : > { %1832 = vrot.lane.b32.xlu1 %v4345_v32, %s4467_s11  ;;  %1830 = vrot.lane.b32.xlu0 %v4344_v1, %s4467_s11 }
 0x2ee   : > { %1834 = vrot.lane.b32.xlu2 %v4346_v42, %s4467_s11 }
 0x2ef   : > { %v1618_v60 = vpop.permute.xlu0 %1617  ;;  %v1620_v54 = vpop.permute.xlu1 %1619 }
 0x2f0   : > { %1702 = vst.msk [vmem:[#allocation2 + $0x60] sm:$0xff] %vm1689_vm9, %v1618_v60  ;;  %v1640_v61 = vpop.permute.xlu2 %1639 }
 0x2f1   : > { %1703 = vst.msk [vmem:[#allocation2 + $0x68] sm:$0xff] %vm1689_vm9, %v1620_v54 }
 0x2f2   : > { %1713 = vst.msk [vmem:[#allocation2 + $0xb8] sm:$0xff] %vm1689_vm9, %v1640_v61 }
 0x2f5   : > { %1836 = vrot.lane.b32.xlu0 %v4347_v38, %s4467_s11  ;;  %1838 = vrot.lane.b32.xlu1 %v4348_v39, %s4467_s11 }
 0x2f6   : > { %1840 = vrot.lane.b32.xlu2 %v4349_v6, %s4467_s11 }
 0x2f7   : > { %v1624_v4 = vpop.permute.xlu0 %1623  ;;  %v1626_v56 = vpop.permute.xlu1 %1625 }
 0x2f8   : > { %1705 = vst.msk [vmem:[#allocation2 + $0x78] sm:$0xff] %vm1689_vm9, %v1624_v4  ;;  %v1646_v55 = vpop.permute.xlu2 %1645 }
 0x2f9   : > { %1706 = vst.msk [vmem:[#allocation2 + $0x80] sm:$0xff] %vm1689_vm9, %v1626_v56 }
 0x2fa   : > { %1716 = vst.msk [vmem:[#allocation2 + $0xd0] sm:$0xff] %vm1689_vm9, %v1646_v55 }
 0x2fd   : > { %1842 = vrot.lane.b32.xlu0 %v5440_v7, %s4467_s11  ;;  %1844 = vrot.lane.b32.xlu1 %v5451_v13, %s4467_s11 }
 0x2ff   : > { %v1630_v49 = vpop.permute.xlu0 %1629  ;;  %v1632_v50 = vpop.permute.xlu1 %1631 }
 0x300   : > { %1708 = vst.msk [vmem:[#allocation2 + $0x90] sm:$0xff] %vm1689_vm9, %v1630_v49  ;;  %v1652_v43 = vpop.permute.xlu2 %1651 }
 0x301   : > { %1709 = vst.msk [vmem:[#allocation2 + $0x98] sm:$0xff] %vm1689_vm9, %v1632_v50 }
 0x302   : > { %1719 = vst.msk [vmem:[#allocation2 + $0xe8] sm:$0xff] %vm1689_vm9, %v1652_v43 }
 0x307   : > { %v1636_v63 = vpop.permute.xlu0 %1635  ;;  %v1638_v52 = vpop.permute.xlu1 %1637 }
 0x308   : > { %1711 = vst.msk [vmem:[#allocation2 + $0xa8] sm:$0xff] %vm1689_vm9, %v1636_v63  ;;  %v1787_v58 = vpop.permute.xlu2 %1786 }
 0x309   : > { %1712 = vst.msk [vmem:[#allocation2 + $0xb0] sm:$0xff] %vm1689_vm9, %v1638_v52 }
 0x30a   : > { %1883 = vst.msk [vmem:[#allocation2] sm:$0xff] %vm1882_vm11, %v1787_v58 }
 0x30f   : > { %v1642_v41 = vpop.permute.xlu0 %1641  ;;  %v1644_v51 = vpop.permute.xlu1 %1643 }
 0x310   : > { %1714 = vst.msk [vmem:[#allocation2 + $0xc0] sm:$0xff] %vm1689_vm9, %v1642_v41  ;;  %v1793_v7 = vpop.permute.xlu2 %1792 }
 0x311   : > { %1715 = vst.msk [vmem:[#allocation2 + $0xc8] sm:$0xff] %vm1689_vm9, %v1644_v51  ;;  %v1915_v13 = vld [vmem:[#allocation2] sm:$0xff] }
 0x312   : > { %1886 = vst.msk [vmem:[#allocation2 + $0x18] sm:$0xff] %vm1882_vm11, %v1793_v7 }
 0x317   : > { %v1648_v0 = vpop.permute.xlu0 %1647  ;;  %v1650_v2 = vpop.permute.xlu1 %1649 }
 0x318   : > { %1717 = vst.msk [vmem:[#allocation2 + $0xd8] sm:$0xff] %vm1689_vm9, %v1648_v0  ;;  %v1799_v8 = vpop.permute.xlu2 %1798  ;;  %v4353_v0 = vld [vmem:[%s4518_s28 + $0x1a2] sm:$0xff] }
 0x319   : > { %1718 = vst.msk [vmem:[#allocation2 + $0xe0] sm:$0xff] %vm1689_vm9, %v1650_v2  ;;  %v1918_v21 = vld [vmem:[#allocation2 + $0x18] sm:$0xff]  ;;  %1848 = vrot.lane.b32.xlu0 %v4353_v0, %s4467_s11 }
 0x31a   : > { %1889 = vst.msk [vmem:[#allocation2 + $0x30] sm:$0xff] %vm1882_vm11, %v1799_v8  ;;  %v4352_v8 = vld [vmem:[%s4518_s28 + $0x19a] sm:$0xff] }
 0x31b   : > { %1846 = vrot.lane.b32.xlu2 %v4352_v8, %s4467_s11 }
 0x31f   : > { %v1654_v5 = vpop.permute.xlu0 %1653  ;;  %v1656_v3 = vpop.permute.xlu1 %1655 }
 0x320   : > { %1720 = vst.msk [vmem:[#allocation2 + $0xf0] sm:$0xff] %vm1689_vm9, %v1654_v5  ;;  %v1805_v11 = vpop.permute.xlu2 %1804 }
 0x321   : > { %1721 = vst.msk [vmem:[#allocation2 + $0xf8] sm:$0xff] %vm1689_vm9, %v1656_v3  ;;  %v1921_v47 = vld [vmem:[#allocation2 + $0x30] sm:$0xff] }
 0x322   : > { %1892 = vst.msk [vmem:[#allocation2 + $0x48] sm:$0xff] %vm1882_vm11, %v1805_v11 }
 0x327   : > { %v1789_v9 = vpop.permute.xlu0 %1788  ;;  %v1791_v10 = vpop.permute.xlu1 %1790 }
 0x328   : > { %1884 = vst.msk [vmem:[#allocation2 + $0x8] sm:$0xff] %vm1882_vm11, %v1789_v9  ;;  %v1811_v17 = vpop.permute.xlu2 %1810  ;;  %v2259_v9 = vld [vmem:[#allocation3 + $0x8] sm:$0xff] }
 0x329   : > { %1885 = vst.msk [vmem:[#allocation2 + $0x10] sm:$0xff] %vm1882_vm11, %v1791_v10  ;;  %v1924_v55 = vld [vmem:[#allocation2 + $0x48] sm:$0xff]  ;;  %2323 = vrot.lane.b32.xlu1 %v2259_v9, %s4461_s30 }
 0x32a   : > { %1895 = vst.msk [vmem:[#allocation2 + $0x60] sm:$0xff] %vm1882_vm11, %v1811_v17  ;;  %v5809_v17 = vld [vmem:[%s6922_s2] ss:$0 sm:$0xff] }
 0x32f   : > { %v1916_v12 = vld [vmem:[#allocation2 + $0x8] sm:$0xff]  ;;  %v1795_v14 = vpop.permute.xlu0 %1794  ;;  %v1797_v15 = vpop.permute.xlu1 %1796 }
 0x330   : > { %v1947_v16 = vpack.c.bf16 %v1916_v12, %v1915_v13  ;;  %1887 = vst.msk [vmem:[#allocation2 + $0x20] sm:$0xff] %vm1882_vm11, %v1795_v14  ;;  %v1917_v20 = vld [vmem:[#allocation2 + $0x10] sm:$0xff]  ;;  %v1817_v22 = vpop.permute.xlu2 %1816 }
 0x331   : > { %1888 = vst.msk [vmem:[#allocation2 + $0x28] sm:$0xff] %vm1882_vm11, %v1797_v15  ;;  %v1948_v23 = vpack.c.bf16 %v1918_v21, %v1917_v20  ;;  %v1927_v51 = vld [vmem:[#allocation2 + $0x60] sm:$0xff]  ;;  %v2260_v14 = vld [vmem:[#allocation3 + $0x10] sm:$0xff] }
 0x332   : > { %4362 = vmatmul.msk.bf16.vlgmr.msra.gmra.mxu0 %vm1987_vm12, %v1947_v16  ;;  %1898 = vst.msk [vmem:[#allocation2 + $0x78] sm:$0xff] %vm1882_vm11, %v1817_v22  ;;  %2325 = vrot.lane.b32.xlu2 %v2260_v14, %s4461_s30 }
 0x337   : > { %v1801_v18 = vpop.permute.xlu0 %1800  ;;  %v1803_v19 = vpop.permute.xlu1 %1802  ;;  %v1919_v34 = vld [vmem:[#allocation2 + $0x20] sm:$0xff] }
 0x338   : > { %1890 = vst.msk [vmem:[#allocation2 + $0x38] sm:$0xff] %vm1882_vm11, %v1801_v18  ;;  %v1823_v24 = vpop.permute.xlu2 %1822  ;;  %v1920_v26 = vld [vmem:[#allocation2 + $0x28] sm:$0xff] }
 0x339   : > { %1891 = vst.msk [vmem:[#allocation2 + $0x40] sm:$0xff] %vm1882_vm11, %v1803_v19  ;;  %v1949_v27 = vpack.c.bf16 %v1920_v26, %v1919_v34  ;;  %v1930_v11 = vld [vmem:[#allocation2 + $0x78] sm:$0xff] }
 0x33a   : > { %1901 = vst.msk [vmem:[#allocation2 + $0x90] sm:$0xff] %vm1882_vm11, %v1823_v24 }
 0x33f   : > { %v1807_v46 = vpop.permute.xlu0 %1806  ;;  %v1809_v59 = vpop.permute.xlu1 %1808  ;;  %v1922_v30 = vld [vmem:[#allocation2 + $0x38] sm:$0xff] }
 0x340   : > { %1893 = vst.msk [vmem:[#allocation2 + $0x50] sm:$0xff] %vm1882_vm11, %v1807_v46  ;;  %v1829_v28 = vpop.permute.xlu2 %1828  ;;  %v1950_v54 = vpack.c.bf16 %v1922_v30, %v1921_v47  ;;  %v1923_v57 = vld [vmem:[#allocation2 + $0x40] sm:$0xff] }
 0x341   : > { %1894 = vst.msk [vmem:[#allocation2 + $0x58] sm:$0xff] %vm1882_vm11, %v1809_v59  ;;  %v1933_v31 = vld [vmem:[#allocation2 + $0x90] sm:$0xff]  ;;  %v1951_v50 = vpack.c.bf16 %v1924_v55, %v1923_v57 }
 0x342   : > { %4363 = vmatmul.msk.bf16.gmra.mxu0 %vm1987_vm12, %v1948_v23  ;;  %1904 = vst.msk [vmem:[#allocation2 + $0xa8] sm:$0xff] %vm1882_vm11, %v1829_v28 }
 0x347   : > { %v1813_v25 = vpop.permute.xlu0 %1812  ;;  %v1815_v53 = vpop.permute.xlu1 %1814  ;;  %v1925_v33 = vld [vmem:[#allocation2 + $0x50] sm:$0xff] }
 0x348   : > { %1896 = vst.msk [vmem:[#allocation2 + $0x68] sm:$0xff] %vm1882_vm11, %v1813_v25  ;;  %v1835_v48 = vpop.permute.xlu2 %1834  ;;  %v1926_v44 = vld [vmem:[#allocation2 + $0x58] sm:$0xff] }
 0x349   : > { %1897 = vst.msk [vmem:[#allocation2 + $0x70] sm:$0xff] %vm1882_vm11, %v1815_v53  ;;  %v1936_v56 = vld [vmem:[#allocation2 + $0xa8] sm:$0xff]  ;;  %v1952_v52 = vpack.c.bf16 %v1926_v44, %v1925_v33 }
 0x34a   : > { %1907 = vst.msk [vmem:[#allocation2 + $0xc0] sm:$0xff] %vm1882_vm11, %v1835_v48 }
 0x34f   : > { %v1819_v62 = vpop.permute.xlu0 %1818  ;;  %v1821_v35 = vpop.permute.xlu1 %1820  ;;  %v1928_v39 = vld [vmem:[#allocation2 + $0x68] sm:$0xff] }
 0x350   : > { %1899 = vst.msk [vmem:[#allocation2 + $0x80] sm:$0xff] %vm1882_vm11, %v1819_v62  ;;  %v1841_v37 = vpop.permute.xlu2 %1840  ;;  %v1953_v7 = vpack.c.bf16 %v1928_v39, %v1927_v51  ;;  %v1929_v10 = vld [vmem:[#allocation2 + $0x70] sm:$0xff] }
 0x351   : > { %1900 = vst.msk [vmem:[#allocation2 + $0x88] sm:$0xff] %vm1882_vm11, %v1821_v35  ;;  %v1939_v36 = vld [vmem:[#allocation2 + $0xc0] sm:$0xff]  ;;  %v1954_v12 = vpack.c.bf16 %v1930_v11, %v1929_v10 }
 0x352   : > { %4364 = vmatmul.msk.bf16.gmra.mxu0 %vm1987_vm12, %v1949_v27  ;;  %1910 = vst.msk [vmem:[#allocation2 + $0xd8] sm:$0xff] %vm1882_vm11, %v1841_v37 }
 0x357   : > { %v1825_v29 = vpop.permute.xlu0 %1824  ;;  %v1827_v40 = vpop.permute.xlu1 %1826  ;;  %v1931_v18 = vld [vmem:[#allocation2 + $0x80] sm:$0xff] }
 0x358   : > { %1902 = vst.msk [vmem:[#allocation2 + $0x98] sm:$0xff] %vm1882_vm11, %v1825_v29  ;;  %v1932_v19 = vld [vmem:[#allocation2 + $0x88] sm:$0xff] }
 0x359   : > { %1903 = vst.msk [vmem:[#allocation2 + $0xa0] sm:$0xff] %vm1882_vm11, %v1827_v40  ;;  %v1942_v6 = vld [vmem:[#allocation2 + $0xd8] sm:$0xff]  ;;  %v1955_v23 = vpack.c.bf16 %v1932_v19, %v1931_v18  ;;  %v2196_v19 = vld [vmem:[#allocation3 + $0xf] sm:$0xff] }
 0x35a   : > { %2228 = vst.msk [vmem:[#allocation4 + $0x8] sm:$0xff] %vm2162_vm13, %v2196_v19 }
 0x35f   : > { %v1934_v60 = vld [vmem:[#allocation2 + $0x98] sm:$0xff]  ;;  %v1833_v1 = vpop.permute.xlu1 %1832  ;;  %v1831_v61 = vpop.permute.xlu0 %1830 }
 0x360   : > { %v1956_v32 = vpack.c.bf16 %v1934_v60, %v1933_v31  ;;  %1906 = vst.msk [vmem:[#allocation2 + $0xb8] sm:$0xff] %vm1882_vm11, %v1833_v1  ;;  %v1935_v4 = vld [vmem:[#allocation2 + $0xa0] sm:$0xff] }
 0x361   : > { %1905 = vst.msk [vmem:[#allocation2 + $0xb0] sm:$0xff] %vm1882_vm11, %v1831_v61  ;;  %v1957_v49 = vpack.c.bf16 %v1936_v56, %v1935_v4 }
 0x362   : > { %4365 = vmatmul.msk.bf16.gmra.mxu0 %vm1987_vm12, %v1950_v54  ;;  %4371 = vmatmul.msk.bf16.vlgmr.msra.gmra.mxu3 %vm1987_vm12, %v1956_v32 }
 0x367   : > { %v1837_v38 = vpop.permute.xlu0 %1836  ;;  %v1938_v45 = vld [vmem:[#allocation2 + $0xb8] sm:$0xff]  ;;  %v1839_v58 = vpop.permute.xlu1 %1838 }
 0x368   : > { %1908 = vst.msk [vmem:[#allocation2 + $0xc8] sm:$0xff] %vm1882_vm11, %v1837_v38  ;;  %v1937_v43 = vld [vmem:[#allocation2 + $0xb0] sm:$0xff] }
 0x369   : > { %v1958_v63 = vpack.c.bf16 %v1938_v45, %v1937_v43  ;;  %1909 = vst.msk [vmem:[#allocation2 + $0xd0] sm:$0xff] %vm1882_vm11, %v1839_v58 }
 0x36f   : > { %v1940_v41 = vld [vmem:[#allocation2 + $0xc8] sm:$0xff]  ;;  %v1845_v2 = vpop.permute.xlu1 %1844  ;;  %v1843_v5 = vpop.permute.xlu0 %1842 }
 0x370   : > { %v1959_v42 = vpack.c.bf16 %v1940_v41, %v1939_v36  ;;  %v1941_v3 = vld [vmem:[#allocation2 + $0xd0] sm:$0xff]  ;;  %1912 = vst.msk [vmem:[#allocation2 + $0xe8] sm:$0xff] %vm1882_vm11, %v1845_v2 }
 0x371   : > { %1911 = vst.msk [vmem:[#allocation2 + $0xe0] sm:$0xff] %vm1882_vm11, %v1843_v5  ;;  %v1960_v13 = vpack.c.bf16 %v1942_v6, %v1941_v3 }
 0x372   : > { %4366 = vmatmul.msk.bf16.gmra.mxu0 %vm1987_vm12, %v1951_v50  ;;  %4372 = vmatmul.msk.bf16.gmra.mxu3 %vm1987_vm12, %v1957_v49 }
 0x375   : > { %v1847_v10 = vpop.permute.xlu2 %1846 }
 0x376   : > { %1913 = vst.msk [vmem:[#allocation2 + $0xf0] sm:$0xff] %vm1882_vm11, %v1847_v10 }
 0x377   : > { %v1944_v16 = vld [vmem:[#allocation2 + $0xe8] sm:$0xff] }
 0x378   : > { %v1943_v15 = vld [vmem:[#allocation2 + $0xe0] sm:$0xff] }
 0x379   : > { %v1961_v20 = vpack.c.bf16 %v1944_v16, %v1943_v15 }
 0x382   : > { %4367 = vmatmul.msk.bf16.gmra.mxu0 %vm1987_vm12, %v1952_v52  ;;  %4373 = vmatmul.msk.bf16.gmra.mxu3 %vm1987_vm12, %v1958_v63 }
 0x392   : > { %4368 = vmatmul.msk.bf16.gmra.mxu0 %vm1987_vm12, %v1953_v7  ;;  %4374 = vmatmul.msk.bf16.gmra.mxu3 %vm1987_vm12, %v1959_v42 }
 0x3a2   : > { %4369 = vmatmul.msk.bf16.gmra.mxu0 %vm1987_vm12, %v1954_v12  ;;  %4375 = vmatmul.msk.bf16.gmra.mxu3 %vm1987_vm12, %v1960_v13 }
 0x3af   : > { %v2049_v21 = vpop.f32.mrf.mxu0 }
 0x3b0   : > { %v2050_v22 = vadd.f32 %v5809_v17, %v2049_v21 }
 0x3b2   : > { %v2129_v46 = vmax.f32 %v2050_v22, 0.0  ;;  %4370 = vmatmul.msk.bf16.gmra.mxu0 %vm1987_vm12, %v1955_v23  ;;  %4376 = vmatmul.msk.bf16.gmra.mxu3 %vm1987_vm12, %v1961_v20  ;;  %v2326_v22 = vpop.permute.xlu2 %2325 }
 0x3b3   : > { %2421 = vst.msk [vmem:[#allocation4 + $0x8] sm:$0xff] %vm2419_vm14, %v2326_v22 }
 0x3b4   : > { %2163 = vst.msk [vmem:[#allocation3 + $0x28] sm:$0xff] %vm2162_vm13, %v2129_v46 }
 0x3b7   : > { %v2051_v59 = vpop.f32.mrf.mxu0 }
 0x3b8   : > { %v2052_v24 = vadd.f32 %v5809_v17, %v2051_v59 }
 0x3ba   : > { %v2130_v25 = vmax.f32 %v2052_v24, 0.0 }
 0x3bb   : > { %v5816_v53 = vld [vmem:[#allocation3 + $0x28] sm:$0xff] }
 0x3bc   : > { %v5818_v34 = vld [vmem:[#allocation3 + $0x27] sm:$0xff]  ;;  %2164 = vst.msk [vmem:[#allocation3 + $0x30] sm:$0xff] %vm2162_vm13, %v2130_v25  ;;  %2327 = vrot.lane.b32.xlu0 %v5816_v53, %s4461_s30 }
 0x3bd   : > { %2229 = vst.msk [vmem:[#allocation4 + $0x10] sm:$0xff] %vm2162_vm13, %v5818_v34 }
 0x3bf   : > { %v2054_v26 = vpop.f32.mrf.mxu0 }
 0x3c0   : > { %v2055_v27 = vadd.f32 %v5809_v17, %v2054_v26 }
 0x3c2   : > { %v2131_v62 = vmax.f32 %v2055_v27, 0.0 }
 0x3c3   : > { %v5826_v35 = vld [vmem:[#allocation3 + $0x30] sm:$0xff] }
 0x3c4   : > { %v5828_v28 = vld [vmem:[#allocation3 + $0x2f] sm:$0xff]  ;;  %2165 = vst.msk [vmem:[#allocation3 + $0x48] sm:$0xff] %vm2162_vm13, %v2131_v62  ;;  %2329 = vrot.lane.b32.xlu1 %v5826_v35, %s4461_s30 }
 0x3c5   : > { %2230 = vst.msk [vmem:[#allocation4 + $0x18] sm:$0xff] %vm2162_vm13, %v5828_v28 }
 0x3c7   : > { %v2056_v29 = vpop.f32.mrf.mxu0 }
 0x3c8   : > { %v2057_v40 = vadd.f32 %v5809_v17, %v2056_v29 }
 0x3ca   : > { %v2132_v47 = vmax.f32 %v2057_v40, 0.0  ;;  %v1849_v40 = vpop.permute.xlu0 %1848 }
 0x3cb   : > { %v5836_v30 = vld [vmem:[#allocation3 + $0x48] sm:$0xff]  ;;  %1914 = vst.msk [vmem:[#allocation2 + $0xf8] sm:$0xff] %vm1882_vm11, %v1849_v40 }
 0x3cc   : > { %v5838_v31 = vld [vmem:[#allocation3 + $0x47] sm:$0xff]  ;;  %2166 = vst.msk [vmem:[#allocation3 + $0x50] sm:$0xff] %vm2162_vm13, %v2132_v47  ;;  %2331 = vrot.lane.b32.xlu2 %v5836_v30, %s4461_s30 }
 0x3cd   : > { %2231 = vst.msk [vmem:[#allocation4 + $0x20] sm:$0xff] %vm2162_vm13, %v5838_v31 }
 0x3cf   : > { %v2059_v60 = vpop.f32.mrf.mxu0 }
 0x3d0   : > { %v2060_v54 = vadd.f32 %v5809_v17, %v2059_v60 }
 0x3d2   : > { %v2133_v32 = vmax.f32 %v2060_v54, 0.0 }
 0x3d3   : > { %v5846_v1 = vld [vmem:[#allocation3 + $0x50] sm:$0xff] }
 0x3d4   : > { %v5848_v61 = vld [vmem:[#allocation3 + $0x4f] sm:$0xff]  ;;  %2167 = vst.msk [vmem:[#allocation3 + $0x68] sm:$0xff] %vm2162_vm13, %v2133_v32  ;;  %2333 = vrot.lane.b32.xlu0 %v5846_v1, %s4461_s30 }
 0x3d5   : > { %2232 = vst.msk [vmem:[#allocation4 + $0x28] sm:$0xff] %vm2162_vm13, %v5848_v61 }
 0x3d7   : > { %v2061_v4 = vpop.f32.mrf.mxu0 }
 0x3d8   : > { %v2062_v56 = vadd.f32 %v5809_v17, %v2061_v4 }
 0x3da   : > { %v2134_v57 = vmax.f32 %v2062_v56, 0.0 }
 0x3db   : > { %v5856_v55 = vld [vmem:[#allocation3 + $0x68] sm:$0xff] }
 0x3dc   : > { %v5858_v49 = vld [vmem:[#allocation3 + $0x67] sm:$0xff]  ;;  %2168 = vst.msk [vmem:[#allocation3 + $0x70] sm:$0xff] %vm2162_vm13, %v2134_v57  ;;  %2335 = vrot.lane.b32.xlu1 %v5856_v55, %s4461_s30 }
 0x3dd   : > { %2233 = vst.msk [vmem:[#allocation4 + $0x30] sm:$0xff] %vm2162_vm13, %v5858_v49 }
 0x3df   : > { %v2064_v50 = vpop.f32.mrf.mxu0 }
 0x3e0   : > { %v2065_v48 = vadd.f32 %v5809_v17, %v2064_v50  ;;  %v2195_v50 = vld [vmem:[#allocation3 + $0x7] sm:$0xff] }
 0x3e1   : > { %2227 = vst.msk [vmem:[#allocation4] sm:$0xff] %vm2162_vm13, %v2195_v50 }
 0x3e2   : > { %v2135_v38 = vmax.f32 %v2065_v48, 0.0 }
 0x3e3   : > { %v5866_v43 = vld [vmem:[#allocation3 + $0x70] sm:$0xff] }
 0x3e4   : > { %v5868_v45 = vld [vmem:[#allocation3 + $0x6f] sm:$0xff]  ;;  %2169 = vst.msk [vmem:[#allocation3 + $0x88] sm:$0xff] %vm2162_vm13, %v2135_v38  ;;  %2337 = vrot.lane.b32.xlu2 %v5866_v43, %s4461_s30 }
 0x3e5   : > { %v2094_v33 = vpop.f32.mrf.mxu3  ;;  %2234 = vst.msk [vmem:[#allocation4 + $0x38] sm:$0xff] %vm2162_vm13, %v5868_v45 }
 0x3e6   : > { %v2095_v44 = vadd.f32 %v5809_v17, %v2094_v33  ;;  %v2324_v33 = vpop.permute.xlu1 %2323 }
 0x3e7   : > { %v2066_v63 = vpop.f32.mrf.mxu0  ;;  %2420 = vst.msk [vmem:[#allocation4] sm:$0xff] %vm2419_vm14, %v2324_v33 }
 0x3e8   : > { %v2067_v52 = vadd.f32 %v5809_v17, %v2066_v63  ;;  %v2147_v37 = vmax.f32 %v2095_v44, 0.0 }
 0x3ea   : > { %v2136_v58 = vmax.f32 %v2067_v52, 0.0  ;;  %2181 = vst.msk [vmem:[#allocation3 + $0x148] sm:$0xff] %vm2162_vm13, %v2147_v37 }
 0x3eb   : > { %v5878_v36 = vld [vmem:[#allocation3 + $0x88] sm:$0xff] }
 0x3ec   : > { %v5880_v41 = vld [vmem:[#allocation3 + $0x87] sm:$0xff]  ;;  %2170 = vst.msk [vmem:[#allocation3 + $0x90] sm:$0xff] %vm2162_vm13, %v2136_v58  ;;  %2339 = vrot.lane.b32.xlu0 %v5878_v36, %s4461_s30 }
 0x3ed   : > { %v2096_v51 = vpop.f32.mrf.mxu3  ;;  %2235 = vst.msk [vmem:[#allocation4 + $0x40] sm:$0xff] %vm2162_vm13, %v5880_v41 }
 0x3ee   : > { %v2097_v39 = vadd.f32 %v5809_v17, %v2096_v51 }
 0x3ef   : > { %v2069_v42 = vpop.f32.mrf.mxu0 }
 0x3f0   : > { %v2070_v7 = vadd.f32 %v5809_v17, %v2069_v42  ;;  %v2148_v0 = vmax.f32 %v2097_v39, 0.0 }
 0x3f1   : > { %v5889_v2 = vld [vmem:[#allocation3 + $0x147] sm:$0xff] }
 0x3f2   : > { %v2137_v5 = vmax.f32 %v2070_v7, 0.0  ;;  %2182 = vst.msk [vmem:[#allocation3 + $0x150] sm:$0xff] %vm2162_vm13, %v2148_v0 }
 0x3f3   : > { %v5892_v3 = vld [vmem:[#allocation3 + $0x90] sm:$0xff]  ;;  %2247 = vst.msk [vmem:[#allocation4 + $0xa0] sm:$0xff] %vm2162_vm13, %v5889_v2 }
 0x3f4   : > { %v5894_v6 = vld [vmem:[#allocation3 + $0x8f] sm:$0xff]  ;;  %2171 = vst.msk [vmem:[#allocation3 + $0xa8] sm:$0xff] %vm2162_vm13, %v2137_v5  ;;  %2341 = vrot.lane.b32.xlu1 %v5892_v3, %s4461_s30 }
 0x3f5   : > { %v2099_v8 = vpop.f32.mrf.mxu3  ;;  %2236 = vst.msk [vmem:[#allocation4 + $0x48] sm:$0xff] %vm2162_vm13, %v5894_v6 }
 0x3f6   : > { %v2100_v9 = vadd.f32 %v5809_v17, %v2099_v8 }
 0x3f7   : > { %v2071_v11 = vpop.f32.mrf.mxu0 }
 0x3f8   : > { %v2072_v13 = vadd.f32 %v5809_v17, %v2071_v11  ;;  %v2149_v12 = vmax.f32 %v2100_v9, 0.0 }
 0x3f9   : > { %v5907_v15 = vld [vmem:[#allocation3 + $0x14f] sm:$0xff] }
 0x3fa   : > { %v2138_v14 = vmax.f32 %v2072_v13, 0.0  ;;  %2183 = vst.msk [vmem:[#allocation3 + $0x168] sm:$0xff] %vm2162_vm13, %v2149_v12 }
 0x3fb   : > { %v5909_v16 = vld [vmem:[#allocation3 + $0xa8] sm:$0xff]  ;;  %2248 = vst.msk [vmem:[#allocation4 + $0xa8] sm:$0xff] %vm2162_vm13, %v5907_v15 }
 0x3fc   : > { %v5911_v18 = vld [vmem:[#allocation3 + $0xa7] sm:$0xff]  ;;  %2172 = vst.msk [vmem:[#allocation3 + $0xb0] sm:$0xff] %vm2162_vm13, %v2138_v14  ;;  %2343 = vrot.lane.b32.xlu2 %v5909_v16, %s4461_s30 }
 0x3fd   : > { %v2101_v20 = vpop.f32.mrf.mxu3  ;;  %2237 = vst.msk [vmem:[#allocation4 + $0x50] sm:$0xff] %vm2162_vm13, %v5911_v18 }
 0x3fe   : > { %v2102_v21 = vadd.f32 %v5809_v17, %v2101_v20 }
 0x3ff   : > { %v2074_v23 = vpop.f32.mrf.mxu0 }
 0x400   : > { %v2075_v46 = vadd.f32 %v5809_v17, %v2074_v23  ;;  %v2150_v59 = vmax.f32 %v2102_v21, 0.0 }
 0x401   : > { %v5924_v24 = vld [vmem:[#allocation3 + $0x167] sm:$0xff] }
 0x402   : > { %v2139_v25 = vmax.f32 %v2075_v46, 0.0  ;;  %2184 = vst.msk [vmem:[#allocation3 + $0x170] sm:$0xff] %vm2162_vm13, %v2150_v59 }
 0x403   : > { %v5927_v26 = vld [vmem:[#allocation3 + $0xb0] sm:$0xff]  ;;  %2249 = vst.msk [vmem:[#allocation4 + $0xb0] sm:$0xff] %vm2162_vm13, %v5924_v24 }
 0x404   : > { %v5929_v27 = vld [vmem:[#allocation3 + $0xaf] sm:$0xff]  ;;  %2173 = vst.msk [vmem:[#allocation3 + $0xc8] sm:$0xff] %vm2162_vm13, %v2139_v25  ;;  %2345 = vrot.lane.b32.xlu0 %v5927_v26, %s4461_s30 }
 0x405   : > { %v2104_v62 = vpop.f32.mrf.mxu3  ;;  %2238 = vst.msk [vmem:[#allocation4 + $0x58] sm:$0xff] %vm2162_vm13, %v5929_v27 }
 0x406   : > { %v2105_v29 = vadd.f32 %v5809_v17, %v2104_v62 }
 0x407   : > { %v2076_v47 = vpop.f32.mrf.mxu0 }
 0x408   : > { %v2077_v60 = vadd.f32 %v5809_v17, %v2076_v47  ;;  %v2151_v54 = vmax.f32 %v2105_v29, 0.0 }
 0x409   : > { %v5942_v4 = vld [vmem:[#allocation3 + $0x16f] sm:$0xff] }
 0x40a   : > { %v2140_v32 = vmax.f32 %v2077_v60, 0.0  ;;  %2185 = vst.msk [vmem:[#allocation3 + $0x188] sm:$0xff] %vm2162_vm13, %v2151_v54 }
 0x40b   : > { %v5944_v56 = vld [vmem:[#allocation3 + $0xc8] sm:$0xff]  ;;  %2250 = vst.msk [vmem:[#allocation4 + $0xb8] sm:$0xff] %vm2162_vm13, %v5942_v4 }
 0x40c   : > { %v5946_v57 = vld [vmem:[#allocation3 + $0xc7] sm:$0xff]  ;;  %2174 = vst.msk [vmem:[#allocation3 + $0xd0] sm:$0xff] %vm2162_vm13, %v2140_v32  ;;  %2347 = vrot.lane.b32.xlu1 %v5944_v56, %s4461_s30 }
 0x40d   : > { %v2106_v48 = vpop.f32.mrf.mxu3  ;;  %2239 = vst.msk [vmem:[#allocation4 + $0x60] sm:$0xff] %vm2162_vm13, %v5946_v57 }
 0x40e   : > { %v2107_v38 = vadd.f32 %v5809_v17, %v2106_v48 }
 0x40f   : > { %v2079_v44 = vpop.f32.mrf.mxu0 }
 0x410   : > { %v2080_v63 = vadd.f32 %v5809_v17, %v2079_v44  ;;  %v2152_v52 = vmax.f32 %v2107_v38, 0.0 }
 0x411   : > { %v5959_v37 = vld [vmem:[#allocation3 + $0x187] sm:$0xff] }
 0x412   : > { %v2141_v58 = vmax.f32 %v2080_v63, 0.0  ;;  %2186 = vst.msk [vmem:[#allocation3 + $0x190] sm:$0xff] %vm2162_vm13, %v2152_v52 }
 0x413   : > { %v5962_v51 = vld [vmem:[#allocation3 + $0xd0] sm:$0xff]  ;;  %2251 = vst.msk [vmem:[#allocation4 + $0xc0] sm:$0xff] %vm2162_vm13, %v5959_v37 }
 0x414   : > { %v5964_v39 = vld [vmem:[#allocation3 + $0xcf] sm:$0xff]  ;;  %2175 = vst.msk [vmem:[#allocation3 + $0xe8] sm:$0xff] %vm2162_vm13, %v2141_v58  ;;  %2349 = vrot.lane.b32.xlu2 %v5962_v51, %s4461_s30 }
 0x415   : > { %v2109_v42 = vpop.f32.mrf.mxu3  ;;  %2240 = vst.msk [vmem:[#allocation4 + $0x68] sm:$0xff] %vm2162_vm13, %v5964_v39 }
 0x416   : > { %v2110_v7 = vadd.f32 %v5809_v17, %v2109_v42 }
 0x417   : > { %v2081_v0 = vpop.f32.mrf.mxu0 }
 0x418   : > { %v2082_v5 = vadd.f32 %v5809_v17, %v2081_v0  ;;  %v2153_v8 = vmax.f32 %v2110_v7, 0.0 }
 0x419   : > { %v5976_v10 = vld [vmem:[#allocation3 + $0x18f] sm:$0xff] }
 0x41a   : > { %v2142_v9 = vmax.f32 %v2082_v5, 0.0  ;;  %2187 = vst.msk [vmem:[#allocation3 + $0x1a8] sm:$0xff] %vm2162_vm13, %v2153_v8 }
 0x41b   : > { %v5978_v11 = vld [vmem:[#allocation3 + $0xe8] sm:$0xff]  ;;  %2252 = vst.msk [vmem:[#allocation4 + $0xc8] sm:$0xff] %vm2162_vm13, %v5976_v10 }
 0x41c   : > { %v5980_v13 = vld [vmem:[#allocation3 + $0xe7] sm:$0xff]  ;;  %2176 = vst.msk [vmem:[#allocation3 + $0xf0] sm:$0xff] %vm2162_vm13, %v2142_v9  ;;  %2351 = vrot.lane.b32.xlu0 %v5978_v11, %s4461_s30 }
 0x41d   : > { %v2111_v12 = vpop.f32.mrf.mxu3  ;;  %2241 = vst.msk [vmem:[#allocation4 + $0x70] sm:$0xff] %vm2162_vm13, %v5980_v13 }
 0x41e   : > { %v2112_v14 = vadd.f32 %v5809_v17, %v2111_v12 }
 0x41f   : > { %v2084_v19 = vpop.f32.mrf.mxu0 }
 0x420   : > { %v2085_v20 = vadd.f32 %v5809_v17, %v2084_v19  ;;  %v2154_v21 = vmax.f32 %v2112_v14, 0.0 }
 0x421   : > { %v5991_v22 = vld [vmem:[#allocation3 + $0x1a7] sm:$0xff] }
 0x422   : > { %v2143_v23 = vmax.f32 %v2085_v20, 0.0  ;;  %2188 = vst.msk [vmem:[#allocation3 + $0x1b0] sm:$0xff] %vm2162_vm13, %v2154_v21 }
 0x423   : > { %v5994_v46 = vld [vmem:[#allocation3 + $0xf0] sm:$0xff]  ;;  %2253 = vst.msk [vmem:[#allocation4 + $0xd0] sm:$0xff] %vm2162_vm13, %v5991_v22 }
 0x424   : > { %2177 = vst.msk [vmem:[#allocation3 + $0x108] sm:$0xff] %vm2162_vm13, %v2143_v23  ;;  %2353 = vrot.lane.b32.xlu1 %v5994_v46, %s4461_s30  ;;  %v6001_v59 = vld [vmem:[#allocation3 + $0xef] sm:$0xff] }
 0x425   : > { %v2114_v25 = vpop.f32.mrf.mxu3  ;;  %2242 = vst.msk [vmem:[#allocation4 + $0x78] sm:$0xff] %vm2162_vm13, %v6001_v59 }
 0x426   : > { %v2332_v62 = vpop.permute.xlu2 %2331  ;;  %v2115_v29 = vadd.f32 %v5809_v17, %v2114_v25 }
 0x427   : > { %2424 = vst.msk [vmem:[#allocation4 + $0x20] sm:$0xff] %vm2419_vm14, %v2332_v62  ;;  %v2086_v40 = vpop.f32.mrf.mxu0  ;;  %v6047_v62 = vld [vmem:[#allocation3 + $0x148] sm:$0xff] }
 0x428   : > { %v2087_v47 = vadd.f32 %v5809_v17, %v2086_v40  ;;  %v2155_v60 = vmax.f32 %v2115_v29, 0.0 }
 0x429   : > { %v6009_v32 = vld [vmem:[#allocation3 + $0x1af] sm:$0xff] }
 0x42a   : > { %v2144_v54 = vmax.f32 %v2087_v47, 0.0  ;;  %2189 = vst.msk [vmem:[#allocation3 + $0x1c8] sm:$0xff] %vm2162_vm13, %v2155_v60 }
 0x42b   : > { %v6011_v50 = vld [vmem:[#allocation3 + $0x108] sm:$0xff]  ;;  %2254 = vst.msk [vmem:[#allocation4 + $0xd8] sm:$0xff] %vm2162_vm13, %v6009_v32 }
 0x42c   : > { %v6013_v48 = vld [vmem:[#allocation3 + $0x107] sm:$0xff]  ;;  %2178 = vst.msk [vmem:[#allocation3 + $0x110] sm:$0xff] %vm2162_vm13, %v2144_v54  ;;  %2355 = vrot.lane.b32.xlu2 %v6011_v50, %s4461_s30 }
 0x42d   : > { %v2116_v38 = vpop.f32.mrf.mxu3  ;;  %2243 = vst.msk [vmem:[#allocation4 + $0x80] sm:$0xff] %vm2162_vm13, %v6013_v48 }
 0x42e   : > { %v2328_v33 = vpop.permute.xlu0 %2327  ;;  %v2117_v44 = vadd.f32 %v5809_v17, %v2116_v38 }
 0x42f   : > { %2422 = vst.msk [vmem:[#allocation4 + $0x10] sm:$0xff] %vm2419_vm14, %v2328_v33  ;;  %v2089_v63 = vpop.f32.mrf.mxu0 }
 0x430   : > { %v2090_v52 = vadd.f32 %v5809_v17, %v2089_v63  ;;  %v2156_v58 = vmax.f32 %v2117_v44, 0.0  ;;  %v6067_v44 = vld [vmem:[#allocation3 + $0x150] sm:$0xff] }
 0x431   : > { %v6025_v42 = vld [vmem:[#allocation3 + $0x1c7] sm:$0xff]  ;;  %v6075_v63 = vld [vmem:[#allocation3 + $0x170] sm:$0xff] }
 0x432   : > { %v2145_v7 = vmax.f32 %v2090_v52, 0.0  ;;  %2190 = vst.msk [vmem:[#allocation3 + $0x1d0] sm:$0xff] %vm2162_vm13, %v2156_v58 }
 0x433   : > { %v6028_v0 = vld [vmem:[#allocation3 + $0x110] sm:$0xff]  ;;  %2255 = vst.msk [vmem:[#allocation4 + $0xe0] sm:$0xff] %vm2162_vm13, %v6025_v42 }
 0x434   : > { %2179 = vst.msk [vmem:[#allocation3 + $0x128] sm:$0xff] %vm2162_vm13, %v2145_v7  ;;  %2357 = vrot.lane.b32.xlu0 %v6028_v0, %s4461_s30  ;;  %v6035_v5 = vld [vmem:[#allocation3 + $0x10f] sm:$0xff] }
 0x435   : > { %v2119_v8 = vpop.f32.mrf.mxu3  ;;  %2244 = vst.msk [vmem:[#allocation4 + $0x88] sm:$0xff] %vm2162_vm13, %v6035_v5  ;;  %v1945_v7 = vld [vmem:[#allocation2 + $0xf0] sm:$0xff] }
 0x436   : > { %v2330_v9 = vpop.permute.xlu1 %2329  ;;  %v2120_v12 = vadd.f32 %v5809_v17, %v2119_v8  ;;  %v1946_v8 = vld [vmem:[#allocation2 + $0xf8] sm:$0xff] }
 0x437   : > { %2423 = vst.msk [vmem:[#allocation4 + $0x18] sm:$0xff] %vm2419_vm14, %v2330_v9  ;;  %v2091_v14 = vpop.f32.mrf.mxu0  ;;  %v1962_v9 = vpack.c.bf16 %v1946_v8, %v1945_v7  ;;  %v2452_v7 = vld [vmem:[#allocation3 + $0x9] sm:$0xff] }
 0x438   : > { %v2092_v19 = vadd.f32 %v5809_v17, %v2091_v14  ;;  %v2157_v20 = vmax.f32 %v2120_v12, 0.0  ;;  %v6087_v14 = vld [vmem:[#allocation3 + $0x168] sm:$0xff] }
 0x439   : > { %v6043_v23 = vld [vmem:[#allocation3 + $0x1cf] sm:$0xff]  ;;  %4377 = vmatmul.msk.bf16.gmra.mxu3 %vm1987_vm12, %v1962_v9 }
 0x43a   : > { %v2146_v21 = vmax.f32 %v2092_v19, 0.0  ;;  %2191 = vst.msk [vmem:[#allocation3 + $0x1e8] sm:$0xff] %vm2162_vm13, %v2157_v20  ;;  %v6089_v19 = vld [vmem:[#allocation3 + $0x188] sm:$0xff] }
 0x43b   : > { %v6045_v25 = vld [vmem:[#allocation3 + $0x128] sm:$0xff]  ;;  %2256 = vst.msk [vmem:[#allocation4 + $0xe8] sm:$0xff] %vm2162_vm13, %v6043_v23 }
 0x43c   : > { %v6049_v29 = vld [vmem:[#allocation3 + $0x127] sm:$0xff]  ;;  %2180 = vst.msk [vmem:[#allocation3 + $0x130] sm:$0xff] %vm2162_vm13, %v2146_v21  ;;  %2359 = vrot.lane.b32.xlu1 %v6045_v25, %s4461_s30  ;;  %2363 = vrot.lane.b32.xlu0 %v6047_v62, %s4461_s30 }
 0x43d   : > { %v2121_v40 = vpop.f32.mrf.mxu3  ;;  %2245 = vst.msk [vmem:[#allocation4 + $0x90] sm:$0xff] %vm2162_vm13, %v6049_v29  ;;  %v6097_v20 = vld [vmem:[#allocation3 + $0x1a8] sm:$0xff] }
 0x43e   : > { %v2338_v47 = vpop.permute.xlu2 %2337  ;;  %v2122_v60 = vadd.f32 %v5809_v17, %v2121_v40  ;;  %v6102_v40 = vld [vmem:[#allocation3 + $0x190] sm:$0xff]  ;;  %v6117_v8 = vld [vmem:[#allocation3 + $0x1c8] sm:$0xff] }
 0x43f   : > { %2427 = vst.msk [vmem:[#allocation4 + $0x38] sm:$0xff] %vm2419_vm14, %v2338_v47  ;;  %v6104_v47 = vld [vmem:[#allocation3 + $0x1b0] sm:$0xff] }
 0x440   : > { %v2158_v54 = vmax.f32 %v2122_v60, 0.0  ;;  %7048 = vst [vmem:[#allocation5_spill] sm:$0xff] %v6104_v47  ;;  %v6110_v60 = vld [vmem:[#allocation3 + $0x1d0] sm:$0xff] }
 0x441   : > { %v6062_v38 = vld [vmem:[#allocation3 + $0x1e7] sm:$0xff]  ;;  %7049 = vst [vmem:[#allocation6_spill] sm:$0xff] %v6110_v60 }
 0x442   : > { %2192 = vst.msk [vmem:[#allocation3 + $0x1f0] sm:$0xff] %vm2162_vm13, %v2158_v54 }
 0x443   : > { %v6065_v33 = vld [vmem:[#allocation3 + $0x130] sm:$0xff]  ;;  %2257 = vst.msk [vmem:[#allocation4 + $0xf0] sm:$0xff] %vm2162_vm13, %v6062_v38 }
 0x444   : > { %2361 = vrot.lane.b32.xlu2 %v6065_v33, %s4461_s30  ;;  %2365 = vrot.lane.b32.xlu1 %v6067_v44, %s4461_s30  ;;  %v6077_v52 = vld [vmem:[#allocation3 + $0x12f] sm:$0xff]  ;;  %7051 = vst [vmem:[#allocation8_spill] sm:$0xff] %v6117_v8 }
 0x445   : > { %2369 = vrot.lane.b32.xlu0 %v6075_v63, %s4461_s30  ;;  %2246 = vst.msk [vmem:[#allocation4 + $0x98] sm:$0xff] %vm2162_vm13, %v6077_v52 }
 0x446   : > { %v2334_v58 = vpop.permute.xlu0 %2333 }
 0x447   : > { %2425 = vst.msk [vmem:[#allocation4 + $0x28] sm:$0xff] %vm2419_vm14, %v2334_v58  ;;  %v6115_v58 = vld [vmem:[#allocation3 + $0x1e8] sm:$0xff] }
 0x448   : > { %7050 = vst [vmem:[#allocation7_spill] sm:$0xff] %v6115_v58 }
 0x449   : > { %v6085_v12 = vld [vmem:[#allocation3 + $0x1ef] sm:$0xff] }
 0x44a   : > { %2258 = vst.msk [vmem:[#allocation4 + $0xf8] sm:$0xff] %vm2162_vm13, %v6085_v12 }
 0x44c   : > { %2367 = vrot.lane.b32.xlu2 %v6087_v14, %s4461_s30  ;;  %2371 = vrot.lane.b32.xlu1 %v6089_v19, %s4461_s30 }
 0x44d   : > { %2375 = vrot.lane.b32.xlu0 %v6097_v20, %s4461_s30 }
 0x44e   : > { %v2336_v21 = vpop.permute.xlu1 %2335 }
 0x44f   : > { %2426 = vst.msk [vmem:[#allocation4 + $0x30] sm:$0xff] %vm2419_vm14, %v2336_v21  ;;  %v2453_v21 = vld [vmem:[#allocation3 + $0x11] sm:$0xff] }
 0x454   : > { %2373 = vrot.lane.b32.xlu2 %v6102_v40, %s4461_s30  ;;  %2377 = vrot.lane.b32.xlu1 %v6104_v47, %s4461_s30  ;;  %v6125_v47 = vld [vmem:[#allocation3 + $0x1f0] sm:$0xff] }
 0x455   : > { %2381 = vrot.lane.b32.xlu0 %v6110_v60, %s4461_s30  ;;  %7052 = vst [vmem:[#allocation9_spill] sm:$0xff] %v6125_v47 }
 0x456   : > { %v2344_v54 = vpop.permute.xlu2 %2343 }
 0x457   : > { %2430 = vst.msk [vmem:[#allocation4 + $0x50] sm:$0xff] %vm2419_vm14, %v2344_v54  ;;  %v6130_v54 = vld [vmem:[#allocation3 + $0x31] sm:$0xff] }
 0x458   : > { %7053 = vst [vmem:[#allocation10_spill] sm:$0xff] %v6130_v54 }
 0x45c   : > { %2379 = vrot.lane.b32.xlu2 %v6117_v8, %s4461_s30  ;;  %2383 = vrot.lane.b32.xlu1 %v6115_v58, %s4461_s30  ;;  %v6137_v58 = vld [vmem:[#allocation3 + $0x29] sm:$0xff] }
 0x45d   : > { %2516 = vrot.lane.b32.xlu0 %v2452_v7, %s4463_s7  ;;  %v6135_v7 = vld [vmem:[#allocation3 + $0x49] sm:$0xff]  ;;  %7055 = vst [vmem:[#allocation12_spill] sm:$0xff] %v6137_v58 }
 0x45e   : > { %v2340_v9 = vpop.permute.xlu0 %2339  ;;  %7054 = vst [vmem:[#allocation11_spill] sm:$0xff] %v6135_v7 }
 0x45f   : > { %2428 = vst.msk [vmem:[#allocation4 + $0x40] sm:$0xff] %vm2419_vm14, %v2340_v9  ;;  %v6143_v9 = vld [vmem:[#allocation3 + $0x69] sm:$0xff] }
 0x460   : > { %7056 = vst [vmem:[#allocation13_spill] sm:$0xff] %v6143_v9 }
 0x464   : > { %2385 = vrot.lane.b32.xlu2 %v6125_v47, %s4461_s30  ;;  %2518 = vrot.lane.b32.xlu1 %v2453_v21, %s4463_s7  ;;  %v6240_v47 = vld [vmem:[#allocation3 + $0x1a9] sm:$0xff] }
 0x465   : > { %2522 = vrot.lane.b32.xlu0 %v6130_v54, %s4463_s7  ;;  %v6148_v54 = vld [vmem:[#allocation3 + $0x71] sm:$0xff]  ;;  %7078 = vst [vmem:[#allocation35_spill] sm:$0xff] %v6240_v47 }
 0x466   : > { %v2342_v60 = vpop.permute.xlu1 %2341  ;;  %7057 = vst [vmem:[#allocation14_spill] sm:$0xff] %v6148_v54 }
 0x467   : > { %2429 = vst.msk [vmem:[#allocation4 + $0x48] sm:$0xff] %vm2419_vm14, %v2342_v60  ;;  %v6150_v60 = vld [vmem:[#allocation3 + $0x51] sm:$0xff] }
 0x468   : > { %7058 = vst [vmem:[#allocation15_spill] sm:$0xff] %v6150_v60 }
 0x46c   : > { %2524 = vrot.lane.b32.xlu1 %v6135_v7, %s4463_s7  ;;  %2520 = vrot.lane.b32.xlu2 %v6137_v58, %s4463_s7  ;;  %v6156_v7 = vld [vmem:[#allocation3 + $0x91] sm:$0xff] }
 0x46d   : > { %2528 = vrot.lane.b32.xlu0 %v6143_v9, %s4463_s7  ;;  %7059 = vst [vmem:[#allocation16_spill] sm:$0xff] %v6156_v7  ;;  %v6161_v9 = vld [vmem:[#allocation3 + $0xa9] sm:$0xff] }
 0x46e   : > { %v2350_v21 = vpop.permute.xlu2 %2349  ;;  %7060 = vst [vmem:[#allocation17_spill] sm:$0xff] %v6161_v9 }
 0x46f   : > { %2433 = vst.msk [vmem:[#allocation4 + $0x68] sm:$0xff] %vm2419_vm14, %v2350_v21  ;;  %v6163_v21 = vld [vmem:[#allocation3 + $0x89] sm:$0xff] }
 0x470   : > { %7061 = vst [vmem:[#allocation18_spill] sm:$0xff] %v6163_v21 }
 0x474   : > { %2530 = vrot.lane.b32.xlu1 %v6148_v54, %s4463_s7  ;;  %2526 = vrot.lane.b32.xlu2 %v6150_v60, %s4463_s7  ;;  %v6169_v54 = vld [vmem:[#allocation3 + $0xc9] sm:$0xff] }
 0x475   : > { %2534 = vrot.lane.b32.xlu0 %v6156_v7, %s4463_s7  ;;  %7062 = vst [vmem:[#allocation19_spill] sm:$0xff] %v6169_v54  ;;  %v6174_v7 = vld [vmem:[#allocation3 + $0xd1] sm:$0xff] }
 0x476   : > { %v2346_v58 = vpop.permute.xlu0 %2345  ;;  %7063 = vst [vmem:[#allocation20_spill] sm:$0xff] %v6174_v7 }
 0x477   : > { %2431 = vst.msk [vmem:[#allocation4 + $0x58] sm:$0xff] %vm2419_vm14, %v2346_v58  ;;  %v6176_v58 = vld [vmem:[#allocation3 + $0xb1] sm:$0xff] }
 0x478   : > { %7064 = vst [vmem:[#allocation21_spill] sm:$0xff] %v6176_v58 }
 0x47c   : > { %2536 = vrot.lane.b32.xlu1 %v6161_v9, %s4463_s7  ;;  %2532 = vrot.lane.b32.xlu2 %v6163_v21, %s4463_s7  ;;  %v6182_v9 = vld [vmem:[#allocation3 + $0xf1] sm:$0xff] }
 0x47d   : > { %2540 = vrot.lane.b32.xlu0 %v6169_v54, %s4463_s7  ;;  %7065 = vst [vmem:[#allocation22_spill] sm:$0xff] %v6182_v9  ;;  %v6187_v54 = vld [vmem:[#allocation3 + $0x109] sm:$0xff] }
 0x47e   : > { %v2348_v60 = vpop.permute.xlu1 %2347  ;;  %7066 = vst [vmem:[#allocation23_spill] sm:$0xff] %v6187_v54 }
 0x47f   : > { %2432 = vst.msk [vmem:[#allocation4 + $0x60] sm:$0xff] %vm2419_vm14, %v2348_v60  ;;  %v6189_v60 = vld [vmem:[#allocation3 + $0xe9] sm:$0xff] }
 0x480   : > { %7067 = vst [vmem:[#allocation24_spill] sm:$0xff] %v6189_v60 }
 0x484   : > { %2542 = vrot.lane.b32.xlu1 %v6174_v7, %s4463_s7  ;;  %2538 = vrot.lane.b32.xlu2 %v6176_v58, %s4463_s7  ;;  %v6195_v7 = vld [vmem:[#allocation3 + $0x129] sm:$0xff] }
 0x485   : > { %2546 = vrot.lane.b32.xlu0 %v6182_v9, %s4463_s7  ;;  %7068 = vst [vmem:[#allocation25_spill] sm:$0xff] %v6195_v7  ;;  %v6200_v9 = vld [vmem:[#allocation3 + $0x131] sm:$0xff] }
 0x486   : > { %v2356_v21 = vpop.permute.xlu2 %2355  ;;  %7069 = vst [vmem:[#allocation26_spill] sm:$0xff] %v6200_v9 }
 0x487   : > { %2436 = vst.msk [vmem:[#allocation4 + $0x80] sm:$0xff] %vm2419_vm14, %v2356_v21  ;;  %v6202_v21 = vld [vmem:[#allocation3 + $0x111] sm:$0xff] }
 0x488   : > { %7070 = vst [vmem:[#allocation27_spill] sm:$0xff] %v6202_v21 }
 0x48c   : > { %2548 = vrot.lane.b32.xlu1 %v6187_v54, %s4463_s7  ;;  %2544 = vrot.lane.b32.xlu2 %v6189_v60, %s4463_s7  ;;  %v6208_v54 = vld [vmem:[#allocation3 + $0x151] sm:$0xff] }
 0x48d   : > { %2552 = vrot.lane.b32.xlu0 %v6195_v7, %s4463_s7  ;;  %7071 = vst [vmem:[#allocation28_spill] sm:$0xff] %v6208_v54  ;;  %v6213_v7 = vld [vmem:[#allocation3 + $0x169] sm:$0xff] }
 0x48e   : > { %v2352_v58 = vpop.permute.xlu0 %2351  ;;  %7072 = vst [vmem:[#allocation29_spill] sm:$0xff] %v6213_v7 }
 0x48f   : > { %2434 = vst.msk [vmem:[#allocation4 + $0x70] sm:$0xff] %vm2419_vm14, %v2352_v58  ;;  %v6215_v58 = vld [vmem:[#allocation3 + $0x149] sm:$0xff] }
 0x490   : > { %7073 = vst [vmem:[#allocation30_spill] sm:$0xff] %v6215_v58 }
 0x494   : > { %2554 = vrot.lane.b32.xlu1 %v6200_v9, %s4463_s7  ;;  %2550 = vrot.lane.b32.xlu2 %v6202_v21, %s4463_s7  ;;  %v6221_v9 = vld [vmem:[#allocation3 + $0x189] sm:$0xff] }
 0x495   : > { %2558 = vrot.lane.b32.xlu0 %v6208_v54, %s4463_s7  ;;  %7074 = vst [vmem:[#allocation31_spill] sm:$0xff] %v6221_v9  ;;  %v6226_v54 = vld [vmem:[#allocation3 + $0x191] sm:$0xff] }
 0x496   : > { %v2354_v60 = vpop.permute.xlu1 %2353  ;;  %7075 = vst [vmem:[#allocation32_spill] sm:$0xff] %v6226_v54 }
 0x497   : > { %2435 = vst.msk [vmem:[#allocation4 + $0x78] sm:$0xff] %vm2419_vm14, %v2354_v60  ;;  %v6228_v60 = vld [vmem:[#allocation3 + $0x171] sm:$0xff] }
 0x498   : > { %7076 = vst [vmem:[#allocation33_spill] sm:$0xff] %v6228_v60 }
 0x49c   : > { %2560 = vrot.lane.b32.xlu1 %v6213_v7, %s4463_s7  ;;  %2556 = vrot.lane.b32.xlu2 %v6215_v58, %s4463_s7  ;;  %v6234_v7 = vld [vmem:[#allocation3 + $0x1b1] sm:$0xff] }
 0x49d   : > { %2564 = vrot.lane.b32.xlu0 %v6221_v9, %s4463_s7  ;;  %7077 = vst [vmem:[#allocation34_spill] sm:$0xff] %v6234_v7 }
 0x49e   : > { %v2362_v21 = vpop.permute.xlu2 %2361 }
 0x49f   : > { %2439 = vst.msk [vmem:[#allocation4 + $0x98] sm:$0xff] %vm2419_vm14, %v2362_v21  ;;  %v2480_v21 = vld [vmem:[#allocation3 + $0x1c9] sm:$0xff] }
 0x4a4   : > { %2566 = vrot.lane.b32.xlu1 %v6226_v54, %s4463_s7  ;;  %2562 = vrot.lane.b32.xlu2 %v6228_v60, %s4463_s7  ;;  %v2482_v54 = vld [vmem:[#allocation3 + $0x1e9] sm:$0xff] }
 0x4a5   : > { %2570 = vrot.lane.b32.xlu0 %v6234_v7, %s4463_s7 }
 0x4a6   : > { %v2368_v58 = vpop.permute.xlu2 %2367  ;;  %v2358_v9 = vpop.permute.xlu0 %2357 }
 0x4a7   : > { %2442 = vst.msk [vmem:[#allocation4 + $0xb0] sm:$0xff] %vm2419_vm14, %v2368_v58  ;;  %v2481_v58 = vld [vmem:[#allocation3 + $0x1d1] sm:$0xff] }
 0x4a8   : > { %2437 = vst.msk [vmem:[#allocation4 + $0x88] sm:$0xff] %vm2419_vm14, %v2358_v9  ;;  %v2483_v9 = vld [vmem:[#allocation3 + $0x1f1] sm:$0xff] }
 0x4ac   : > { %2572 = vrot.lane.b32.xlu1 %v2480_v21, %s4463_s7  ;;  %2568 = vrot.lane.b32.xlu2 %v6240_v47, %s4463_s7 }
 0x4ad   : > { %2576 = vrot.lane.b32.xlu0 %v2482_v54, %s4463_s7 }
 0x4ae   : > { %v2374_v60 = vpop.permute.xlu2 %2373  ;;  %v2360_v8 = vpop.permute.xlu1 %2359 }
 0x4af   : > { %2445 = vst.msk [vmem:[#allocation4 + $0xc8] sm:$0xff] %vm2419_vm14, %v2374_v60  ;;  %v2364_v7 = vpop.permute.xlu0 %2363 }
 0x4b0   : > { %2438 = vst.msk [vmem:[#allocation4 + $0x90] sm:$0xff] %vm2419_vm14, %v2360_v8 }
 0x4b1   : > { %2440 = vst.msk [vmem:[#allocation4 + $0xa0] sm:$0xff] %vm2419_vm14, %v2364_v7 }
 0x4b4   : > { %2578 = vrot.lane.b32.xlu1 %v2483_v9, %s4463_s7  ;;  %2574 = vrot.lane.b32.xlu2 %v2481_v58, %s4463_s7 }
 0x4b5   : > { %2711 = vrot.lane.b32.xlu0 %v5828_v28, %s4465_s9 }
 0x4b6   : > { %v2380_v21 = vpop.permute.xlu2 %2379  ;;  %v2366_v54 = vpop.permute.xlu1 %2365 }
 0x4b7   : > { %2448 = vst.msk [vmem:[#allocation4 + $0xe0] sm:$0xff] %vm2419_vm14, %v2380_v21  ;;  %v2370_v47 = vpop.permute.xlu0 %2369 }
 0x4b8   : > { %2441 = vst.msk [vmem:[#allocation4 + $0xa8] sm:$0xff] %vm2419_vm14, %v2366_v54 }
 0x4b9   : > { %2443 = vst.msk [vmem:[#allocation4 + $0xb8] sm:$0xff] %vm2419_vm14, %v2370_v47 }
 0x4bc   : > { %2713 = vrot.lane.b32.xlu1 %v5838_v31, %s4465_s9  ;;  %2709 = vrot.lane.b32.xlu2 %v5818_v34, %s4465_s9  ;;  %v2124_v47 = vpop.f32.mrf.mxu3 }
 0x4bd   : > { %2717 = vrot.lane.b32.xlu0 %v5858_v49, %s4465_s9  ;;  %v2125_v60 = vadd.f32 %v5809_v17, %v2124_v47 }
 0x4be   : > { %v2386_v8 = vpop.permute.xlu2 %2385  ;;  %v2372_v28 = vpop.permute.xlu1 %2371 }
 0x4bf   : > { %2451 = vst.msk [vmem:[#allocation4 + $0xf8] sm:$0xff] %vm2419_vm14, %v2386_v8  ;;  %v2376_v7 = vpop.permute.xlu0 %2375 }
 0x4c0   : > { %2444 = vst.msk [vmem:[#allocation4 + $0xc0] sm:$0xff] %vm2419_vm14, %v2372_v28 }
 0x4c1   : > { %2446 = vst.msk [vmem:[#allocation4 + $0xd0] sm:$0xff] %vm2419_vm14, %v2376_v7 }
 0x4c4   : > { %2719 = vrot.lane.b32.xlu1 %v5868_v45, %s4465_s9  ;;  %2715 = vrot.lane.b32.xlu2 %v5848_v61, %s4465_s9  ;;  %v2126_v58 = vpop.f32.mrf.mxu3 }
 0x4c5   : > { %2723 = vrot.lane.b32.xlu0 %v5894_v6, %s4465_s9 }
 0x4c6   : > { %v2378_v34 = vpop.permute.xlu1 %2377  ;;  %v2521_v31 = vpop.permute.xlu2 %2520 }
 0x4c7   : > { %2447 = vst.msk [vmem:[#allocation4 + $0xd8] sm:$0xff] %vm2419_vm14, %v2378_v34  ;;  %v2382_v49 = vpop.permute.xlu0 %2381 }
 0x4c8   : > { %2615 = vst.msk [vmem:[#allocation4 + $0x10] sm:$0xff] %vm2612_vm15, %v2521_v31 }
 0x4c9   : > { %2449 = vst.msk [vmem:[#allocation4 + $0xe8] sm:$0xff] %vm2419_vm14, %v2382_v49 }
 0x4cc   : > { %2725 = vrot.lane.b32.xlu1 %v5911_v18, %s4465_s9  ;;  %2721 = vrot.lane.b32.xlu2 %v5880_v41, %s4465_s9  ;;  %v2159_v41 = vmax.f32 %v2125_v60, 0.0 }
 0x4cd   : > { %2729 = vrot.lane.b32.xlu0 %v5946_v57, %s4465_s9 }
 0x4ce   : > { %v2384_v61 = vpop.permute.xlu1 %2383  ;;  %v2527_v45 = vpop.permute.xlu2 %2526  ;;  %2193 = vst.msk [vmem:[#allocation3 + $0x208] sm:$0xff] %vm2162_vm13, %v2159_v41  ;;  %v7080_v41 = vld [vmem:[#allocation6_spill] sm:$0xff] }
 0x4cf   : > { %2450 = vst.msk [vmem:[#allocation4 + $0xf0] sm:$0xff] %vm2419_vm14, %v2384_v61  ;;  %v2517_v6 = vpop.permute.xlu0 %2516 }
 0x4d0   : > { %2618 = vst.msk [vmem:[#allocation4 + $0x28] sm:$0xff] %vm2612_vm15, %v2527_v45 }
 0x4d1   : > { %2613 = vst.msk [vmem:[#allocation4] sm:$0xff] %vm2612_vm15, %v2517_v6 }
 0x4d4   : > { %2731 = vrot.lane.b32.xlu1 %v5964_v39, %s4465_s9  ;;  %2727 = vrot.lane.b32.xlu2 %v5929_v27, %s4465_s9  ;;  %v2127_v39 = vadd.f32 %v5809_v17, %v2126_v58 }
 0x4d5   : > { %2735 = vrot.lane.b32.xlu0 %v6001_v59, %s4465_s9  ;;  %v2675_v45 = vld [vmem:[#allocation3 + $0x207] sm:$0xff] }
 0x4d6   : > { %v2519_v18 = vpop.permute.xlu1 %2518  ;;  %v2533_v57 = vpop.permute.xlu2 %2532  ;;  %v2160_v27 = vmax.f32 %v2127_v39, 0.0  ;;  %v6438_v58 = vld [vmem:[#allocation3 + $0x208] sm:$0xff]  ;;  %v7083_v39 = vld [vmem:[#allocation7_spill] sm:$0xff] }
 0x4d7   : > { %2614 = vst.msk [vmem:[#allocation4 + $0x8] sm:$0xff] %vm2612_vm15, %v2519_v18  ;;  %v2523_v9 = vpop.permute.xlu0 %2522 }
 0x4d8   : > { %2621 = vst.msk [vmem:[#allocation4 + $0x40] sm:$0xff] %vm2612_vm15, %v2533_v57 }
 0x4d9   : > { %2616 = vst.msk [vmem:[#allocation4 + $0x18] sm:$0xff] %vm2612_vm15, %v2523_v9 }
 0x4da   : > { %2194 = vst.msk [vmem:[#allocation3 + $0x210] sm:$0xff] %vm2162_vm13, %v2160_v27  ;;  %v7084_v27 = vld [vmem:[#allocation12_spill] sm:$0xff] }
 0x4dc   : > { %2737 = vrot.lane.b32.xlu1 %v6013_v48, %s4465_s9  ;;  %2733 = vrot.lane.b32.xlu2 %v5980_v13, %s4465_s9 }
 0x4dd   : > { %2741 = vrot.lane.b32.xlu0 %v6049_v29, %s4465_s9 }
 0x4de   : > { %v2525_v59 = vpop.permute.xlu1 %2524  ;;  %v2539_v21 = vpop.permute.xlu2 %2538 }
 0x4df   : > { %2617 = vst.msk [vmem:[#allocation4 + $0x20] sm:$0xff] %vm2612_vm15, %v2525_v59  ;;  %v2529_v54 = vpop.permute.xlu0 %2528 }
 0x4e0   : > { %2624 = vst.msk [vmem:[#allocation4 + $0x58] sm:$0xff] %vm2612_vm15, %v2539_v21 }
 0x4e1   : > { %2619 = vst.msk [vmem:[#allocation4 + $0x30] sm:$0xff] %vm2612_vm15, %v2529_v54  ;;  %v2676_v61 = vld [vmem:[#allocation3 + $0x20f] sm:$0xff] }
 0x4e4   : > { %2743 = vrot.lane.b32.xlu1 %v6077_v52, %s4465_s9  ;;  %2739 = vrot.lane.b32.xlu2 %v6035_v5, %s4465_s9 }
 0x4e5   : > { %2747 = vrot.lane.b32.xlu0 %v5907_v15, %s4465_s9 }
 0x4e6   : > { %v2531_v17 = vpop.permute.xlu1 %2530  ;;  %v2545_v13 = vpop.permute.xlu2 %2544 }
 0x4e7   : > { %2620 = vst.msk [vmem:[#allocation4 + $0x38] sm:$0xff] %vm2612_vm15, %v2531_v17  ;;  %v2535_v48 = vpop.permute.xlu0 %2534  ;;  %v6449_v17 = vld [vmem:[#allocation3 + $0x210] sm:$0xff] }
 0x4e8   : > { %2627 = vst.msk [vmem:[#allocation4 + $0x70] sm:$0xff] %vm2612_vm15, %v2545_v13  ;;  %v7085_v13 = vld [vmem:[#allocation10_spill] sm:$0xff] }
 0x4e9   : > { %2622 = vst.msk [vmem:[#allocation4 + $0x48] sm:$0xff] %vm2612_vm15, %v2535_v48  ;;  %v7086_v48 = vld [vmem:[#allocation15_spill] sm:$0xff] }
 0x4ec   : > { %2749 = vrot.lane.b32.xlu1 %v5924_v24, %s4465_s9  ;;  %2745 = vrot.lane.b32.xlu2 %v5889_v2, %s4465_s9 }
 0x4ed   : > { %2753 = vrot.lane.b32.xlu0 %v5959_v37, %s4465_s9 }
 0x4ee   : > { %v2537_v5 = vpop.permute.xlu1 %2536  ;;  %v2551_v29 = vpop.permute.xlu2 %2550 }
 0x4ef   : > { %2623 = vst.msk [vmem:[#allocation4 + $0x50] sm:$0xff] %vm2612_vm15, %v2537_v5  ;;  %v2541_v52 = vpop.permute.xlu0 %2540 }
 0x4f0   : > { %2630 = vst.msk [vmem:[#allocation4 + $0x88] sm:$0xff] %vm2612_vm15, %v2551_v29 }
 0x4f1   : > { %2625 = vst.msk [vmem:[#allocation4 + $0x60] sm:$0xff] %vm2612_vm15, %v2541_v52 }
 0x4f4   : > { %2755 = vrot.lane.b32.xlu1 %v5976_v10, %s4465_s9  ;;  %2751 = vrot.lane.b32.xlu2 %v5942_v4, %s4465_s9 }
 0x4f5   : > { %2759 = vrot.lane.b32.xlu0 %v6009_v32, %s4465_s9 }
 0x4f6   : > { %v2543_v8 = vpop.permute.xlu1 %2542  ;;  %v2557_v28 = vpop.permute.xlu2 %2556 }
 0x4f7   : > { %2626 = vst.msk [vmem:[#allocation4 + $0x68] sm:$0xff] %vm2612_vm15, %v2543_v8  ;;  %v2547_v7 = vpop.permute.xlu0 %2546  ;;  %v7087_v8 = vld [vmem:[#allocation13_spill] sm:$0xff] }
 0x4f8   : > { %2633 = vst.msk [vmem:[#allocation4 + $0xa0] sm:$0xff] %vm2612_vm15, %v2557_v28  ;;  %v7088_v28 = vld [vmem:[#allocation11_spill] sm:$0xff] }
 0x4f9   : > { %2628 = vst.msk [vmem:[#allocation4 + $0x78] sm:$0xff] %vm2612_vm15, %v2547_v7  ;;  %v7089_v7 = vld [vmem:[#allocation18_spill] sm:$0xff] }
 0x4fc   : > { %2761 = vrot.lane.b32.xlu1 %v6025_v42, %s4465_s9  ;;  %2757 = vrot.lane.b32.xlu2 %v5991_v22, %s4465_s9 }
 0x4fd   : > { %2765 = vrot.lane.b32.xlu0 %v6062_v38, %s4465_s9 }
 0x4fe   : > { %v2549_v34 = vpop.permute.xlu1 %2548  ;;  %v2563_v31 = vpop.permute.xlu2 %2562 }
 0x4ff   : > { %2629 = vst.msk [vmem:[#allocation4 + $0x80] sm:$0xff] %vm2612_vm15, %v2549_v34  ;;  %v2553_v49 = vpop.permute.xlu0 %2552 }
 0x500   : > { %2636 = vst.msk [vmem:[#allocation4 + $0xb8] sm:$0xff] %vm2612_vm15, %v2563_v31 }
 0x501   : > { %2631 = vst.msk [vmem:[#allocation4 + $0x90] sm:$0xff] %vm2612_vm15, %v2553_v49 }
 0x504   : > { %2767 = vrot.lane.b32.xlu1 %v6085_v12, %s4465_s9  ;;  %2763 = vrot.lane.b32.xlu2 %v6043_v23, %s4465_s9 }
 0x505   : > { %2771 = vrot.lane.b32.xlu0 %v2676_v61, %s4465_s9  ;;  %v7090_v61 = vld [vmem:[#allocation16_spill] sm:$0xff] }
 0x506   : > { %v2555_v22 = vpop.permute.xlu1 %2554  ;;  %v2569_v42 = vpop.permute.xlu2 %2568 }
 0x507   : > { %2632 = vst.msk [vmem:[#allocation4 + $0x98] sm:$0xff] %vm2612_vm15, %v2555_v22  ;;  %v2559_v38 = vpop.permute.xlu0 %2558  ;;  %v7091_v22 = vld [vmem:[#allocation14_spill] sm:$0xff] }
 0x508   : > { %2639 = vst.msk [vmem:[#allocation4 + $0xd0] sm:$0xff] %vm2612_vm15, %v2569_v42  ;;  %v7092_v42 = vld [vmem:[#allocation21_spill] sm:$0xff] }
 0x509   : > { %2634 = vst.msk [vmem:[#allocation4 + $0xa8] sm:$0xff] %vm2612_vm15, %v2559_v38 }
 0x50c   : > { %2902 = vrot.lane.b32.xlu1 %v5816_v53, %s4467_s11  ;;  %2769 = vrot.lane.b32.xlu2 %v2675_v45, %s4465_s9 }
 0x50d   : > { %2906 = vrot.lane.b32.xlu0 %v5836_v30, %s4467_s11 }
 0x50e   : > { %v2561_v23 = vpop.permute.xlu1 %2560  ;;  %v2575_v12 = vpop.permute.xlu2 %2574 }
 0x50f   : > { %2635 = vst.msk [vmem:[#allocation4 + $0xb0] sm:$0xff] %vm2612_vm15, %v2561_v23  ;;  %v2565_v6 = vpop.permute.xlu0 %2564 }
 0x510   : > { %2642 = vst.msk [vmem:[#allocation4 + $0xe8] sm:$0xff] %vm2612_vm15, %v2575_v12  ;;  %v7093_v12 = vld [vmem:[#allocation19_spill] sm:$0xff] }
 0x511   : > { %2637 = vst.msk [vmem:[#allocation4 + $0xc0] sm:$0xff] %vm2612_vm15, %v2565_v6  ;;  %v7094_v6 = vld [vmem:[#allocation17_spill] sm:$0xff] }
 0x514   : > { %2908 = vrot.lane.b32.xlu1 %v5846_v1, %s4467_s11  ;;  %2904 = vrot.lane.b32.xlu2 %v5826_v35, %s4467_s11 }
 0x515   : > { %2912 = vrot.lane.b32.xlu0 %v5866_v43, %s4467_s11 }
 0x516   : > { %v2567_v53 = vpop.permute.xlu1 %2566  ;;  %v2710_v30 = vpop.permute.xlu2 %2709 }
 0x517   : > { %2638 = vst.msk [vmem:[#allocation4 + $0xc8] sm:$0xff] %vm2612_vm15, %v2567_v53  ;;  %v2571_v47 = vpop.permute.xlu0 %2570  ;;  %v7095_v53 = vld [vmem:[#allocation24_spill] sm:$0xff] }
 0x518   : > { %2806 = vst.msk [vmem:[#allocation4] sm:$0xff] %vm2805_vm0, %v2710_v30 }
 0x519   : > { %2640 = vst.msk [vmem:[#allocation4 + $0xd8] sm:$0xff] %vm2612_vm15, %v2571_v47 }
 0x51c   : > { %2914 = vrot.lane.b32.xlu1 %v5878_v36, %s4467_s11  ;;  %2910 = vrot.lane.b32.xlu2 %v5856_v55, %s4467_s11 }
 0x51d   : > { %2918 = vrot.lane.b32.xlu0 %v5909_v16, %s4467_s11 }
 0x51e   : > { %v2573_v35 = vpop.permute.xlu1 %2572  ;;  %v2716_v1 = vpop.permute.xlu2 %2715 }
 0x51f   : > { %2641 = vst.msk [vmem:[#allocation4 + $0xe0] sm:$0xff] %vm2612_vm15, %v2573_v35  ;;  %v2577_v43 = vpop.permute.xlu0 %2576 }
 0x520   : > { %2809 = vst.msk [vmem:[#allocation4 + $0x18] sm:$0xff] %vm2805_vm0, %v2716_v1  ;;  %v7096_v1 = vld [vmem:[#allocation22_spill] sm:$0xff] }
 0x521   : > { %2643 = vst.msk [vmem:[#allocation4 + $0xf0] sm:$0xff] %vm2612_vm15, %v2577_v43  ;;  %v7097_v43 = vld [vmem:[#allocation20_spill] sm:$0xff] }
 0x524   : > { %2920 = vrot.lane.b32.xlu1 %v5927_v26, %s4467_s11  ;;  %2916 = vrot.lane.b32.xlu2 %v5892_v3, %s4467_s11 }
 0x525   : > { %2924 = vrot.lane.b32.xlu0 %v5962_v51, %s4467_s11 }
 0x526   : > { %v2579_v55 = vpop.permute.xlu1 %2578  ;;  %v2722_v36 = vpop.permute.xlu2 %2721 }
 0x527   : > { %2644 = vst.msk [vmem:[#allocation4 + $0xf8] sm:$0xff] %vm2612_vm15, %v2579_v55  ;;  %v2712_v16 = vpop.permute.xlu0 %2711  ;;  %v7098_v55 = vld [vmem:[#allocation27_spill] sm:$0xff] }
 0x528   : > { %2812 = vst.msk [vmem:[#allocation4 + $0x30] sm:$0xff] %vm2805_vm0, %v2722_v36 }
 0x529   : > { %2807 = vst.msk [vmem:[#allocation4 + $0x8] sm:$0xff] %vm2805_vm0, %v2712_v16 }
 0x52c   : > { %2926 = vrot.lane.b32.xlu1 %v5978_v11, %s4467_s11  ;;  %2922 = vrot.lane.b32.xlu2 %v5944_v56, %s4467_s11 }
 0x52d   : > { %2930 = vrot.lane.b32.xlu0 %v6011_v50, %s4467_s11 }
 0x52e   : > { %v2714_v3 = vpop.permute.xlu1 %2713  ;;  %v2728_v26 = vpop.permute.xlu2 %2727 }
 0x52f   : > { %2808 = vst.msk [vmem:[#allocation4 + $0x10] sm:$0xff] %vm2805_vm0, %v2714_v3  ;;  %v2718_v51 = vpop.permute.xlu0 %2717 }
 0x530   : > { %2815 = vst.msk [vmem:[#allocation4 + $0x48] sm:$0xff] %vm2805_vm0, %v2728_v26  ;;  %v7099_v26 = vld [vmem:[#allocation25_spill] sm:$0xff] }
 0x531   : > { %2810 = vst.msk [vmem:[#allocation4 + $0x20] sm:$0xff] %vm2805_vm0, %v2718_v51  ;;  %v7100_v51 = vld [vmem:[#allocation23_spill] sm:$0xff] }
 0x534   : > { %2932 = vrot.lane.b32.xlu1 %v6028_v0, %s4467_s11  ;;  %2928 = vrot.lane.b32.xlu2 %v5994_v46, %s4467_s11 }
 0x535   : > { %2936 = vrot.lane.b32.xlu0 %v6065_v33, %s4467_s11 }
 0x536   : > { %v2720_v56 = vpop.permute.xlu1 %2719  ;;  %v2734_v11 = vpop.permute.xlu2 %2733 }
 0x537   : > { %2811 = vst.msk [vmem:[#allocation4 + $0x28] sm:$0xff] %vm2805_vm0, %v2720_v56  ;;  %v2724_v50 = vpop.permute.xlu0 %2723  ;;  %v7101_v56 = vld [vmem:[#allocation30_spill] sm:$0xff] }
 0x538   : > { %2818 = vst.msk [vmem:[#allocation4 + $0x60] sm:$0xff] %vm2805_vm0, %v2734_v11 }
 0x539   : > { %2813 = vst.msk [vmem:[#allocation4 + $0x38] sm:$0xff] %vm2805_vm0, %v2724_v50 }
 0x53c   : > { %2938 = vrot.lane.b32.xlu1 %v6047_v62, %s4467_s11  ;;  %2934 = vrot.lane.b32.xlu2 %v6045_v25, %s4467_s11 }
 0x53d   : > { %2942 = vrot.lane.b32.xlu0 %v6087_v14, %s4467_s11 }
 0x53e   : > { %v2726_v46 = vpop.permute.xlu1 %2725  ;;  %v2740_v0 = vpop.permute.xlu2 %2739 }
 0x53f   : > { %2814 = vst.msk [vmem:[#allocation4 + $0x40] sm:$0xff] %vm2805_vm0, %v2726_v46  ;;  %v2730_v33 = vpop.permute.xlu0 %2729 }
 0x540   : > { %2821 = vst.msk [vmem:[#allocation4 + $0x78] sm:$0xff] %vm2805_vm0, %v2740_v0  ;;  %v7102_v0 = vld [vmem:[#allocation28_spill] sm:$0xff] }
 0x541   : > { %2816 = vst.msk [vmem:[#allocation4 + $0x50] sm:$0xff] %vm2805_vm0, %v2730_v33  ;;  %v7103_v33 = vld [vmem:[#allocation26_spill] sm:$0xff] }
 0x544   : > { %2944 = vrot.lane.b32.xlu1 %v6075_v63, %s4467_s11  ;;  %2940 = vrot.lane.b32.xlu2 %v6067_v44, %s4467_s11  ;;  %v7079_v44 = vld [vmem:[#allocation8_spill] sm:$0xff] }
 0x545   : > { %2948 = vrot.lane.b32.xlu0 %v6102_v40, %s4467_s11 }
 0x546   : > { %v2732_v25 = vpop.permute.xlu1 %2731  ;;  %v2746_v62 = vpop.permute.xlu2 %2745 }
 0x547   : > { %2817 = vst.msk [vmem:[#allocation4 + $0x58] sm:$0xff] %vm2805_vm0, %v2732_v25  ;;  %v2736_v14 = vpop.permute.xlu0 %2735  ;;  %v7104_v25 = vld [vmem:[#allocation33_spill] sm:$0xff] }
 0x548   : > { %2824 = vst.msk [vmem:[#allocation4 + $0x90] sm:$0xff] %vm2805_vm0, %v2746_v62 }
 0x549   : > { %2819 = vst.msk [vmem:[#allocation4 + $0x68] sm:$0xff] %vm2805_vm0, %v2736_v14 }
 0x54c   : > { %2950 = vrot.lane.b32.xlu1 %v6097_v20, %s4467_s11  ;;  %2946 = vrot.lane.b32.xlu2 %v6089_v19, %s4467_s11  ;;  %v7081_v20 = vld [vmem:[#allocation5_spill] sm:$0xff] }
 0x54d   : > { %2954 = vrot.lane.b32.xlu0 %v7079_v44, %s4467_s11  ;;  %v7082_v19 = vld [vmem:[#allocation9_spill] sm:$0xff] }
 0x54e   : > { %v2738_v63 = vpop.permute.xlu1 %2737  ;;  %v2752_v40 = vpop.permute.xlu2 %2751 }
 0x54f   : > { %2820 = vst.msk [vmem:[#allocation4 + $0x70] sm:$0xff] %vm2805_vm0, %v2738_v63  ;;  %v2742_v60 = vpop.permute.xlu0 %2741  ;;  %v7105_v63 = vld [vmem:[#allocation31_spill] sm:$0xff] }
 0x550   : > { %2827 = vst.msk [vmem:[#allocation4 + $0xa8] sm:$0xff] %vm2805_vm0, %v2752_v40  ;;  %v7106_v40 = vld [vmem:[#allocation29_spill] sm:$0xff] }
 0x551   : > { %2822 = vst.msk [vmem:[#allocation4 + $0x80] sm:$0xff] %vm2805_vm0, %v2742_v60  ;;  %v7107_v60 = vld [vmem:[#allocation35_spill] sm:$0xff] }
 0x554   : > { %2956 = vrot.lane.b32.xlu1 %v7080_v41, %s4467_s11  ;;  %2952 = vrot.lane.b32.xlu2 %v7081_v20, %s4467_s11 }
 0x555   : > { %2960 = vrot.lane.b32.xlu0 %v7082_v19, %s4467_s11 }
 0x556   : > { %v2744_v18 = vpop.permute.xlu1 %2743  ;;  %v2758_v57 = vpop.permute.xlu2 %2757 }
 0x557   : > { %2823 = vst.msk [vmem:[#allocation4 + $0x88] sm:$0xff] %vm2805_vm0, %v2744_v18  ;;  %v2748_v9 = vpop.permute.xlu0 %2747  ;;  %v7108_v18 = vld [vmem:[#allocation34_spill] sm:$0xff] }
 0x558   : > { %2830 = vst.msk [vmem:[#allocation4 + $0xc0] sm:$0xff] %vm2805_vm0, %v2758_v57  ;;  %v7109_v57 = vld [vmem:[#allocation32_spill] sm:$0xff] }
 0x559   : > { %2825 = vst.msk [vmem:[#allocation4 + $0x98] sm:$0xff] %vm2805_vm0, %v2748_v9 }
 0x55c   : > { %2962 = vrot.lane.b32.xlu1 %v6438_v58, %s4467_s11  ;;  %2958 = vrot.lane.b32.xlu2 %v7083_v39, %s4467_s11 }
 0x55d   : > { %3095 = vrot.lane.b32.xlu0 %v7084_v27, %s4468_s21 }
 0x55e   : > { %v2750_v59 = vpop.permute.xlu1 %2749  ;;  %v2764_v21 = vpop.permute.xlu2 %2763 }
 0x55f   : > { %2826 = vst.msk [vmem:[#allocation4 + $0xa0] sm:$0xff] %vm2805_vm0, %v2750_v59  ;;  %v2754_v54 = vpop.permute.xlu0 %2753  ;;  %v3434_v59 = vld [vmem:[#allocation3 + $0x148] sm:$0xff] }
 0x560   : > { %2833 = vst.msk [vmem:[#allocation4 + $0xd8] sm:$0xff] %vm2805_vm0, %v2764_v21 }
 0x561   : > { %2828 = vst.msk [vmem:[#allocation4 + $0xb0] sm:$0xff] %vm2805_vm0, %v2754_v54 }
 0x564   : > { %3097 = vrot.lane.b32.xlu1 %v7085_v13, %s4468_s21  ;;  %2964 = vrot.lane.b32.xlu2 %v6449_v17, %s4467_s11  ;;  %v3435_v13 = vld [vmem:[#allocation3 + $0x150] sm:$0xff] }
 0x565   : > { %3101 = vrot.lane.b32.xlu0 %v7086_v48, %s4468_s21 }
 0x566   : > { %v2756_v5 = vpop.permute.xlu1 %2755  ;;  %v2770_v29 = vpop.permute.xlu2 %2769 }
 0x567   : > { %2829 = vst.msk [vmem:[#allocation4 + $0xb8] sm:$0xff] %vm2805_vm0, %v2756_v5  ;;  %v2760_v52 = vpop.permute.xlu0 %2759 }
 0x568   : > { %2836 = vst.msk [vmem:[#allocation4 + $0xf0] sm:$0xff] %vm2805_vm0, %v2770_v29 }
 0x569   : > { %2831 = vst.msk [vmem:[#allocation4 + $0xc8] sm:$0xff] %vm2805_vm0, %v2760_v52  ;;  %v3418_v52 = vld [vmem:[#allocation3 + $0x48] sm:$0xff] }
 0x56c   : > { %3103 = vrot.lane.b32.xlu1 %v7087_v8, %s4468_s21  ;;  %3099 = vrot.lane.b32.xlu2 %v7088_v28, %s4468_s21  ;;  %v3225_v8 = vld [vmem:[#allocation3 + $0x47] sm:$0xff] }
 0x56d   : > { %3107 = vrot.lane.b32.xlu0 %v7089_v7, %s4468_s21  ;;  %v3611_v28 = vld [vmem:[#allocation3 + $0x49] sm:$0xff] }
 0x56e   : > { %v2762_v34 = vpop.permute.xlu1 %2761  ;;  %v2905_v31 = vpop.permute.xlu2 %2904 }
 0x56f   : > { %2832 = vst.msk [vmem:[#allocation4 + $0xd0] sm:$0xff] %vm2805_vm0, %v2762_v34  ;;  %v2766_v49 = vpop.permute.xlu0 %2765 }
 0x570   : > { %3000 = vst.msk [vmem:[#allocation4 + $0x8] sm:$0xff] %vm2998_vm1, %v2905_v31 }
 0x571   : > { %2834 = vst.msk [vmem:[#allocation4 + $0xe0] sm:$0xff] %vm2805_vm0, %v2766_v49  ;;  %v3612_v49 = vld [vmem:[#allocation3 + $0x51] sm:$0xff] }
 0x574   : > { %3109 = vrot.lane.b32.xlu1 %v7090_v61, %s4468_s21  ;;  %3105 = vrot.lane.b32.xlu2 %v7091_v22, %s4468_s21  ;;  %v3419_v61 = vld [vmem:[#allocation3 + $0x50] sm:$0xff] }
 0x575   : > { %3113 = vrot.lane.b32.xlu0 %v7092_v42, %s4468_s21 }
 0x576   : > { %v2768_v38 = vpop.permute.xlu1 %2767  ;;  %v2911_v45 = vpop.permute.xlu2 %2910 }
 0x577   : > { %2835 = vst.msk [vmem:[#allocation4 + $0xe8] sm:$0xff] %vm2805_vm0, %v2768_v38  ;;  %v2772_v23 = vpop.permute.xlu0 %2771 }
 0x578   : > { %3003 = vst.msk [vmem:[#allocation4 + $0x20] sm:$0xff] %vm2998_vm1, %v2911_v45  ;;  %v3436_v45 = vld [vmem:[#allocation3 + $0x168] sm:$0xff] }
 0x579   : > { %2837 = vst.msk [vmem:[#allocation4 + $0xf8] sm:$0xff] %vm2805_vm0, %v2772_v23 }
 0x57c   : > { %3115 = vrot.lane.b32.xlu1 %v7093_v12, %s4468_s21  ;;  %3111 = vrot.lane.b32.xlu2 %v7094_v6, %s4468_s21  ;;  %v3437_v6 = vld [vmem:[#allocation3 + $0x170] sm:$0xff] }
 0x57d   : > { %3119 = vrot.lane.b32.xlu0 %v7095_v53, %s4468_s21  ;;  %v3228_v53 = vld [vmem:[#allocation3 + $0x6f] sm:$0xff] }
 0x57e   : > { %v2903_v30 = vpop.permute.xlu1 %2902  ;;  %v2917_v47 = vpop.permute.xlu2 %2916 }
 0x57f   : > { %2999 = vst.msk [vmem:[#allocation4] sm:$0xff] %vm2998_vm1, %v2903_v30  ;;  %v2907_v35 = vpop.permute.xlu0 %2906 }
 0x580   : > { %3006 = vst.msk [vmem:[#allocation4 + $0x38] sm:$0xff] %vm2998_vm1, %v2917_v47 }
 0x581   : > { %3001 = vst.msk [vmem:[#allocation4 + $0x10] sm:$0xff] %vm2998_vm1, %v2907_v35  ;;  %v3420_v35 = vld [vmem:[#allocation3 + $0x68] sm:$0xff] }
 0x584   : > { %3121 = vrot.lane.b32.xlu1 %v7096_v1, %s4468_s21  ;;  %3117 = vrot.lane.b32.xlu2 %v7097_v43, %s4468_s21  ;;  %v3227_v1 = vld [vmem:[#allocation3 + $0x67] sm:$0xff] }
 0x585   : > { %3125 = vrot.lane.b32.xlu0 %v7098_v55, %s4468_s21  ;;  %v3613_v43 = vld [vmem:[#allocation3 + $0x69] sm:$0xff] }
 0x586   : > { %v2909_v36 = vpop.permute.xlu1 %2908  ;;  %v2923_v16 = vpop.permute.xlu2 %2922 }
 0x587   : > { %3002 = vst.msk [vmem:[#allocation4 + $0x18] sm:$0xff] %vm2998_vm1, %v2909_v36  ;;  %v2913_v3 = vpop.permute.xlu0 %2912 }
 0x588   : > { %3009 = vst.msk [vmem:[#allocation4 + $0x50] sm:$0xff] %vm2998_vm1, %v2923_v16 }
 0x589   : > { %3004 = vst.msk [vmem:[#allocation4 + $0x28] sm:$0xff] %vm2998_vm1, %v2913_v3  ;;  %v3614_v3 = vld [vmem:[#allocation3 + $0x71] sm:$0xff] }
 0x58c   : > { %3127 = vrot.lane.b32.xlu1 %v7099_v26, %s4468_s21  ;;  %3123 = vrot.lane.b32.xlu2 %v7100_v51, %s4468_s21  ;;  %v3421_v26 = vld [vmem:[#allocation3 + $0x70] sm:$0xff] }
 0x58d   : > { %3131 = vrot.lane.b32.xlu0 %v7101_v56, %s4468_s21 }
 0x58e   : > { %v2915_v11 = vpop.permute.xlu1 %2914  ;;  %v2929_v50 = vpop.permute.xlu2 %2928 }
 0x58f   : > { %3005 = vst.msk [vmem:[#allocation4 + $0x30] sm:$0xff] %vm2998_vm1, %v2915_v11  ;;  %v2919_v46 = vpop.permute.xlu0 %2918 }
 0x590   : > { %3012 = vst.msk [vmem:[#allocation4 + $0x68] sm:$0xff] %vm2998_vm1, %v2929_v50  ;;  %v3438_v50 = vld [vmem:[#allocation3 + $0x188] sm:$0xff] }
 0x591   : > { %3007 = vst.msk [vmem:[#allocation4 + $0x40] sm:$0xff] %vm2998_vm1, %v2919_v46  ;;  %v3631_v46 = vld [vmem:[#allocation3 + $0x189] sm:$0xff] }
 0x594   : > { %3133 = vrot.lane.b32.xlu1 %v7102_v0, %s4468_s21  ;;  %3129 = vrot.lane.b32.xlu2 %v7103_v33, %s4468_s21 }
 0x595   : > { %3137 = vrot.lane.b32.xlu0 %v7104_v25, %s4468_s21 }
 0x596   : > { %v2921_v62 = vpop.permute.xlu1 %2920  ;;  %v2935_v14 = vpop.permute.xlu2 %2934 }
 0x597   : > { %3008 = vst.msk [vmem:[#allocation4 + $0x48] sm:$0xff] %vm2998_vm1, %v2921_v62  ;;  %v2925_v44 = vpop.permute.xlu0 %2924  ;;  %v3439_v62 = vld [vmem:[#allocation3 + $0x190] sm:$0xff] }
 0x598   : > { %3015 = vst.msk [vmem:[#allocation4 + $0x80] sm:$0xff] %vm2998_vm1, %v2935_v14  ;;  %v3230_v14 = vld [vmem:[#allocation3 + $0x8f] sm:$0xff] }
 0x599   : > { %3010 = vst.msk [vmem:[#allocation4 + $0x58] sm:$0xff] %vm2998_vm1, %v2925_v44 }
 0x59c   : > { %3139 = vrot.lane.b32.xlu1 %v7105_v63, %s4468_s21  ;;  %3135 = vrot.lane.b32.xlu2 %v7106_v40, %s4468_s21 }
 0x59d   : > { %3143 = vrot.lane.b32.xlu0 %v7107_v60, %s4468_s21  ;;  %v3422_v60 = vld [vmem:[#allocation3 + $0x88] sm:$0xff] }
 0x59e   : > { %v2927_v41 = vpop.permute.xlu1 %2926  ;;  %v2941_v20 = vpop.permute.xlu2 %2940 }
 0x59f   : > { %3011 = vst.msk [vmem:[#allocation4 + $0x60] sm:$0xff] %vm2998_vm1, %v2927_v41  ;;  %v2931_v19 = vpop.permute.xlu0 %2930  ;;  %v3229_v41 = vld [vmem:[#allocation3 + $0x87] sm:$0xff] }
 0x5a0   : > { %3018 = vst.msk [vmem:[#allocation4 + $0x98] sm:$0xff] %vm2998_vm1, %v2941_v20 }
 0x5a1   : > { %3013 = vst.msk [vmem:[#allocation4 + $0x70] sm:$0xff] %vm2998_vm1, %v2931_v19  ;;  %v3615_v19 = vld [vmem:[#allocation3 + $0x89] sm:$0xff] }
 0x5a4   : > { %3145 = vrot.lane.b32.xlu1 %v7108_v18, %s4468_s21  ;;  %3141 = vrot.lane.b32.xlu2 %v7109_v57, %s4468_s21 }
 0x5a5   : > { %3323 = vrot.lane.b32.xlu0 %v5907_v15, %s4469_s22 }
 0x5a6   : > { %v2933_v9 = vpop.permute.xlu1 %2932  ;;  %v2947_v39 = vpop.permute.xlu2 %2946 }
 0x5a7   : > { %3014 = vst.msk [vmem:[#allocation4 + $0x78] sm:$0xff] %vm2998_vm1, %v2933_v9  ;;  %v2937_v27 = vpop.permute.xlu0 %2936 }
 0x5a8   : > { %3021 = vst.msk [vmem:[#allocation4 + $0xb0] sm:$0xff] %vm2998_vm1, %v2947_v39 }
 0x5a9   : > { %3016 = vst.msk [vmem:[#allocation4 + $0x88] sm:$0xff] %vm2998_vm1, %v2937_v27 }
 0x5ac   : > { %3514 = vrot.lane.b32.xlu1 %v3434_v59, %s4470_s23  ;;  %3321 = vrot.lane.b32.xlu2 %v5889_v2, %s4469_s22  ;;  %v3226_v2 = vld [vmem:[#allocation3 + $0x4f] sm:$0xff]  ;;  %v4418_v59 = vld [vmem:[%s6923_s3 + $0x18] sm:$0xff] }
 0x5ad   : > { %3707 = vrot.lane.b32.xlu0 %v7101_v56, %s4471_s24 }
 0x5ae   : > { %v2939_v15 = vpop.permute.xlu1 %2938  ;;  %v2953_v21 = vpop.permute.xlu2 %2952 }
 0x5af   : > { %3017 = vst.msk [vmem:[#allocation4 + $0x90] sm:$0xff] %vm2998_vm1, %v2939_v15  ;;  %v2943_v54 = vpop.permute.xlu0 %2942  ;;  %v3616_v15 = vld [vmem:[#allocation3 + $0x91] sm:$0xff] }
 0x5b0   : > { %3024 = vst.msk [vmem:[#allocation4 + $0xc8] sm:$0xff] %vm2998_vm1, %v2953_v21  ;;  %v3423_v21 = vld [vmem:[#allocation3 + $0x90] sm:$0xff] }
 0x5b1   : > { %3019 = vst.msk [vmem:[#allocation4 + $0xa0] sm:$0xff] %vm2998_vm1, %v2943_v54  ;;  %v4417_v54 = vld [vmem:[%s6923_s3 + $0x10] sm:$0xff] }
 0x5b4   : > { %3709 = vrot.lane.b32.xlu1 %v7102_v0, %s4471_s24  ;;  %3516 = vrot.lane.b32.xlu2 %v3435_v13, %s4470_s23 }
 0x5b5   : > { %3291 = vrot.lane.b32.xlu0 %v3226_v2, %s4469_s22 }
 0x5b6   : > { %v2945_v48 = vpop.permute.xlu1 %2944  ;;  %v2959_v5 = vpop.permute.xlu2 %2958 }
 0x5b7   : > { %3020 = vst.msk [vmem:[#allocation4 + $0xa8] sm:$0xff] %vm2998_vm1, %v2945_v48  ;;  %v2949_v29 = vpop.permute.xlu0 %2948 }
 0x5b8   : > { %3027 = vst.msk [vmem:[#allocation4 + $0xe0] sm:$0xff] %vm2998_vm1, %v2959_v5  ;;  %v3440_v5 = vld [vmem:[#allocation3 + $0x1a8] sm:$0xff] }
 0x5b9   : > { %3022 = vst.msk [vmem:[#allocation4 + $0xb8] sm:$0xff] %vm2998_vm1, %v2949_v29  ;;  %v3247_v29 = vld [vmem:[#allocation3 + $0x1a7] sm:$0xff] }
 0x5bc   : > { %3482 = vrot.lane.b32.xlu1 %v3418_v52, %s4470_s23  ;;  %3289 = vrot.lane.b32.xlu2 %v3225_v8, %s4469_s22  ;;  %v3633_v52 = vld [vmem:[#allocation3 + $0x1a9] sm:$0xff]  ;;  %v4415_v8 = vld [vmem:[%s6923_s3] sm:$0xff] }
 0x5bd   : > { %3675 = vrot.lane.b32.xlu0 %v3611_v28, %s4471_s24 }
 0x5be   : > { %v2951_v7 = vpop.permute.xlu1 %2950  ;;  %v2965_v34 = vpop.permute.xlu2 %2964 }
 0x5bf   : > { %3023 = vst.msk [vmem:[#allocation4 + $0xc0] sm:$0xff] %vm2998_vm1, %v2951_v7  ;;  %v2955_v31 = vpop.permute.xlu0 %2954 }
 0x5c0   : > { %3030 = vst.msk [vmem:[#allocation4 + $0xf8] sm:$0xff] %vm2998_vm1, %v2965_v34 }
 0x5c1   : > { %3025 = vst.msk [vmem:[#allocation4 + $0xd0] sm:$0xff] %vm2998_vm1, %v2955_v31  ;;  %v3634_v31 = vld [vmem:[#allocation3 + $0x1b1] sm:$0xff] }
 0x5c4   : > { %3677 = vrot.lane.b32.xlu1 %v3612_v49, %s4471_s24  ;;  %3484 = vrot.lane.b32.xlu2 %v3419_v61, %s4470_s23  ;;  %v3441_v49 = vld [vmem:[#allocation3 + $0x1b0] sm:$0xff] }
 0x5c5   : > { %3327 = vrot.lane.b32.xlu0 %v5942_v4, %s4469_s22  ;;  %v3232_v61 = vld [vmem:[#allocation3 + $0xaf] sm:$0xff] }
 0x5c6   : > { %v2957_v22 = vpop.permute.xlu1 %2956  ;;  %v3100_v42 = vpop.permute.xlu2 %3099 }
 0x5c7   : > { %3026 = vst.msk [vmem:[#allocation4 + $0xd8] sm:$0xff] %vm2998_vm1, %v2957_v22  ;;  %v2961_v38 = vpop.permute.xlu0 %2960 }
 0x5c8   : > { %3194 = vst.msk [vmem:[#allocation4 + $0x10] sm:$0xff] %vm3191_vm2, %v3100_v42 }
 0x5c9   : > { %3028 = vst.msk [vmem:[#allocation4 + $0xe8] sm:$0xff] %vm2998_vm1, %v2961_v38 }
 0x5cc   : > { %3518 = vrot.lane.b32.xlu1 %v3436_v45, %s4470_s23  ;;  %3325 = vrot.lane.b32.xlu2 %v5924_v24, %s4469_s22  ;;  %v3424_v45 = vld [vmem:[#allocation3 + $0xa8] sm:$0xff] }
 0x5cd   : > { %3711 = vrot.lane.b32.xlu0 %v7106_v40, %s4471_s24  ;;  %v3860_v40 = vld [vmem:[%s6923_s3 + $0x20] sm:$0xf] }
 0x5ce   : > { %v2963_v4 = vpop.permute.xlu1 %2962  ;;  %v3106_v23 = vpop.permute.xlu2 %3105  ;;  %v3882_v20 = vunpack.c.l.b16 %v3860_v40 }
 0x5cf   : > { %3029 = vst.msk [vmem:[#allocation4 + $0xf0] sm:$0xff] %vm2998_vm1, %v2963_v4  ;;  %v3096_v12 = vpop.permute.xlu0 %3095  ;;  %v3231_v4 = vld [vmem:[#allocation3 + $0xa7] sm:$0xff] }
 0x5d0   : > { %3197 = vst.msk [vmem:[#allocation4 + $0x28] sm:$0xff] %vm3191_vm2, %v3106_v23  ;;  %v3887_v18 = vpack.c.b16 %v3882_v20, %v3882_v20  ;;  %v3617_v23 = vld [vmem:[#allocation3 + $0xa9] sm:$0xff] }
 0x5d1   : > { %3192 = vst.msk [vmem:[#allocation4] sm:$0xff] %vm3191_vm2, %v3096_v12 }
 0x5d2   : > { %v3943_v27 = vsel %vm3941_vm3, %v3887_v18, 0  ;;  %v3620_v18 = vld [vmem:[#allocation3 + $0xd1] sm:$0xff] }
 0x5d3   : > { %4422 = vmatpush.bf16.msra.mxu2 %v3943_v27  ;;  %3948 = vmatpush.bf16.msra.mxu1 %v3943_v27 }
 0x5d4   : > { %3713 = vrot.lane.b32.xlu1 %v7104_v25, %s4471_s24  ;;  %3520 = vrot.lane.b32.xlu2 %v3437_v6, %s4470_s23  ;;  %v3632_v25 = vld [vmem:[#allocation3 + $0x191] sm:$0xff] }
 0x5d5   : > { %3295 = vrot.lane.b32.xlu0 %v3228_v53, %s4469_s22 }
 0x5d6   : > { %v3098_v24 = vpop.permute.xlu1 %3097  ;;  %v3112_v30 = vpop.permute.xlu2 %3111 }
 0x5d7   : > { %3193 = vst.msk [vmem:[#allocation4 + $0x8] sm:$0xff] %vm3191_vm2, %v3098_v24  ;;  %v3102_v47 = vpop.permute.xlu0 %3101  ;;  %4423 = vmatpush.bf16.msra.mxu2 %v4418_v59  ;;  %3949 = vmatpush.bf16.msra.mxu1 %v4418_v59  ;;  %v3618_v24 = vld [vmem:[#allocation3 + $0xb1] sm:$0xff]  ;;  %v3251_v59 = vld [vmem:[#allocation3 + $0x1e7] sm:$0xff] }
 0x5d8   : > { %3200 = vst.msk [vmem:[#allocation4 + $0x40] sm:$0xff] %vm3191_vm2, %v3112_v30  ;;  %v3425_v30 = vld [vmem:[#allocation3 + $0xb0] sm:$0xff] }
 0x5d9   : > { %3195 = vst.msk [vmem:[#allocation4 + $0x18] sm:$0xff] %vm3191_vm2, %v3102_v47  ;;  %v3250_v47 = vld [vmem:[#allocation3 + $0x1cf] sm:$0xff] }
 0x5db   : > { %4424 = vmatpush.bf16.msra.mxu2 %v4417_v54  ;;  %3950 = vmatpush.bf16.msra.mxu1 %v4417_v54 }
 0x5dc   : > { %3486 = vrot.lane.b32.xlu1 %v3420_v35, %s4470_s23  ;;  %3293 = vrot.lane.b32.xlu2 %v3227_v1, %s4469_s22 }
 0x5dd   : > { %3679 = vrot.lane.b32.xlu0 %v3613_v43, %s4471_s24 }
 0x5de   : > { %v3104_v55 = vpop.permute.xlu1 %3103  ;;  %v3118_v36 = vpop.permute.xlu2 %3117 }
 0x5df   : > { %3196 = vst.msk [vmem:[#allocation4 + $0x20] sm:$0xff] %vm3191_vm2, %v3104_v55  ;;  %v3108_v16 = vpop.permute.xlu0 %3107  ;;  %v3442_v55 = vld [vmem:[#allocation3 + $0x1c8] sm:$0xff] }
 0x5e0   : > { %3203 = vst.msk [vmem:[#allocation4 + $0x58] sm:$0xff] %vm3191_vm2, %v3118_v36  ;;  %v3249_v36 = vld [vmem:[#allocation3 + $0x1c7] sm:$0xff] }
 0x5e1   : > { %3198 = vst.msk [vmem:[#allocation4 + $0x30] sm:$0xff] %vm3191_vm2, %v3108_v16  ;;  %v3635_v16 = vld [vmem:[#allocation3 + $0x1c9] sm:$0xff] }
 0x5e4   : > { %3681 = vrot.lane.b32.xlu1 %v3614_v3, %s4471_s24  ;;  %3488 = vrot.lane.b32.xlu2 %v3421_v26, %s4470_s23 }
 0x5e5   : > { %3331 = vrot.lane.b32.xlu0 %v5976_v10, %s4469_s22 }
 0x5e6   : > { %v3110_v51 = vpop.permute.xlu1 %3109  ;;  %v3124_v56 = vpop.permute.xlu2 %3123 }
 0x5e7   : > { %3199 = vst.msk [vmem:[#allocation4 + $0x38] sm:$0xff] %vm3191_vm2, %v3110_v51  ;;  %v3114_v11 = vpop.permute.xlu0 %3113 }
 0x5e8   : > { %3206 = vst.msk [vmem:[#allocation4 + $0x70] sm:$0xff] %vm3191_vm2, %v3124_v56 }
 0x5e9   : > { %3201 = vst.msk [vmem:[#allocation4 + $0x48] sm:$0xff] %vm3191_vm2, %v3114_v11 }
 0x5ec   : > { %3522 = vrot.lane.b32.xlu1 %v3438_v50, %s4470_s23  ;;  %3329 = vrot.lane.b32.xlu2 %v5959_v37, %s4469_s22 }
 0x5ed   : > { %3715 = vrot.lane.b32.xlu0 %v3631_v46, %s4471_s24  ;;  %v3636_v46 = vld [vmem:[#allocation3 + $0x1d1] sm:$0xff] }
 0x5ee   : > { %v3116_v0 = vpop.permute.xlu1 %3115  ;;  %v3130_v10 = vpop.permute.xlu2 %3129 }
 0x5ef   : > { %3202 = vst.msk [vmem:[#allocation4 + $0x50] sm:$0xff] %vm3191_vm2, %v3116_v0  ;;  %v3120_v33 = vpop.permute.xlu0 %3119  ;;  %v3443_v0 = vld [vmem:[#allocation3 + $0x1d0] sm:$0xff] }
 0x5f0   : > { %3209 = vst.msk [vmem:[#allocation4 + $0x88] sm:$0xff] %vm3191_vm2, %v3130_v10  ;;  %v3234_v10 = vld [vmem:[#allocation3 + $0xcf] sm:$0xff] }
 0x5f1   : > { %3204 = vst.msk [vmem:[#allocation4 + $0x60] sm:$0xff] %vm3191_vm2, %v3120_v33 }
 0x5f4   : > { %3717 = vrot.lane.b32.xlu1 %v3632_v25, %s4471_s24  ;;  %3524 = vrot.lane.b32.xlu2 %v3439_v62, %s4470_s23 }
 0x5f5   : > { %3299 = vrot.lane.b32.xlu0 %v3230_v14, %s4469_s22  ;;  %v3426_v14 = vld [vmem:[#allocation3 + $0xc8] sm:$0xff] }
 0x5f6   : > { %v3122_v37 = vpop.permute.xlu1 %3121  ;;  %v3136_v44 = vpop.permute.xlu2 %3135 }
 0x5f7   : > { %3205 = vst.msk [vmem:[#allocation4 + $0x68] sm:$0xff] %vm3191_vm2, %v3122_v37  ;;  %v3126_v63 = vpop.permute.xlu0 %3125  ;;  %v3233_v37 = vld [vmem:[#allocation3 + $0xc7] sm:$0xff] }
 0x5f8   : > { %3212 = vst.msk [vmem:[#allocation4 + $0xa0] sm:$0xff] %vm3191_vm2, %v3136_v44  ;;  %v3619_v44 = vld [vmem:[#allocation3 + $0xc9] sm:$0xff] }
 0x5f9   : > { %3207 = vst.msk [vmem:[#allocation4 + $0x78] sm:$0xff] %vm3191_vm2, %v3126_v63 }
 0x5fc   : > { %3490 = vrot.lane.b32.xlu1 %v3422_v60, %s4470_s23  ;;  %3297 = vrot.lane.b32.xlu2 %v3229_v41, %s4469_s22 }
 0x5fd   : > { %3683 = vrot.lane.b32.xlu0 %v3615_v19, %s4471_s24 }
 0x5fe   : > { %v3128_v57 = vpop.permute.xlu1 %3127  ;;  %v3142_v9 = vpop.permute.xlu2 %3141 }
 0x5ff   : > { %3208 = vst.msk [vmem:[#allocation4 + $0x80] sm:$0xff] %vm3191_vm2, %v3128_v57  ;;  %v3132_v39 = vpop.permute.xlu0 %3131  ;;  %v3427_v57 = vld [vmem:[#allocation3 + $0xd0] sm:$0xff] }
 0x600   : > { %3215 = vst.msk [vmem:[#allocation4 + $0xb8] sm:$0xff] %vm3191_vm2, %v3142_v9 }
 0x601   : > { %3210 = vst.msk [vmem:[#allocation4 + $0x90] sm:$0xff] %vm3191_vm2, %v3132_v39 }
 0x604   : > { %3685 = vrot.lane.b32.xlu1 %v3616_v15, %s4471_s24  ;;  %3492 = vrot.lane.b32.xlu2 %v3423_v21, %s4470_s23  ;;  %v3444_v15 = vld [vmem:[#allocation3 + $0x1e8] sm:$0xff] }
 0x605   : > { %3335 = vrot.lane.b32.xlu0 %v6009_v32, %s4469_s22  ;;  %v4416_v32 = vld [vmem:[%s6923_s3 + $0x8] sm:$0xff] }
 0x606   : > { %v3134_v13 = vpop.permute.xlu1 %3133  ;;  %v3322_v2 = vpop.permute.xlu2 %3321  ;;  %4425 = vmatpush.bf16.msra.mxu2 %v4416_v32  ;;  %3951 = vmatpush.bf16.msra.mxu1 %v4416_v32 }
 0x607   : > { %3211 = vst.msk [vmem:[#allocation4 + $0x98] sm:$0xff] %vm3191_vm2, %v3134_v13  ;;  %v3138_v48 = vpop.permute.xlu0 %3137 }
 0x608   : > { %3402 = vst.msk [vmem:[#allocation4 + $0x80] sm:$0xff] %vm3385_vm4, %v3322_v2 }
 0x609   : > { %3213 = vst.msk [vmem:[#allocation4 + $0xa8] sm:$0xff] %vm3191_vm2, %v3138_v48 }
 0x60a   : > { %4426 = vmatpush.bf16.msra.mxu2 %v4415_v8  ;;  %3952 = vmatpush.bf16.msra.mxu1 %v4415_v8 }
 0x60c   : > { %3526 = vrot.lane.b32.xlu1 %v3440_v5, %s4470_s23  ;;  %3333 = vrot.lane.b32.xlu2 %v3247_v29, %s4469_s22  ;;  %v3445_v5 = vld [vmem:[#allocation3 + $0x1f0] sm:$0xff] }
 0x60d   : > { %3719 = vrot.lane.b32.xlu0 %v3633_v52, %s4471_s24  ;;  %v3252_v29 = vld [vmem:[#allocation3 + $0x1ef] sm:$0xff] }
 0x60e   : > { %v3140_v28 = vpop.permute.xlu1 %3139  ;;  %v3517_v7 = vpop.permute.xlu2 %3516  ;;  %v3638_v52 = vld [vmem:[#allocation3 + $0x1f1] sm:$0xff] }
 0x60f   : > { %3214 = vst.msk [vmem:[#allocation4 + $0xb0] sm:$0xff] %vm3191_vm2, %v3140_v28  ;;  %v3144_v34 = vpop.permute.xlu0 %3143 }
 0x610   : > { %3216 = vst.msk [vmem:[#allocation4 + $0xc0] sm:$0xff] %vm3191_vm2, %v3144_v34  ;;  %v3235_v34 = vld [vmem:[#allocation3 + $0xe7] sm:$0xff] }
 0x614   : > { %3721 = vrot.lane.b32.xlu1 %v3634_v31, %s4471_s24  ;;  %3528 = vrot.lane.b32.xlu2 %v3441_v49, %s4470_s23  ;;  %v3637_v31 = vld [vmem:[#allocation3 + $0x1e9] sm:$0xff] }
 0x615   : > { %3303 = vrot.lane.b32.xlu0 %v3232_v61, %s4469_s22  ;;  %v3428_v49 = vld [vmem:[#allocation3 + $0xe8] sm:$0xff] }
 0x616   : > { %v3146_v22 = vpop.permute.xlu1 %3145  ;;  %v3290_v42 = vpop.permute.xlu2 %3289 }
 0x617   : > { %3217 = vst.msk [vmem:[#allocation4 + $0xc8] sm:$0xff] %vm3191_vm2, %v3146_v22  ;;  %v3324_v38 = vpop.permute.xlu0 %3323 }
 0x618   : > { %3386 = vst.msk [vmem:[#allocation4] sm:$0xff] %vm3385_vm4, %v3290_v42 }
 0x619   : > { %3403 = vst.msk [vmem:[#allocation4 + $0x88] sm:$0xff] %vm3385_vm4, %v3324_v38 }
 0x61a   : > { %3596 = vst.msk [vmem:[#allocation4 + $0x88] sm:$0xff] %vm3578_vm5, %v3517_v7 }
 0x61c   : > { %3494 = vrot.lane.b32.xlu1 %v3424_v45, %s4470_s23  ;;  %3301 = vrot.lane.b32.xlu2 %v3231_v4, %s4469_s22 }
 0x61d   : > { %3687 = vrot.lane.b32.xlu0 %v3617_v23, %s4471_s24  ;;  %v3429_v23 = vld [vmem:[#allocation3 + $0xf0] sm:$0xff] }
 0x61e   : > { %v3515_v12 = vpop.permute.xlu1 %3514  ;;  %v3485_v6 = vpop.permute.xlu2 %3484 }
 0x61f   : > { %3595 = vst.msk [vmem:[#allocation4 + $0x80] sm:$0xff] %vm3578_vm5, %v3515_v12  ;;  %v3708_v53 = vpop.permute.xlu0 %3707  ;;  %v3236_v12 = vld [vmem:[#allocation3 + $0xef] sm:$0xff] }
 0x620   : > { %3788 = vst.msk [vmem:[#allocation4 + $0x80] sm:$0xff] %vm3771_vm6, %v3708_v53 }
 0x624   : > { %3689 = vrot.lane.b32.xlu1 %v3618_v24, %s4471_s24  ;;  %3496 = vrot.lane.b32.xlu2 %v3425_v30, %s4470_s23 }
 0x625   : > { %3339 = vrot.lane.b32.xlu0 %v3250_v47, %s4469_s22  ;;  %v3621_v47 = vld [vmem:[#allocation3 + $0xe9] sm:$0xff] }
 0x626   : > { %v3710_v35 = vpop.permute.xlu1 %3709  ;;  %v3326_v1 = vpop.permute.xlu2 %3325 }
 0x627   : > { %3789 = vst.msk [vmem:[#allocation4 + $0x88] sm:$0xff] %vm3771_vm6, %v3710_v35  ;;  %v3292_v43 = vpop.permute.xlu0 %3291  ;;  %v3820_v51 = vld [vmem:[#allocation4 + $0x80] sm:$0xff] }
 0x628   : > { %3404 = vst.msk [vmem:[#allocation4 + $0x90] sm:$0xff] %vm3385_vm4, %v3326_v1  ;;  %v3253_v35 = vld [vmem:[#allocation3 + $0x207] sm:$0xff] }
 0x629   : > { %3387 = vst.msk [vmem:[#allocation4 + $0x8] sm:$0xff] %vm3385_vm4, %v3292_v43 }
 0x62a   : > { %3580 = vst.msk [vmem:[#allocation4 + $0x8] sm:$0xff] %vm3578_vm5, %v3485_v6  ;;  %v3622_v6 = vld [vmem:[#allocation3 + $0xf1] sm:$0xff] }
 0x62c   : > { %3530 = vrot.lane.b32.xlu1 %v3442_v55, %s4470_s23  ;;  %3337 = vrot.lane.b32.xlu2 %v3249_v36, %s4469_s22 }
 0x62d   : > { %3723 = vrot.lane.b32.xlu0 %v3635_v16, %s4471_s24 }
 0x62e   : > { %v3483_v3 = vpop.permute.xlu1 %3482  ;;  %v3521_v26 = vpop.permute.xlu2 %3520  ;;  %v3821_v56 = vld [vmem:[#allocation4 + $0x88] sm:$0xff] }
 0x62f   : > { %3579 = vst.msk [vmem:[#allocation4] sm:$0xff] %vm3578_vm5, %v3483_v3  ;;  %v3676_v11 = vpop.permute.xlu0 %3675  ;;  %v3844_v50 = vpack.c.bf16 %v3821_v56, %v3820_v51 }
 0x630   : > { %3772 = vst.msk [vmem:[#allocation4] sm:$0xff] %vm3771_vm6, %v3676_v11 }
 0x631   : > { %4402 = vmatmul.msk.bf16.vlgmr.msra.gmra.mxu2 %vm3892_vm7, %v3844_v50  ;;  %v3639_v50 = vld [vmem:[#allocation3 + $0x209] sm:$0xff] }
 0x634   : > { %3725 = vrot.lane.b32.xlu1 %v3636_v46, %s4471_s24  ;;  %3532 = vrot.lane.b32.xlu2 %v3443_v0, %s4470_s23 }
 0x635   : > { %3307 = vrot.lane.b32.xlu0 %v3234_v10, %s4469_s22 }
 0x636   : > { %v3678_v33 = vpop.permute.xlu1 %3677  ;;  %v3294_v25 = vpop.permute.xlu2 %3293 }
 0x637   : > { %3773 = vst.msk [vmem:[#allocation4 + $0x8] sm:$0xff] %vm3771_vm6, %v3678_v33  ;;  %v3328_v62 = vpop.permute.xlu0 %3327  ;;  %v3804_v60 = vld [vmem:[#allocation4] sm:$0xff] }
 0x638   : > { %3388 = vst.msk [vmem:[#allocation4 + $0x10] sm:$0xff] %vm3385_vm4, %v3294_v25 }
 0x639   : > { %3405 = vst.msk [vmem:[#allocation4 + $0x98] sm:$0xff] %vm3385_vm4, %v3328_v62 }
 0x63a   : > { %3598 = vst.msk [vmem:[#allocation4 + $0x98] sm:$0xff] %vm3578_vm5, %v3521_v26  ;;  %v3254_v26 = vld [vmem:[#allocation3 + $0x20f] sm:$0xff] }
 0x63c   : > { %3498 = vrot.lane.b32.xlu1 %v3426_v14, %s4470_s23  ;;  %3305 = vrot.lane.b32.xlu2 %v3233_v37, %s4469_s22  ;;  %v3238_v14 = vld [vmem:[#allocation3 + $0x10f] sm:$0xff] }
 0x63d   : > { %3691 = vrot.lane.b32.xlu0 %v3619_v44, %s4471_s24  ;;  %v3640_v37 = vld [vmem:[#allocation3 + $0x211] sm:$0xff] }
 0x63e   : > { %v3519_v63 = vpop.permute.xlu1 %3518  ;;  %v3489_v40 = vpop.permute.xlu2 %3488  ;;  %v3805_v41 = vld [vmem:[#allocation4 + $0x8] sm:$0xff] }
 0x63f   : > { %3597 = vst.msk [vmem:[#allocation4 + $0x90] sm:$0xff] %vm3578_vm5, %v3519_v63  ;;  %v3712_v20 = vpop.permute.xlu0 %3711  ;;  %v3836_v19 = vpack.c.bf16 %v3805_v41, %v3804_v60  ;;  %v3623_v60 = vld [vmem:[#allocation3 + $0x109] sm:$0xff] }
 0x640   : > { %3790 = vst.msk [vmem:[#allocation4 + $0x90] sm:$0xff] %vm3771_vm6, %v3712_v20  ;;  %v3430_v41 = vld [vmem:[#allocation3 + $0x108] sm:$0xff] }
 0x641   : > { %4394 = vmatmul.msk.bf16.vlgmr.msra.gmra.mxu1 %vm3892_vm7, %v3836_v19 }
 0x644   : > { %3693 = vrot.lane.b32.xlu1 %v3620_v18, %s4471_s24  ;;  %3500 = vrot.lane.b32.xlu2 %v3427_v57, %s4470_s23 }
 0x645   : > { %3149 = vrot.lane.b32.xlu0 %v3636_v46, %s4468_s21  ;;  %v3237_v46 = vld [vmem:[#allocation3 + $0x107] sm:$0xff] }
 0x646   : > { %v3714_v9 = vpop.permute.xlu1 %3713  ;;  %v3330_v39 = vpop.permute.xlu2 %3329 }
 0x647   : > { %3791 = vst.msk [vmem:[#allocation4 + $0x98] sm:$0xff] %vm3771_vm6, %v3714_v9  ;;  %v3296_v27 = vpop.permute.xlu0 %3295  ;;  %v3822_v13 = vld [vmem:[#allocation4 + $0x90] sm:$0xff] }
 0x648   : > { %3406 = vst.msk [vmem:[#allocation4 + $0xa0] sm:$0xff] %vm3385_vm4, %v3330_v39 }
 0x649   : > { %3389 = vst.msk [vmem:[#allocation4 + $0x18] sm:$0xff] %vm3385_vm4, %v3296_v27  ;;  %v3256_v27 = vld [vmem:[#allocation3 + $0x22f] sm:$0xff] }
 0x64a   : > { %3582 = vst.msk [vmem:[#allocation4 + $0x18] sm:$0xff] %vm3578_vm5, %v3489_v40 }
 0x64c   : > { %3341 = vrot.lane.b32.xlu1 %v3251_v59, %s4469_s22  ;;  %3147 = vrot.lane.b32.xlu2 %v3635_v16, %s4468_s21  ;;  %v3624_v59 = vld [vmem:[#allocation3 + $0x111] sm:$0xff] }
 0x64d   : > { %3534 = vrot.lane.b32.xlu0 %v3444_v15, %s4470_s23 }
 0x64e   : > { %v3487_v21 = vpop.permute.xlu1 %3486  ;;  %v3525_v54 = vpop.permute.xlu2 %3524  ;;  %v3823_v2 = vld [vmem:[#allocation4 + $0x98] sm:$0xff] }
 0x64f   : > { %3581 = vst.msk [vmem:[#allocation4 + $0x10] sm:$0xff] %vm3578_vm5, %v3487_v21  ;;  %v3680_v48 = vpop.permute.xlu0 %3679  ;;  %v3845_v32 = vpack.c.bf16 %v3823_v2, %v3822_v13  ;;  %v3448_v13 = vld [vmem:[#allocation3 + $0x228] sm:$0xff] }
 0x650   : > { %3774 = vst.msk [vmem:[#allocation4 + $0x10] sm:$0xff] %vm3771_vm6, %v3680_v48  ;;  %v3255_v2 = vld [vmem:[#allocation3 + $0x227] sm:$0xff] }
 0x651   : > { %4403 = vmatmul.msk.bf16.gmra.mxu2 %vm3892_vm7, %v3845_v32  ;;  %v3641_v48 = vld [vmem:[#allocation3 + $0x229] sm:$0xff] }
 0x654   : > { %3536 = vrot.lane.b32.xlu1 %v3445_v5, %s4470_s23  ;;  %3343 = vrot.lane.b32.xlu2 %v3252_v29, %s4469_s22 }
 0x655   : > { %3729 = vrot.lane.b32.xlu0 %v3638_v52, %s4471_s24 }
 0x656   : > { %v3682_v8 = vpop.permute.xlu1 %3681  ;;  %v3298_v28 = vpop.permute.xlu2 %3297 }
 0x657   : > { %3775 = vst.msk [vmem:[#allocation4 + $0x18] sm:$0xff] %vm3771_vm6, %v3682_v8  ;;  %v3332_v7 = vpop.permute.xlu0 %3331  ;;  %v3806_v42 = vld [vmem:[#allocation4 + $0x10] sm:$0xff] }
 0x658   : > { %3390 = vst.msk [vmem:[#allocation4 + $0x20] sm:$0xff] %vm3385_vm4, %v3298_v28 }
 0x659   : > { %3407 = vst.msk [vmem:[#allocation4 + $0xa8] sm:$0xff] %vm3385_vm4, %v3332_v7  ;;  %v3642_v7 = vld [vmem:[#allocation3 + $0x231] sm:$0xff] }
 0x65a   : > { %3600 = vst.msk [vmem:[#allocation4 + $0xa8] sm:$0xff] %vm3578_vm5, %v3525_v54 }
 0x65c   : > { %3309 = vrot.lane.b32.xlu1 %v3235_v34, %s4469_s22  ;;  %3727 = vrot.lane.b32.xlu2 %v3637_v31, %s4471_s24  ;;  %v3449_v34 = vld [vmem:[#allocation3 + $0x230] sm:$0xff] }
 0x65d   : > { %3502 = vrot.lane.b32.xlu0 %v3428_v49, %s4470_s23 }
 0x65e   : > { %v3523_v61 = vpop.permute.xlu1 %3522  ;;  %v3493_v22 = vpop.permute.xlu2 %3492  ;;  %v3807_v38 = vld [vmem:[#allocation4 + $0x18] sm:$0xff] }
 0x65f   : > { %3599 = vst.msk [vmem:[#allocation4 + $0xa0] sm:$0xff] %vm3578_vm5, %v3523_v61  ;;  %v3716_v45 = vpop.permute.xlu0 %3715  ;;  %v3837_v4 = vpack.c.bf16 %v3807_v38, %v3806_v42  ;;  %v3432_v42 = vld [vmem:[#allocation3 + $0x128] sm:$0xff] }
 0x660   : > { %3792 = vst.msk [vmem:[#allocation4 + $0xa0] sm:$0xff] %vm3771_vm6, %v3716_v45  ;;  %v3239_v38 = vld [vmem:[#allocation3 + $0x127] sm:$0xff] }
 0x661   : > { %4395 = vmatmul.msk.bf16.gmra.mxu1 %vm3892_vm7, %v3837_v4  ;;  %v3625_v45 = vld [vmem:[#allocation3 + $0x129] sm:$0xff] }
 0x664   : > { %3504 = vrot.lane.b32.xlu1 %v3429_v23, %s4470_s23  ;;  %3311 = vrot.lane.b32.xlu2 %v3236_v12, %s4469_s22 }
 0x665   : > { %3697 = vrot.lane.b32.xlu0 %v3622_v6, %s4471_s24 }
 0x666   : > { %v3718_v53 = vpop.permute.xlu1 %3717  ;;  %v3334_v24 = vpop.permute.xlu2 %3333 }
 0x667   : > { %3793 = vst.msk [vmem:[#allocation4 + $0xa8] sm:$0xff] %vm3771_vm6, %v3718_v53  ;;  %v3300_v30 = vpop.permute.xlu0 %3299  ;;  %v3824_v55 = vld [vmem:[#allocation4 + $0xa0] sm:$0xff] }
 0x668   : > { %3408 = vst.msk [vmem:[#allocation4 + $0xb0] sm:$0xff] %vm3385_vm4, %v3334_v24 }
 0x669   : > { %3391 = vst.msk [vmem:[#allocation4 + $0x28] sm:$0xff] %vm3385_vm4, %v3300_v30  ;;  %v6768_v30 = vld [vmem:[%s6924_s4] ss:$0 sm:$0xff] }
 0x66a   : > { %3584 = vst.msk [vmem:[#allocation4 + $0x28] sm:$0xff] %vm3578_vm5, %v3493_v22 }
 0x66c   : > { %3151 = vrot.lane.b32.xlu1 %v3637_v31, %s4468_s21  ;;  %3695 = vrot.lane.b32.xlu2 %v3621_v47, %s4471_s24  ;;  %v3240_v31 = vld [vmem:[#allocation3 + $0x12f] sm:$0xff] }
 0x66d   : > { %3345 = vrot.lane.b32.xlu0 %v3253_v35, %s4469_s22  ;;  %v3626_v47 = vld [vmem:[#allocation3 + $0x131] sm:$0xff] }
 0x66e   : > { %v3491_v1 = vpop.permute.xlu1 %3490  ;;  %v3529_v43 = vpop.permute.xlu2 %3528  ;;  %v3825_v36 = vld [vmem:[#allocation4 + $0xa8] sm:$0xff]  ;;  %v3433_v35 = vld [vmem:[#allocation3 + $0x130] sm:$0xff] }
 0x66f   : > { %3583 = vst.msk [vmem:[#allocation4 + $0x20] sm:$0xff] %vm3578_vm5, %v3491_v1  ;;  %v3684_v16 = vpop.permute.xlu0 %3683  ;;  %v3846_v3 = vpack.c.bf16 %v3825_v36, %v3824_v55 }
 0x670   : > { %3776 = vst.msk [vmem:[#allocation4 + $0x20] sm:$0xff] %vm3771_vm6, %v3684_v16 }
 0x671   : > { %4404 = vmatmul.msk.bf16.gmra.mxu2 %vm3892_vm7, %v3846_v3 }
 0x674   : > { %3347 = vrot.lane.b32.xlu1 %v3254_v26, %s4469_s22  ;;  %3153 = vrot.lane.b32.xlu2 %v3638_v52, %s4468_s21 }
 0x675   : > { %3540 = vrot.lane.b32.xlu0 %v6449_v17, %s4470_s23 }
 0x676   : > { %v3686_v51 = vpop.permute.xlu1 %3685  ;;  %v3302_v56 = vpop.permute.xlu2 %3301 }
 0x677   : > { %3777 = vst.msk [vmem:[#allocation4 + $0x28] sm:$0xff] %vm3771_vm6, %v3686_v51  ;;  %v3336_v11 = vpop.permute.xlu0 %3335  ;;  %v3808_v10 = vld [vmem:[#allocation4 + $0x20] sm:$0xff] }
 0x678   : > { %3392 = vst.msk [vmem:[#allocation4 + $0x30] sm:$0xff] %vm3385_vm4, %v3302_v56 }
 0x679   : > { %3409 = vst.msk [vmem:[#allocation4 + $0xb8] sm:$0xff] %vm3385_vm4, %v3336_v11 }
 0x67a   : > { %3602 = vst.msk [vmem:[#allocation4 + $0xb8] sm:$0xff] %vm3578_vm5, %v3529_v43 }
 0x67c   : > { %3731 = vrot.lane.b32.xlu1 %v3639_v50, %s4471_s24  ;;  %3538 = vrot.lane.b32.xlu2 %v6438_v58, %s4470_s23  ;;  %v3431_v58 = vld [vmem:[#allocation3 + $0x110] sm:$0xff] }
 0x67d   : > { %3313 = vrot.lane.b32.xlu0 %v3237_v46, %s4469_s22 }
 0x67e   : > { %v3527_v17 = vpop.permute.xlu1 %3526  ;;  %v3497_v0 = vpop.permute.xlu2 %3496  ;;  %v3809_v33 = vld [vmem:[#allocation4 + $0x28] sm:$0xff] }
 0x67f   : > { %3601 = vst.msk [vmem:[#allocation4 + $0xb0] sm:$0xff] %vm3578_vm5, %v3527_v17  ;;  %v3720_v25 = vpop.permute.xlu0 %3719  ;;  %v3838_v62 = vpack.c.bf16 %v3809_v33, %v3808_v10 }
 0x680   : > { %3794 = vst.msk [vmem:[#allocation4 + $0xb0] sm:$0xff] %vm3771_vm6, %v3720_v25 }
 0x681   : > { %4396 = vmatmul.msk.bf16.gmra.mxu1 %vm3892_vm7, %v3838_v62 }
 0x684   : > { %3315 = vrot.lane.b32.xlu1 %v3238_v14, %s4469_s22  ;;  %3733 = vrot.lane.b32.xlu2 %v3640_v37, %s4471_s24 }
 0x685   : > { %3508 = vrot.lane.b32.xlu0 %v3431_v58, %s4470_s23 }
 0x686   : > { %v3722_v44 = vpop.permute.xlu1 %3721  ;;  %v3338_v63 = vpop.permute.xlu2 %3337 }
 0x687   : > { %3795 = vst.msk [vmem:[#allocation4 + $0xb8] sm:$0xff] %vm3771_vm6, %v3722_v44  ;;  %v3304_v40 = vpop.permute.xlu0 %3303  ;;  %v3826_v18 = vld [vmem:[#allocation4 + $0xb0] sm:$0xff] }
 0x688   : > { %3410 = vst.msk [vmem:[#allocation4 + $0xc0] sm:$0xff] %vm3385_vm4, %v3338_v63 }
 0x689   : > { %3393 = vst.msk [vmem:[#allocation4 + $0x38] sm:$0xff] %vm3385_vm4, %v3304_v40 }
 0x68a   : > { %3586 = vst.msk [vmem:[#allocation4 + $0x38] sm:$0xff] %vm3578_vm5, %v3497_v0 }
 0x68c   : > { %3699 = vrot.lane.b32.xlu1 %v3623_v60, %s4471_s24  ;;  %3506 = vrot.lane.b32.xlu2 %v3430_v41, %s4470_s23 }
 0x68d   : > { %3155 = vrot.lane.b32.xlu0 %v3639_v50, %s4468_s21 }
 0x68e   : > { %v3495_v20 = vpop.permute.xlu1 %3494  ;;  %v3533_v19 = vpop.permute.xlu2 %3532  ;;  %v3827_v57 = vld [vmem:[#allocation4 + $0xb8] sm:$0xff] }
 0x68f   : > { %3585 = vst.msk [vmem:[#allocation4 + $0x30] sm:$0xff] %vm3578_vm5, %v3495_v20  ;;  %v3688_v9 = vpop.permute.xlu0 %3687  ;;  %v3847_v39 = vpack.c.bf16 %v3827_v57, %v3826_v18 }
 0x690   : > { %3778 = vst.msk [vmem:[#allocation4 + $0x30] sm:$0xff] %vm3771_vm6, %v3688_v9 }
 0x691   : > { %4405 = vmatmul.msk.bf16.gmra.mxu2 %vm3892_vm7, %v3847_v39 }
 0x694   : > { %3157 = vrot.lane.b32.xlu1 %v3640_v37, %s4468_s21  ;;  %3701 = vrot.lane.b32.xlu2 %v3624_v59, %s4471_s24 }
 0x695   : > { %3351 = vrot.lane.b32.xlu0 %v3256_v27, %s4469_s22 }
 0x696   : > { %v3690_v15 = vpop.permute.xlu1 %3689  ;;  %v3306_v21 = vpop.permute.xlu2 %3305 }
 0x697   : > { %3779 = vst.msk [vmem:[#allocation4 + $0x38] sm:$0xff] %vm3771_vm6, %v3690_v15  ;;  %v3340_v54 = vpop.permute.xlu0 %3339  ;;  %v3810_v29 = vld [vmem:[#allocation4 + $0x30] sm:$0xff] }
 0x698   : > { %3394 = vst.msk [vmem:[#allocation4 + $0x40] sm:$0xff] %vm3385_vm4, %v3306_v21 }
 0x699   : > { %3411 = vst.msk [vmem:[#allocation4 + $0xc8] sm:$0xff] %vm3385_vm4, %v3340_v54 }
 0x69a   : > { %3604 = vst.msk [vmem:[#allocation4 + $0xc8] sm:$0xff] %vm3578_vm5, %v3533_v19 }
 0x69c   : > { %3542 = vrot.lane.b32.xlu1 %v3448_v13, %s4470_s23  ;;  %3349 = vrot.lane.b32.xlu2 %v3255_v2, %s4469_s22 }
 0x69d   : > { %3735 = vrot.lane.b32.xlu0 %v3641_v48, %s4471_s24 }
 0x69e   : > { %v3531_v32 = vpop.permute.xlu1 %3530  ;;  %v3501_v5 = vpop.permute.xlu2 %3500  ;;  %v3811_v52 = vld [vmem:[#allocation4 + $0x38] sm:$0xff] }
 0x69f   : > { %3603 = vst.msk [vmem:[#allocation4 + $0xc0] sm:$0xff] %vm3578_vm5, %v3531_v32  ;;  %v3724_v8 = vpop.permute.xlu0 %3723  ;;  %v3839_v28 = vpack.c.bf16 %v3811_v52, %v3810_v29 }
 0x6a0   : > { %3796 = vst.msk [vmem:[#allocation4 + $0xc0] sm:$0xff] %vm3771_vm6, %v3724_v8 }
 0x6a1   : > { %4397 = vmatmul.msk.bf16.gmra.mxu1 %vm3892_vm7, %v3839_v28 }
 0x6a4   : > { %3737 = vrot.lane.b32.xlu1 %v3642_v7, %s4471_s24  ;;  %3544 = vrot.lane.b32.xlu2 %v3449_v34, %s4470_s23 }
 0x6a5   : > { %3319 = vrot.lane.b32.xlu0 %v3240_v31, %s4469_s22 }
 0x6a6   : > { %v3726_v49 = vpop.permute.xlu1 %3725  ;;  %v3148_v61 = vpop.permute.xlu2 %3147 }
 0x6a7   : > { %3797 = vst.msk [vmem:[#allocation4 + $0xc8] sm:$0xff] %vm3771_vm6, %v3726_v49  ;;  %v3308_v22 = vpop.permute.xlu0 %3307  ;;  %v3828_v12 = vld [vmem:[#allocation4 + $0xc0] sm:$0xff] }
 0x6a8   : > { %3218 = vst.msk [vmem:[#allocation4 + $0xd0] sm:$0xff] %vm3191_vm2, %v3148_v61 }
 0x6a9   : > { %3395 = vst.msk [vmem:[#allocation4 + $0x48] sm:$0xff] %vm3385_vm4, %v3308_v22 }
 0x6aa   : > { %3588 = vst.msk [vmem:[#allocation4 + $0x48] sm:$0xff] %vm3578_vm5, %v3501_v5 }
 0x6ac   : > { %3510 = vrot.lane.b32.xlu1 %v3432_v42, %s4470_s23  ;;  %3317 = vrot.lane.b32.xlu2 %v3239_v38, %s4469_s22 }
 0x6ad   : > { %3703 = vrot.lane.b32.xlu0 %v3625_v45, %s4471_s24 }
 0x6ae   : > { %v3499_v4 = vpop.permute.xlu1 %3498  ;;  %v3344_v23 = vpop.permute.xlu2 %3343  ;;  %v3829_v6 = vld [vmem:[#allocation4 + $0xc8] sm:$0xff] }
 0x6af   : > { %3587 = vst.msk [vmem:[#allocation4 + $0x40] sm:$0xff] %vm3578_vm5, %v3499_v4  ;;  %v3692_v53 = vpop.permute.xlu0 %3691  ;;  %v3848_v24 = vpack.c.bf16 %v3829_v6, %v3828_v12 }
 0x6b0   : > { %3780 = vst.msk [vmem:[#allocation4 + $0x40] sm:$0xff] %vm3771_vm6, %v3692_v53 }
 0x6b1   : > { %4406 = vmatmul.msk.bf16.gmra.mxu2 %vm3892_vm7, %v3848_v24 }
 0x6b4   : > { %3705 = vrot.lane.b32.xlu1 %v3626_v47, %s4471_s24  ;;  %3512 = vrot.lane.b32.xlu2 %v3433_v35, %s4470_s23  ;;  %v3994_v1 = vpop.f32.mrf.mxu2 }
 0x6b5   : > { %v3995_v43 = vadd.f32 %v6768_v30, %v3994_v1 }
 0x6b6   : > { %v3694_v55 = vpop.permute.xlu1 %3693  ;;  %v3728_v36 = vpop.permute.xlu2 %3727 }
 0x6b7   : > { %v4050_v16 = vmax.f32 %v3995_v43, 0.0  ;;  %3781 = vst.msk [vmem:[#allocation4 + $0x48] sm:$0xff] %vm3771_vm6, %v3694_v55  ;;  %v3150_v3 = vpop.permute.xlu0 %3149  ;;  %v3812_v50 = vld [vmem:[#allocation4 + $0x40] sm:$0xff] }
 0x6b8   : > { %3219 = vst.msk [vmem:[#allocation4 + $0xd8] sm:$0xff] %vm3191_vm2, %v3150_v3 }
 0x6b9   : > { %4082 = vst.msk [vmem:[%s4513_s25 + $0x80] sm:$0xff] %vm2162_vm13, %v4050_v16 }
 0x6ba   : > { %3413 = vst.msk [vmem:[#allocation4 + $0xd8] sm:$0xff] %vm3385_vm4, %v3344_v23 }
 0x6bc   : > { %v3996_v26 = vpop.f32.mrf.mxu2 }
 0x6bd   : > { %v3997_v51 = vadd.f32 %v6768_v30, %v3996_v26 }
 0x6be   : > { %v3342_v56 = vpop.permute.xlu1 %3341  ;;  %v3312_v11 = vpop.permute.xlu2 %3311  ;;  %v3813_v46 = vld [vmem:[#allocation4 + $0x48] sm:$0xff] }
 0x6bf   : > { %v4051_v17 = vmax.f32 %v3997_v51, 0.0  ;;  %3412 = vst.msk [vmem:[#allocation4 + $0xd0] sm:$0xff] %vm3385_vm4, %v3342_v56  ;;  %v3954_v0 = vpop.f32.mrf.mxu1  ;;  %v3535_v10 = vpop.permute.xlu0 %3534  ;;  %v3840_v33 = vpack.c.bf16 %v3813_v46, %v3812_v50 }
 0x6c0   : > { %3397 = vst.msk [vmem:[#allocation4 + $0x58] sm:$0xff] %vm3385_vm4, %v3312_v11  ;;  %v3955_v25 = vadd.f32 %v6768_v30, %v3954_v0 }
 0x6c1   : > { %4083 = vst.msk [vmem:[%s4513_s25 + $0x88] sm:$0xff] %vm2162_vm13, %v4051_v17  ;;  %4398 = vmatmul.msk.bf16.gmra.mxu1 %vm3892_vm7, %v3840_v33 }
 0x6c2   : > { %v4034_v62 = vmax.f32 %v3955_v25, 0.0  ;;  %3605 = vst.msk [vmem:[#allocation4 + $0xd0] sm:$0xff] %vm3578_vm5, %v3535_v10 }
 0x6c3   : > { %3798 = vst.msk [vmem:[#allocation4 + $0xd0] sm:$0xff] %vm3771_vm6, %v3728_v36 }
 0x6c4   : > { %4066 = vst.msk [vmem:[%s4513_s25] sm:$0xff] %vm2162_vm13, %v4034_v62 }
 0x6c6   : > { %v3537_v14 = vpop.permute.xlu1 %3536  ;;  %v3696_v37 = vpop.permute.xlu2 %3695 }
 0x6c7   : > { %3606 = vst.msk [vmem:[#allocation4 + $0xd8] sm:$0xff] %vm3578_vm5, %v3537_v14  ;;  %v3956_v58 = vpop.f32.mrf.mxu1  ;;  %v3730_v44 = vpop.permute.xlu0 %3729 }
 0x6c8   : > { %v3957_v63 = vadd.f32 %v6768_v30, %v3956_v58  ;;  %3799 = vst.msk [vmem:[#allocation4 + $0xd8] sm:$0xff] %vm3771_vm6, %v3730_v44 }
 0x6ca   : > { %v4035_v40 = vmax.f32 %v3957_v63, 0.0  ;;  %v3830_v19 = vld [vmem:[#allocation4 + $0xd0] sm:$0xff] }
 0x6cc   : > { %4067 = vst.msk [vmem:[%s4513_s25 + $0x8] sm:$0xff] %vm2162_vm13, %v4035_v40 }
 0x6ce   : > { %v3310_v60 = vpop.permute.xlu1 %3309  ;;  %v3154_v41 = vpop.permute.xlu2 %3153 }
 0x6cf   : > { %3396 = vst.msk [vmem:[#allocation4 + $0x50] sm:$0xff] %vm3385_vm4, %v3310_v60  ;;  %v3503_v20 = vpop.permute.xlu0 %3502  ;;  %v3831_v18 = vld [vmem:[#allocation4 + $0xd8] sm:$0xff] }
 0x6d0   : > { %3221 = vst.msk [vmem:[#allocation4 + $0xe8] sm:$0xff] %vm3191_vm2, %v3154_v41  ;;  %v3849_v57 = vpack.c.bf16 %v3831_v18, %v3830_v19 }
 0x6d1   : > { %3589 = vst.msk [vmem:[#allocation4 + $0x50] sm:$0xff] %vm3578_vm5, %v3503_v20 }
 0x6d2   : > { %3782 = vst.msk [vmem:[#allocation4 + $0x50] sm:$0xff] %vm3771_vm6, %v3696_v37  ;;  %4407 = vmatmul.msk.bf16.gmra.mxu2 %vm3892_vm7, %v3849_v57 }
 0x6d4   : > { %v3999_v9 = vpop.f32.mrf.mxu2 }
 0x6d5   : > { %v4000_v39 = vadd.f32 %v6768_v30, %v3999_v9 }
 0x6d6   : > { %v3505_v27 = vpop.permute.xlu1 %3504  ;;  %v3539_v59 = vpop.permute.xlu2 %3538 }
 0x6d7   : > { %v4052_v15 = vmax.f32 %v4000_v39, 0.0  ;;  %3590 = vst.msk [vmem:[#allocation4 + $0x58] sm:$0xff] %vm3578_vm5, %v3505_v27  ;;  %v3698_v21 = vpop.permute.xlu0 %3697 }
 0x6d8   : > { %3783 = vst.msk [vmem:[#allocation4 + $0x58] sm:$0xff] %vm3771_vm6, %v3698_v21 }
 0x6d9   : > { %4084 = vst.msk [vmem:[%s4513_s25 + $0x90] sm:$0xff] %vm2162_vm13, %v4052_v15  ;;  %v3814_v52 = vld [vmem:[#allocation4 + $0x50] sm:$0xff] }
 0x6dc   : > { %v4001_v54 = vpop.f32.mrf.mxu2 }
 0x6dd   : > { %v4002_v13 = vadd.f32 %v6768_v30, %v4001_v54 }
 0x6de   : > { %v3152_v2 = vpop.permute.xlu1 %3151  ;;  %v3734_v48 = vpop.permute.xlu2 %3733 }
 0x6df   : > { %v4053_v32 = vmax.f32 %v4002_v13, 0.0  ;;  %3220 = vst.msk [vmem:[#allocation4 + $0xe0] sm:$0xff] %vm3191_vm2, %v3152_v2  ;;  %v3346_v5 = vpop.permute.xlu0 %3345  ;;  %v3959_v29 = vpop.f32.mrf.mxu1  ;;  %v3815_v8 = vld [vmem:[#allocation4 + $0x58] sm:$0xff] }
 0x6e0   : > { %3414 = vst.msk [vmem:[#allocation4 + $0xe0] sm:$0xff] %vm3385_vm4, %v3346_v5  ;;  %v3960_v28 = vadd.f32 %v6768_v30, %v3959_v29  ;;  %v3841_v7 = vpack.c.bf16 %v3815_v8, %v3814_v52 }
 0x6e1   : > { %4085 = vst.msk [vmem:[%s4513_s25 + $0x98] sm:$0xff] %vm2162_vm13, %v4053_v32 }
 0x6e2   : > { %3607 = vst.msk [vmem:[#allocation4 + $0xe0] sm:$0xff] %vm3578_vm5, %v3539_v59  ;;  %v4036_v34 = vmax.f32 %v3960_v28, 0.0  ;;  %4399 = vmatmul.msk.bf16.gmra.mxu1 %vm3892_vm7, %v3841_v7 }
 0x6e4   : > { %4068 = vst.msk [vmem:[%s4513_s25 + $0x10] sm:$0xff] %vm2162_vm13, %v4036_v34 }
 0x6e6   : > { %v3348_v31 = vpop.permute.xlu1 %3347  ;;  %v3507_v49 = vpop.permute.xlu2 %3506 }
 0x6e7   : > { %3415 = vst.msk [vmem:[#allocation4 + $0xe8] sm:$0xff] %vm3385_vm4, %v3348_v31  ;;  %v3541_v61 = vpop.permute.xlu0 %3540  ;;  %v3961_v22 = vpop.f32.mrf.mxu1 }
 0x6e8   : > { %3608 = vst.msk [vmem:[#allocation4 + $0xe8] sm:$0xff] %vm3578_vm5, %v3541_v61  ;;  %v3962_v42 = vadd.f32 %v6768_v30, %v3961_v22 }
 0x6e9   : > { %3801 = vst.msk [vmem:[#allocation4 + $0xe8] sm:$0xff] %vm3771_vm6, %v3734_v48 }
 0x6ea   : > { %v4037_v38 = vmax.f32 %v3962_v42, 0.0 }
 0x6ec   : > { %4069 = vst.msk [vmem:[%s4513_s25 + $0x18] sm:$0xff] %vm2162_vm13, %v4037_v38 }
 0x6ee   : > { %v3732_v45 = vpop.permute.xlu1 %3731  ;;  %v3702_v4 = vpop.permute.xlu2 %3701 }
 0x6ef   : > { %3800 = vst.msk [vmem:[#allocation4 + $0xe0] sm:$0xff] %vm3771_vm6, %v3732_v45  ;;  %v3314_v23 = vpop.permute.xlu0 %3313 }
 0x6f0   : > { %3398 = vst.msk [vmem:[#allocation4 + $0x60] sm:$0xff] %vm3385_vm4, %v3314_v23  ;;  %v3833_v35 = vld [vmem:[#allocation4 + $0xe8] sm:$0xff] }
 0x6f1   : > { %3591 = vst.msk [vmem:[#allocation4 + $0x60] sm:$0xff] %vm3578_vm5, %v3507_v49 }
 0x6f4   : > { %v4004_v12 = vpop.f32.mrf.mxu2 }
 0x6f5   : > { %v4005_v6 = vadd.f32 %v6768_v30, %v4004_v12 }
 0x6f6   : > { %v3316_v53 = vpop.permute.xlu1 %3315  ;;  %v3350_v24 = vpop.permute.xlu2 %3349  ;;  %v3832_v47 = vld [vmem:[#allocation4 + $0xe0] sm:$0xff] }
 0x6f7   : > { %v4054_v1 = vmax.f32 %v4005_v6, 0.0  ;;  %3399 = vst.msk [vmem:[#allocation4 + $0x68] sm:$0xff] %vm3385_vm4, %v3316_v53  ;;  %v3509_v43 = vpop.permute.xlu0 %3508  ;;  %v3850_v55 = vpack.c.bf16 %v3833_v35, %v3832_v47 }
 0x6f8   : > { %3592 = vst.msk [vmem:[#allocation4 + $0x68] sm:$0xff] %vm3578_vm5, %v3509_v43 }
 0x6f9   : > { %4086 = vst.msk [vmem:[%s4513_s25 + $0xa0] sm:$0xff] %vm2162_vm13, %v4054_v1  ;;  %4408 = vmatmul.msk.bf16.gmra.mxu2 %vm3892_vm7, %v3850_v55 }
 0x6fa   : > { %3785 = vst.msk [vmem:[#allocation4 + $0x68] sm:$0xff] %vm3771_vm6, %v3702_v4 }
 0x6fc   : > { %v4006_v36 = vpop.f32.mrf.mxu2 }
 0x6fd   : > { %v4007_v16 = vadd.f32 %v6768_v30, %v4006_v36 }
 0x6fe   : > { %v3700_v3 = vpop.permute.xlu1 %3699  ;;  %v3545_v26 = vpop.permute.xlu2 %3544 }
 0x6ff   : > { %v4055_v51 = vmax.f32 %v4007_v16, 0.0  ;;  %3784 = vst.msk [vmem:[#allocation4 + $0x60] sm:$0xff] %vm3771_vm6, %v3700_v3  ;;  %v3156_v56 = vpop.permute.xlu0 %3155  ;;  %v3964_v11 = vpop.f32.mrf.mxu1 }
 0x700   : > { %3222 = vst.msk [vmem:[#allocation4 + $0xf0] sm:$0xff] %vm3191_vm2, %v3156_v56  ;;  %v3965_v50 = vadd.f32 %v6768_v30, %v3964_v11 }
 0x701   : > { %4087 = vst.msk [vmem:[%s4513_s25 + $0xa8] sm:$0xff] %vm2162_vm13, %v4055_v51  ;;  %v3817_v33 = vld [vmem:[#allocation4 + $0x68] sm:$0xff] }
 0x702   : > { %3416 = vst.msk [vmem:[#allocation4 + $0xf0] sm:$0xff] %vm3385_vm4, %v3350_v24  ;;  %v4038_v46 = vmax.f32 %v3965_v50, 0.0 }
 0x704   : > { %4070 = vst.msk [vmem:[%s4513_s25 + $0x20] sm:$0xff] %vm2162_vm13, %v4038_v46 }
 0x706   : > { %v3158_v17 = vpop.permute.xlu1 %3157  ;;  %v3318_v0 = vpop.permute.xlu2 %3317  ;;  %v3816_v10 = vld [vmem:[#allocation4 + $0x60] sm:$0xff] }
 0x707   : > { %3223 = vst.msk [vmem:[#allocation4 + $0xf8] sm:$0xff] %vm3191_vm2, %v3158_v17  ;;  %v3352_v25 = vpop.permute.xlu0 %3351  ;;  %v3966_v62 = vpop.f32.mrf.mxu1  ;;  %v3842_v14 = vpack.c.bf16 %v3817_v33, %v3816_v10 }
 0x708   : > { %3400 = vst.msk [vmem:[#allocation4 + $0x70] sm:$0xff] %vm3385_vm4, %v3318_v0  ;;  %v3967_v37 = vadd.f32 %v6768_v30, %v3966_v62 }
 0x709   : > { %3417 = vst.msk [vmem:[#allocation4 + $0xf8] sm:$0xff] %vm3385_vm4, %v3352_v25  ;;  %4400 = vmatmul.msk.bf16.gmra.mxu1 %vm3892_vm7, %v3842_v14 }
 0x70a   : > { %3610 = vst.msk [vmem:[#allocation4 + $0xf8] sm:$0xff] %vm3578_vm5, %v3545_v26  ;;  %v4039_v58 = vmax.f32 %v3967_v37, 0.0 }
 0x70c   : > { %4071 = vst.msk [vmem:[%s4513_s25 + $0x28] sm:$0xff] %vm2162_vm13, %v4039_v58 }
 0x70e   : > { %v3543_v44 = vpop.permute.xlu1 %3542  ;;  %v3513_v18 = vpop.permute.xlu2 %3512 }
 0x70f   : > { %3609 = vst.msk [vmem:[#allocation4 + $0xf0] sm:$0xff] %vm3578_vm5, %v3543_v44  ;;  %v3736_v63 = vpop.permute.xlu0 %3735 }
 0x710   : > { %3802 = vst.msk [vmem:[#allocation4 + $0xf0] sm:$0xff] %vm3771_vm6, %v3736_v63 }
 0x714   : > { %v4009_v40 = vpop.f32.mrf.mxu2 }
 0x715   : > { %v4010_v60 = vadd.f32 %v6768_v30, %v4009_v40 }
 0x716   : > { %v3738_v41 = vpop.permute.xlu1 %3737 }
 0x717   : > { %v4056_v20 = vmax.f32 %v4010_v60, 0.0  ;;  %3803 = vst.msk [vmem:[#allocation4 + $0xf8] sm:$0xff] %vm3771_vm6, %v3738_v41  ;;  %v3320_v19 = vpop.permute.xlu0 %3319  ;;  %v3834_v9 = vld [vmem:[#allocation4 + $0xf0] sm:$0xff] }
 0x718   : > { %3401 = vst.msk [vmem:[#allocation4 + $0x78] sm:$0xff] %vm3385_vm4, %v3320_v19 }
 0x719   : > { %4088 = vst.msk [vmem:[%s4513_s25 + $0xb0] sm:$0xff] %vm2162_vm13, %v4056_v20 }
 0x71a   : > { %3594 = vst.msk [vmem:[#allocation4 + $0x78] sm:$0xff] %vm3578_vm5, %v3513_v18 }
 0x71c   : > { %v4011_v57 = vpop.f32.mrf.mxu2 }
 0x71d   : > { %v4012_v39 = vadd.f32 %v6768_v30, %v4011_v57 }
 0x71e   : > { %v3511_v27 = vpop.permute.xlu1 %3510  ;;  %v3969_v59 = vpop.f32.mrf.mxu1  ;;  %v3835_v15 = vld [vmem:[#allocation4 + $0xf8] sm:$0xff] }
 0x71f   : > { %v4057_v21 = vmax.f32 %v4012_v39, 0.0  ;;  %3593 = vst.msk [vmem:[#allocation4 + $0x70] sm:$0xff] %vm3578_vm5, %v3511_v27  ;;  %v3704_v54 = vpop.permute.xlu0 %3703  ;;  %v3970_v13 = vadd.f32 %v6768_v30, %v3969_v59  ;;  %v3851_v2 = vpack.c.bf16 %v3835_v15, %v3834_v9 }
 0x720   : > { %3786 = vst.msk [vmem:[#allocation4 + $0x70] sm:$0xff] %vm3771_vm6, %v3704_v54 }
 0x721   : > { %4089 = vst.msk [vmem:[%s4513_s25 + $0xb8] sm:$0xff] %vm2162_vm13, %v4057_v21  ;;  %v4040_v48 = vmax.f32 %v3970_v13, 0.0  ;;  %4409 = vmatmul.msk.bf16.gmra.mxu2 %vm3892_vm7, %v3851_v2 }
 0x723   : > { %4072 = vst.msk [vmem:[%s4513_s25 + $0x30] sm:$0xff] %vm2162_vm13, %v4040_v48 }
 0x726   : > { %v3706_v32 = vpop.permute.xlu1 %3705  ;;  %v3971_v5 = vpop.f32.mrf.mxu1 }
 0x727   : > { %3787 = vst.msk [vmem:[#allocation4 + $0x78] sm:$0xff] %vm3771_vm6, %v3706_v32  ;;  %v3972_v29 = vadd.f32 %v6768_v30, %v3971_v5  ;;  %v3818_v8 = vld [vmem:[#allocation4 + $0x70] sm:$0xff] }
 0x729   : > { %v4041_v52 = vmax.f32 %v3972_v29, 0.0 }
 0x72b   : > { %4073 = vst.msk [vmem:[%s4513_s25 + $0x38] sm:$0xff] %vm2162_vm13, %v4041_v52 }
 0x72e   : > { %v3819_v28 = vld [vmem:[#allocation4 + $0x78] sm:$0xff] }
 0x72f   : > { %v3843_v7 = vpack.c.bf16 %v3819_v28, %v3818_v8 }
 0x731   : > { %4401 = vmatmul.msk.bf16.gmra.mxu1 %vm3892_vm7, %v3843_v7 }
 0x734   : > { %v4014_v34 = vpop.f32.mrf.mxu2 }
 0x735   : > { %v4015_v31 = vadd.f32 %v6768_v30, %v4014_v34 }
 0x737   : > { %v4058_v49 = vmax.f32 %v4015_v31, 0.0 }
 0x739   : > { %4090 = vst.msk [vmem:[%s4513_s25 + $0xc0] sm:$0xff] %vm2162_vm13, %v4058_v49 }
 0x73c   : > { %v4016_v61 = vpop.f32.mrf.mxu2 }
 0x73d   : > { %v4017_v22 = vadd.f32 %v6768_v30, %v4016_v61 }
 0x73e   : > { %v3974_v42 = vpop.f32.mrf.mxu1 }
 0x73f   : > { %v4059_v38 = vmax.f32 %v4017_v22, 0.0  ;;  %v3975_v45 = vadd.f32 %v6768_v30, %v3974_v42 }
 0x741   : > { %4091 = vst.msk [vmem:[%s4513_s25 + $0xc8] sm:$0xff] %vm2162_vm13, %v4059_v38  ;;  %v4042_v4 = vmax.f32 %v3975_v45, 0.0 }
 0x743   : > { %4074 = vst.msk [vmem:[%s4513_s25 + $0x40] sm:$0xff] %vm2162_vm13, %v4042_v4 }
 0x746   : > { %v3976_v23 = vpop.f32.mrf.mxu1 }
 0x747   : > { %v3977_v12 = vadd.f32 %v6768_v30, %v3976_v23 }
 0x749   : > { %v4043_v6 = vmax.f32 %v3977_v12, 0.0 }
 0x74b   : > { %4075 = vst.msk [vmem:[%s4513_s25 + $0x48] sm:$0xff] %vm2162_vm13, %v4043_v6 }
 0x755   : > { %v4019_v53 = vpop.f32.mrf.mxu2 }
 0x756   : > { %v4020_v24 = vadd.f32 %v6768_v30, %v4019_v53 }
 0x758   : > { %v4060_v47 = vmax.f32 %v4020_v24, 0.0 }
 0x75a   : > { %4092 = vst.msk [vmem:[%s4513_s25 + $0xd0] sm:$0xff] %vm2162_vm13, %v4060_v47 }
 0x75d   : > { %v4021_v35 = vpop.f32.mrf.mxu2 }
 0x75e   : > { %v4022_v1 = vadd.f32 %v6768_v30, %v4021_v35 }
 0x75f   : > { %v3979_v43 = vpop.f32.mrf.mxu1 }
 0x760   : > { %v4061_v55 = vmax.f32 %v4022_v1, 0.0  ;;  %v3980_v36 = vadd.f32 %v6768_v30, %v3979_v43 }
 0x762   : > { %4093 = vst.msk [vmem:[%s4513_s25 + $0xd8] sm:$0xff] %vm2162_vm13, %v4061_v55  ;;  %v4044_v16 = vmax.f32 %v3980_v36, 0.0 }
 0x764   : > { %4076 = vst.msk [vmem:[%s4513_s25 + $0x50] sm:$0xff] %vm2162_vm13, %v4044_v16 }
 0x767   : > { %v3981_v3 = vpop.f32.mrf.mxu1 }
 0x768   : > { %v3982_v26 = vadd.f32 %v6768_v30, %v3981_v3 }
 0x76a   : > { %v4045_v51 = vmax.f32 %v3982_v26, 0.0 }
 0x76c   : > { %4077 = vst.msk [vmem:[%s4513_s25 + $0x58] sm:$0xff] %vm2162_vm13, %v4045_v51 }
 0x77c   : > { %v4024_v56 = vpop.f32.mrf.mxu2 }
 0x77d   : > { %v4025_v11 = vadd.f32 %v6768_v30, %v4024_v56 }
 0x77f   : > { %v4062_v50 = vmax.f32 %v4025_v11, 0.0 }
 0x781   : > { %4094 = vst.msk [vmem:[%s4513_s25 + $0xe0] sm:$0xff] %vm2162_vm13, %v4062_v50 }
 0x784   : > { %v4026_v46 = vpop.f32.mrf.mxu2 }
 0x785   : > { %v4027_v17 = vadd.f32 %v6768_v30, %v4026_v46 }
 0x786   : > { %v3984_v0 = vpop.f32.mrf.mxu1 }
 0x787   : > { %v4063_v10 = vmax.f32 %v4027_v17, 0.0  ;;  %v3985_v33 = vadd.f32 %v6768_v30, %v3984_v0 }
 0x789   : > { %4095 = vst.msk [vmem:[%s4513_s25 + $0xe8] sm:$0xff] %vm2162_vm13, %v4063_v10  ;;  %v4046_v25 = vmax.f32 %v3985_v33, 0.0 }
 0x78b   : > { %4078 = vst.msk [vmem:[%s4513_s25 + $0x60] sm:$0xff] %vm2162_vm13, %v4046_v25 }
 0x78e   : > { %v3986_v62 = vpop.f32.mrf.mxu1 }
 0x78f   : > { %v3987_v14 = vadd.f32 %v6768_v30, %v3986_v62 }
 0x791   : > { %v4047_v37 = vmax.f32 %v3987_v14, 0.0 }
 0x793   : > { %4079 = vst.msk [vmem:[%s4513_s25 + $0x68] sm:$0xff] %vm2162_vm13, %v4047_v37 }
 0x7a4   : > { %v4029_v58 = vpop.f32.mrf.mxu2 }
 0x7a5   : > { %v4030_v44 = vadd.f32 %v6768_v30, %v4029_v58 }
 0x7a7   : > { %v4064_v63 = vmax.f32 %v4030_v44, 0.0 }
 0x7a9   : > { %4096 = vst.msk [vmem:[%s4513_s25 + $0xf0] sm:$0xff] %vm2162_vm13, %v4064_v63 }
 0x7ac   : > { %v4031_v40 = vpop.f32.mrf.mxu2 }
 0x7ad   : > { %v4032_v60 = vadd.f32 %v6768_v30, %v4031_v40 }
 0x7ae   : > { %v3989_v41 = vpop.f32.mrf.mxu1 }
 0x7af   : > { %v4065_v20 = vmax.f32 %v4032_v60, 0.0  ;;  %v3990_v19 = vadd.f32 %v6768_v30, %v3989_v41 }
 0x7b1   : > { %4097 = vst.msk [vmem:[%s4513_s25 + $0xf8] sm:$0xff] %vm2162_vm13, %v4065_v20  ;;  %v4048_v18 = vmax.f32 %v3990_v19, 0.0 }
 0x7b3   : > { %4080 = vst.msk [vmem:[%s4513_s25 + $0x70] sm:$0xff] %vm2162_vm13, %v4048_v18 }
 0x7b6   : > { %v3991_v57 = vpop.f32.mrf.mxu1 }
 0x7b7   : > { %v3992_v9 = vadd.f32 %v6768_v30, %v3991_v57 }
 0x7b9   : > { %v4049_v39 = vmax.f32 %v3992_v9, 0.0 }
 0x7bb   : > { %4081 = vst.msk [vmem:[%s4513_s25 + $0x78] sm:$0xff] %vm2162_vm13, %v4049_v39 }
 0x7bc PF: > { %s15_s18 = sadd.s32 1, %s4457_s18  }
 0x7bd   : > { %p12_p5 = scmp.ge.s32.totalorder %s15_s18, 4  }
 0x7bf   :  { %14 = sbr.rel (!%p12_p5) target bundleno = 1 (0x1), region = 78 }

</bundles_post_ra>
